<compile_context>
chip_gen: v6e
topology: v6e:2x2x1
jax: 0.10.0
libtpu: 0.0.40
codegen_flags: <defaults>
</compile_context>

<pallas_src>
import functools

import jax
import jax.numpy as jnp
from jax import lax
from jax.experimental import pallas as pl
from jax.experimental.pallas import tpu as pltpu


# ----------------------------------------------------------------------------
# Fused RRDB kernel: one grid step == one batch element, full spatial extent.
# ----------------------------------------------------------------------------
def _rrdb_kernel(*refs, H, W, nf, gc, compute_dtype):
    # refs = (x_ref, w1, b1, ..., w15, b15, o_ref, patch_buf)
    #   x_ref     : (1, nf, H*W)                 f32
    #   w_k       : (Cout_k, 9*Cin_k)            compute_dtype (chunked im2col weights)
    #   b_k       : (Cout_k, 1)                  f32
    #   o_ref     : (1, nf, H*W)                 f32
    #   patch_buf : (9*(nf+4*gc), H*W)           f32 VMEM scratch (im2col bank)
    x_ref = refs[0]
    o_ref = refs[-2]
    buf = refs[-1]
    wb = refs[1:-2]
    assert len(wb) == 30  # 15 convs x (weight, bias)
    HW = H * W

    # Source-side column masks (row wrap is handled by the zero lane-halo):
    #   * ox = +1 taps wrongly pull source column 0   when wrapping -> zero it
    #   * ox = -1 taps wrongly pull source column W-1 when wrapping -> zero it
    col = lax.broadcasted_iota(jnp.int32, (1, HW), 1) % W
    m_for_left = (col <= W - 2).astype(jnp.float32)    # used for ox = -1 taps
    m_for_right = (col >= 1).astype(jnp.float32)       # used for ox = +1 taps

    def write_taps(feat, base):
        """feat: (C, H*W) f32. Write its 9 shifted taps (9*C rows) at buf[base:]."""
        c = feat.shape[0]
        halo = jnp.zeros((c, W + 1), jnp.float32)
        variants = {
            -1: jnp.concatenate([halo, feat * m_for_left, halo], axis=1),
            0: jnp.concatenate([halo, feat, halo], axis=1),
            1: jnp.concatenate([halo, feat * m_for_right, halo], axis=1),
        }
        taps = []
        for oy in (-1, 0, 1):          # tap order = (ky, kx) row-major
            for ox in (-1, 0, 1):
                start = (W + 1) + oy * W + ox
                # tap[:, p] == feat[:, p + oy*W + ox] inside, 0 on the halo.
                taps.append(variants[ox][:, start:start + HW])
        buf[pl.ds(base, 9 * c), :] = jnp.concatenate(taps, axis=0)

    def conv(conv_idx, k_rows, lrelu):
        """One 3x3 SAME conv from the patch bank: single MXU matmul + bias (+LReLU)."""
        w_ref, b_ref = wb[2 * conv_idx], wb[2 * conv_idx + 1]
        patches = buf[pl.ds(0, k_rows), :].astype(compute_dtype)   # (9*Cin, HW) bf16
        acc = jnp.dot(w_ref[...], patches, preferred_element_type=jnp.float32)
        acc = acc + b_ref[...]                                     # (Cout,1) broadcast
        if lrelu:
            acc = jnp.maximum(acc, 0.2 * acc)                      # LeakyReLU(0.2)
        return acc

    x = x_ref[0].astype(jnp.float32)          # (nf, H*W); residual path kept in f32
    cur = x
    ci = 0
    for _rdb in range(3):                     # RDB1, RDB2, RDB3
        inp = cur
        write_taps(inp, 0)                    # chunk 0: RDB input (nf channels)
        for i in range(5):
            k_rows = 9 * (nf + i * gc)        # growing prefix of the patch bank
            y = conv(ci, k_rows, lrelu=(i < 4))
            ci += 1
            if i < 4:
                write_taps(y, 9 * (nf + i * gc))   # append chunk i+1 (gc channels)
            else:
                cur = y * 0.2 + inp           # fused RDB residual
    out = cur * 0.2 + x                       # fused RRDB residual
    o_ref[0] = out.astype(o_ref.dtype)


# ----------------------------------------------------------------------------
# Host-side weight packing: chunked im2col layout matching the patch bank.
#   K ordering = [chunk0 | chunk1 | ...], each chunk = tap-major, channel-minor.
# ----------------------------------------------------------------------------
def _im2col_weight(w_hwio, chunk_sizes, compute_dtype):
    cout = w_hwio.shape[3]
    blocks, off = [], 0
    for sz in chunk_sizes:
        wc = w_hwio[:, :, off:off + sz, :]                       # (3,3,sz,cout)
        wc = jnp.transpose(wc, (3, 0, 1, 2)).reshape(cout, 9 * sz)
        blocks.append(wc)
        off += sz
    return jnp.concatenate(blocks, axis=1).astype(compute_dtype)


# ----------------------------------------------------------------------------
# Wrapper: NCHW in -> NCHW out, single pallas_call for the whole RRDB.
# ----------------------------------------------------------------------------
def rrdb_forward_nchw(x_nchw, params, *, compute_dtype=jnp.bfloat16):
    N, C, H, W = x_nchw.shape
    nf = C
    gc = params[0]["w1"].shape[3]
    HW = H * W
    x2 = x_nchw.reshape(N, C, HW)             # free reshape, keeps NCHW layout

    flat_inputs = [x2]
    in_specs = [pl.BlockSpec((1, C, HW), lambda n: (n, 0, 0))]
    for block in params:                      # 3 RDBs x 5 convs
        for i in range(1, 6):
            w = block[f"w{i}"]                # HWIO (3, 3, Cin, Cout)
            cin, cout = w.shape[2], w.shape[3]
            chunk_sizes = [nf] + [gc] * (i - 1)
            assert sum(chunk_sizes) == cin
            w_mat = _im2col_weight(w, chunk_sizes, compute_dtype)   # (Cout, 9*Cin)
            b = block[f"b{i}"].reshape(cout, 1).astype(jnp.float32)
            flat_inputs += [w_mat, b]
            in_specs += [pl.BlockSpec((cout, 9 * cin), lambda n: (0, 0)),
                         pl.BlockSpec((cout, 1), lambda n: (0, 0))]

    kernel = functools.partial(_rrdb_kernel, H=H, W=W, nf=nf, gc=gc,
                               compute_dtype=compute_dtype)
    out = pl.pallas_call(
        kernel,
        out_shape=jax.ShapeDtypeStruct((N, C, HW), x_nchw.dtype),
        grid=(N,),
        in_specs=in_specs,
        out_specs=pl.BlockSpec((1, C, HW), lambda n: (n, 0, 0)),
        scratch_shapes=[pltpu.VMEM((9 * (nf + 4 * gc), HW), jnp.float32)],
        compiler_params=pltpu.CompilerParams(
            dimension_semantics=("parallel",)),
    )(*flat_inputs)
    return out.reshape(N, C, H, W)


# ----------------------------------------------------------------------------
# Deterministic parameter init (mirrors conv shapes; scale 0.1 like
# mutil.initialize_weights(..., 0.1) in the reference).  Weights kept in HWIO.
# ----------------------------------------------------------------------------
def init_rrdb_params(key, nf, gc):
    params = []
    for _ in range(3):  # RDB1, RDB2, RDB3
        cins = [nf, nf + gc, nf + 2 * gc, nf + 3 * gc, nf + 4 * gc]
        couts = [gc, gc, gc, gc, nf]
        block = {}
        for i, (cin, cout) in enumerate(zip(cins, couts), start=1):
            key, kw, kb = jax.random.split(key, 3)
            fan_in = 3 * 3 * cin
            w = jax.random.normal(kw, (3, 3, cin, cout), jnp.float32)
            w = w * (0.1 * (2.0 / fan_in) ** 0.5)
            b = 0.01 * jax.random.normal(kb, (cout,), jnp.float32)
            block[f"w{i}"] = w
            block[f"b{i}"] = b
        params.append(block)
    return params


# ----------------------------------------------------------------------------
# Pure-JAX f32 reference (lax.conv) for correctness checking.
# ----------------------------------------------------------------------------
def _conv_ref(x, w, b, lrelu):
    y = lax.conv_general_dilated(
        x, w, window_strides=(1, 1), padding="SAME",
        dimension_numbers=("NHWC", "HWIO", "NHWC"))
    y = y + b
    if lrelu:
        y = jnp.where(y > 0, y, 0.2 * y)
    return y


def _rdb_ref(x, p):
    x1 = _conv_ref(x, p["w1"], p["b1"], True)
    x2 = _conv_ref(jnp.concatenate([x, x1], -1), p["w2"], p["b2"], True)
    x3 = _conv_ref(jnp.concatenate([x, x1, x2], -1), p["w3"], p["b3"], True)
    x4 = _conv_ref(jnp.concatenate([x, x1, x2, x3], -1), p["w4"], p["b4"], True)
    x5 = _conv_ref(jnp.concatenate([x, x1, x2, x3, x4], -1), p["w5"], p["b5"], False)
    return x5 * 0.2 + x


def _rrdb_ref_nchw(x_nchw, params):
    x = jnp.transpose(x_nchw, (0, 2, 3, 1))
    out = _rdb_ref(x, params[0])
    out = _rdb_ref(out, params[1])
    out = _rdb_ref(out, params[2])
    out = out * 0.2 + x
    return jnp.transpose(out, (0, 3, 1, 2))


if __name__ == "__main__":
    key = jax.random.PRNGKey(0)
    nf, gc = 8, 8
    N, H, W = 2, 16, 16

    kx, kp = jax.random.split(key)
    x = jax.random.normal(kx, (N, nf, H, W), jnp.float32)   # NCHW like PyTorch
    params = init_rrdb_params(kp, nf, gc)

    out = jax.jit(rrdb_forward_nchw)(x, params)
    out = jax.block_until_ready(out)

    ref = jax.block_until_ready(_rrdb_ref_nchw(x, params))
    assert out.shape == (N, nf, H, W)
    # Kernel uses bf16 MXU operands (f32 accumulation); compare against the f32
    # lax.conv reference with a correspondingly loosened tolerance.
    assert jnp.allclose(out, ref, atol=3e-2, rtol=3e-2), \
        f"mismatch vs lax.conv reference, max abs err {float(jnp.max(jnp.abs(out - ref)))}"

    print("KERNEL_OK")
</pallas_src>

<mosaic_0001>
module attributes {stable_mosaic.version = 11 : i64} {
  func.func @_rrdb_kernel(%arg0: i32, %arg1: memref<1x8x256xf32, #tpu.memory_space<vmem>>, %arg2: memref<8x72xbf16, #tpu.memory_space<vmem>>, %arg3: memref<8x1xf32, #tpu.memory_space<vmem>>, %arg4: memref<8x144xbf16, #tpu.memory_space<vmem>>, %arg5: memref<8x1xf32, #tpu.memory_space<vmem>>, %arg6: memref<8x216xbf16, #tpu.memory_space<vmem>>, %arg7: memref<8x1xf32, #tpu.memory_space<vmem>>, %arg8: memref<8x288xbf16, #tpu.memory_space<vmem>>, %arg9: memref<8x1xf32, #tpu.memory_space<vmem>>, %arg10: memref<8x360xbf16, #tpu.memory_space<vmem>>, %arg11: memref<8x1xf32, #tpu.memory_space<vmem>>, %arg12: memref<8x72xbf16, #tpu.memory_space<vmem>>, %arg13: memref<8x1xf32, #tpu.memory_space<vmem>>, %arg14: memref<8x144xbf16, #tpu.memory_space<vmem>>, %arg15: memref<8x1xf32, #tpu.memory_space<vmem>>, %arg16: memref<8x216xbf16, #tpu.memory_space<vmem>>, %arg17: memref<8x1xf32, #tpu.memory_space<vmem>>, %arg18: memref<8x288xbf16, #tpu.memory_space<vmem>>, %arg19: memref<8x1xf32, #tpu.memory_space<vmem>>, %arg20: memref<8x360xbf16, #tpu.memory_space<vmem>>, %arg21: memref<8x1xf32, #tpu.memory_space<vmem>>, %arg22: memref<8x72xbf16, #tpu.memory_space<vmem>>, %arg23: memref<8x1xf32, #tpu.memory_space<vmem>>, %arg24: memref<8x144xbf16, #tpu.memory_space<vmem>>, %arg25: memref<8x1xf32, #tpu.memory_space<vmem>>, %arg26: memref<8x216xbf16, #tpu.memory_space<vmem>>, %arg27: memref<8x1xf32, #tpu.memory_space<vmem>>, %arg28: memref<8x288xbf16, #tpu.memory_space<vmem>>, %arg29: memref<8x1xf32, #tpu.memory_space<vmem>>, %arg30: memref<8x360xbf16, #tpu.memory_space<vmem>>, %arg31: memref<8x1xf32, #tpu.memory_space<vmem>>, %arg32: memref<1x8x256xf32, #tpu.memory_space<vmem>>, %arg33: memref<360x256xf32, #tpu.memory_space<vmem>>) attributes {dimension_semantics = [#tpu.dimension_semantics<parallel>], iteration_bounds = array<i64: 2>, scalar_prefetch = 0 : i64, scratch_operands = 1 : i64, tpu.core_type = #tpu.core_type<tc>, window_params = [{transform_indices = @transform_0, window_bounds = array<i64: 1, 8, 256>}, {pipeline_mode = #tpu.pipeline_mode<synchronous>, transform_indices = @transform_1, window_bounds = array<i64: 8, 72>}, {pipeline_mode = #tpu.pipeline_mode<synchronous>, transform_indices = @transform_2, window_bounds = array<i64: 8, 1>}, {pipeline_mode = #tpu.pipeline_mode<synchronous>, transform_indices = @transform_3, window_bounds = array<i64: 8, 144>}, {pipeline_mode = #tpu.pipeline_mode<synchronous>, transform_indices = @transform_4, window_bounds = array<i64: 8, 1>}, {pipeline_mode = #tpu.pipeline_mode<synchronous>, transform_indices = @transform_5, window_bounds = array<i64: 8, 216>}, {pipeline_mode = #tpu.pipeline_mode<synchronous>, transform_indices = @transform_6, window_bounds = array<i64: 8, 1>}, {pipeline_mode = #tpu.pipeline_mode<synchronous>, transform_indices = @transform_7, window_bounds = array<i64: 8, 288>}, {pipeline_mode = #tpu.pipeline_mode<synchronous>, transform_indices = @transform_8, window_bounds = array<i64: 8, 1>}, {pipeline_mode = #tpu.pipeline_mode<synchronous>, transform_indices = @transform_9, window_bounds = array<i64: 8, 360>}, {pipeline_mode = #tpu.pipeline_mode<synchronous>, transform_indices = @transform_10, window_bounds = array<i64: 8, 1>}, {pipeline_mode = #tpu.pipeline_mode<synchronous>, transform_indices = @transform_11, window_bounds = array<i64: 8, 72>}, {pipeline_mode = #tpu.pipeline_mode<synchronous>, transform_indices = @transform_12, window_bounds = array<i64: 8, 1>}, {pipeline_mode = #tpu.pipeline_mode<synchronous>, transform_indices = @transform_13, window_bounds = array<i64: 8, 144>}, {pipeline_mode = #tpu.pipeline_mode<synchronous>, transform_indices = @transform_14, window_bounds = array<i64: 8, 1>}, {pipeline_mode = #tpu.pipeline_mode<synchronous>, transform_indices = @transform_15, window_bounds = array<i64: 8, 216>}, {pipeline_mode = #tpu.pipeline_mode<synchronous>, transform_indices = @transform_16, window_bounds = array<i64: 8, 1>}, {pipeline_mode = #tpu.pipeline_mode<synchronous>, transform_indices = @transform_17, window_bounds = array<i64: 8, 288>}, {pipeline_mode = #tpu.pipeline_mode<synchronous>, transform_indices = @transform_18, window_bounds = array<i64: 8, 1>}, {pipeline_mode = #tpu.pipeline_mode<synchronous>, transform_indices = @transform_19, window_bounds = array<i64: 8, 360>}, {pipeline_mode = #tpu.pipeline_mode<synchronous>, transform_indices = @transform_20, window_bounds = array<i64: 8, 1>}, {pipeline_mode = #tpu.pipeline_mode<synchronous>, transform_indices = @transform_21, window_bounds = array<i64: 8, 72>}, {pipeline_mode = #tpu.pipeline_mode<synchronous>, transform_indices = @transform_22, window_bounds = array<i64: 8, 1>}, {pipeline_mode = #tpu.pipeline_mode<synchronous>, transform_indices = @transform_23, window_bounds = array<i64: 8, 144>}, {pipeline_mode = #tpu.pipeline_mode<synchronous>, transform_indices = @transform_24, window_bounds = array<i64: 8, 1>}, {pipeline_mode = #tpu.pipeline_mode<synchronous>, transform_indices = @transform_25, window_bounds = array<i64: 8, 216>}, {pipeline_mode = #tpu.pipeline_mode<synchronous>, transform_indices = @transform_26, window_bounds = array<i64: 8, 1>}, {pipeline_mode = #tpu.pipeline_mode<synchronous>, transform_indices = @transform_27, window_bounds = array<i64: 8, 288>}, {pipeline_mode = #tpu.pipeline_mode<synchronous>, transform_indices = @transform_28, window_bounds = array<i64: 8, 1>}, {pipeline_mode = #tpu.pipeline_mode<synchronous>, transform_indices = @transform_29, window_bounds = array<i64: 8, 360>}, {pipeline_mode = #tpu.pipeline_mode<synchronous>, transform_indices = @transform_30, window_bounds = array<i64: 8, 1>}, {transform_indices = @transform_31, window_bounds = array<i64: 1, 8, 256>}]} {
    %0 = tpu.iota {dimensions = array<i32: 1>} : vector<1x256xi32>
    %c16_i32 = arith.constant 16 : i32
    %c0_i32 = arith.constant 0 : i32
    %1 = arith.cmpi eq, %c16_i32, %c0_i32 : i32
    %c1_i32 = arith.constant 1 : i32
    %2 = arith.select %1, %c1_i32, %c16_i32 : i32
    %3 = vector.broadcast %2 : i32 to vector<1x256xi32>
    %4 = arith.remsi %0, %3 : vector<1x256xi32>
    %c0_i32_0 = arith.constant 0 : i32
    %5 = vector.broadcast %c0_i32_0 : i32 to vector<1x256xi32>
    %6 = arith.cmpi ne, %4, %5 : vector<1x256xi32>
    %c0_i32_1 = arith.constant 0 : i32
    %7 = vector.broadcast %c0_i32_1 : i32 to vector<1x256xi32>
    %8 = arith.cmpi slt, %4, %7 : vector<1x256xi32>
    %c0_i32_2 = arith.constant 0 : i32
    %9 = arith.cmpi slt, %2, %c0_i32_2 : i32
    %10 = vector.broadcast %9 : i1 to vector<1x256xi1>
    %11 = vector.broadcast %10 : vector<1x256xi1> to vector<1x256xi1>
    %12 = arith.xori %8, %11 : vector<1x256xi1>
    %13 = arith.andi %12, %6 : vector<1x256xi1>
    %14 = vector.broadcast %2 : i32 to vector<1x256xi32>
    %15 = arith.addi %4, %14 : vector<1x256xi32>
    %16 = arith.select %13, %15, %4 : vector<1x256xi1>, vector<1x256xi32>
    %c14_i32 = arith.constant 14 : i32
    %17 = vector.broadcast %c14_i32 : i32 to vector<1x256xi32>
    %18 = arith.cmpi sle, %16, %17 : vector<1x256xi32>
    %19 = arith.extui %18 : vector<1x256xi1> to vector<1x256xi32>
    %20 = arith.sitofp %19 : vector<1x256xi32> to vector<1x256xf32>
    %c1_i32_3 = arith.constant 1 : i32
    %21 = vector.broadcast %c1_i32_3 : i32 to vector<1x256xi32>
    %22 = arith.cmpi sge, %16, %21 : vector<1x256xi32>
    %23 = arith.extui %22 : vector<1x256xi1> to vector<1x256xi32>
    %24 = arith.sitofp %23 : vector<1x256xi32> to vector<1x256xf32>
    %c0 = arith.constant 0 : index
    %c0_4 = arith.constant 0 : index
    %c0_5 = arith.constant 0 : index
    %25 = vector.load %arg1[%c0, %c0_4, %c0_5] : memref<1x8x256xf32, #tpu.memory_space<vmem>>, vector<1x8x256xf32>
    %26 = vector.shape_cast %25 : vector<1x8x256xf32> to vector<8x256xf32>
    %cst = arith.constant 0.000000e+00 : f32
    %27 = vector.broadcast %cst : f32 to vector<8x17xf32>
    %28 = vector.broadcast %20 : vector<1x256xf32> to vector<8x256xf32>
    %29 = arith.mulf %26, %28 : vector<8x256xf32>
    %30 = tpu.concatenate %27, %29, %27 in 1 : vector<8x17xf32>, vector<8x256xf32>, vector<8x17xf32> -> vector<8x290xf32>
    %31 = tpu.concatenate %27, %26, %27 in 1 : vector<8x17xf32>, vector<8x256xf32>, vector<8x17xf32> -> vector<8x290xf32>
    %32 = vector.broadcast %24 : vector<1x256xf32> to vector<8x256xf32>
    %33 = arith.mulf %26, %32 : vector<8x256xf32>
    %34 = tpu.concatenate %27, %33, %27 in 1 : vector<8x17xf32>, vector<8x256xf32>, vector<8x17xf32> -> vector<8x290xf32>
    %35 = vector.extract_strided_slice %30 {offsets = [0, 0], sizes = [8, 256], strides = [1, 1]} : vector<8x290xf32> to vector<8x256xf32>
    %36 = vector.extract_strided_slice %31 {offsets = [0, 1], sizes = [8, 256], strides = [1, 1]} : vector<8x290xf32> to vector<8x256xf32>
    %37 = vector.extract_strided_slice %34 {offsets = [0, 2], sizes = [8, 256], strides = [1, 1]} : vector<8x290xf32> to vector<8x256xf32>
    %38 = vector.extract_strided_slice %30 {offsets = [0, 16], sizes = [8, 256], strides = [1, 1]} : vector<8x290xf32> to vector<8x256xf32>
    %39 = vector.extract_strided_slice %31 {offsets = [0, 17], sizes = [8, 256], strides = [1, 1]} : vector<8x290xf32> to vector<8x256xf32>
    %40 = vector.extract_strided_slice %34 {offsets = [0, 18], sizes = [8, 256], strides = [1, 1]} : vector<8x290xf32> to vector<8x256xf32>
    %41 = vector.extract_strided_slice %30 {offsets = [0, 32], sizes = [8, 256], strides = [1, 1]} : vector<8x290xf32> to vector<8x256xf32>
    %42 = vector.extract_strided_slice %31 {offsets = [0, 33], sizes = [8, 256], strides = [1, 1]} : vector<8x290xf32> to vector<8x256xf32>
    %43 = vector.extract_strided_slice %34 {offsets = [0, 34], sizes = [8, 256], strides = [1, 1]} : vector<8x290xf32> to vector<8x256xf32>
    %44 = tpu.concatenate %35, %36, %37, %38, %39, %40, %41, %42, %43 in 0 : vector<8x256xf32>, vector<8x256xf32>, vector<8x256xf32>, vector<8x256xf32>, vector<8x256xf32>, vector<8x256xf32>, vector<8x256xf32>, vector<8x256xf32>, vector<8x256xf32> -> vector<72x256xf32>
    %c0_6 = arith.constant 0 : index
    %c0_7 = arith.constant 0 : index
    %45 = vector.load %arg33[%c0_6, %c0_7] : memref<360x256xf32, #tpu.memory_space<vmem>>, vector<72x256xf32>
    tpu.vector_store %arg33[%c0_6, %c0_7], %44 {strides = array<i32>} : memref<360x256xf32, #tpu.memory_space<vmem>>, vector<72x256xf32>,
    %c0_8 = arith.constant 0 : index
    %c0_9 = arith.constant 0 : index
    %46 = vector.load %arg33[%c0_8, %c0_9] : memref<360x256xf32, #tpu.memory_space<vmem>>, vector<72x256xf32>
    %47 = arith.truncf %46 : vector<72x256xf32> to vector<72x256xbf16>
    %c0_10 = arith.constant 0 : index
    %c0_11 = arith.constant 0 : index
    %48 = vector.load %arg2[%c0_10, %c0_11] : memref<8x72xbf16, #tpu.memory_space<vmem>>, vector<8x72xbf16>
    %cst_12 = arith.constant dense<0.000000e+00> : vector<8x256xf32>
    %49 = tpu.matmul %48, %47, %cst_12 {dimension_numbers = #tpu.dot_dimension_numbers<[1], [0], [0], [1], [0, 0, 1, 1], [], []>} : vector<8x72xbf16>, vector<72x256xbf16>, vector<8x256xf32> -> vector<8x256xf32>
    %c0_13 = arith.constant 0 : index
    %c0_14 = arith.constant 0 : index
    %50 = vector.load %arg3[%c0_13, %c0_14] : memref<8x1xf32, #tpu.memory_space<vmem>>, vector<8x1xf32>
    %51 = vector.broadcast %50 : vector<8x1xf32> to vector<8x256xf32>
    %52 = arith.addf %49, %51 : vector<8x256xf32>
    %cst_15 = arith.constant 2.000000e-01 : f32
    %53 = vector.broadcast %cst_15 : f32 to vector<8x256xf32>
    %54 = arith.mulf %53, %52 : vector<8x256xf32>
    %55 = arith.maximumf %52, %54 : vector<8x256xf32>
    %cst_16 = arith.constant 0.000000e+00 : f32
    %56 = vector.broadcast %cst_16 : f32 to vector<8x17xf32>
    %57 = vector.broadcast %20 : vector<1x256xf32> to vector<8x256xf32>
    %58 = arith.mulf %55, %57 : vector<8x256xf32>
    %59 = tpu.concatenate %56, %58, %56 in 1 : vector<8x17xf32>, vector<8x256xf32>, vector<8x17xf32> -> vector<8x290xf32>
    %60 = tpu.concatenate %56, %55, %56 in 1 : vector<8x17xf32>, vector<8x256xf32>, vector<8x17xf32> -> vector<8x290xf32>
    %61 = vector.broadcast %24 : vector<1x256xf32> to vector<8x256xf32>
    %62 = arith.mulf %55, %61 : vector<8x256xf32>
    %63 = tpu.concatenate %56, %62, %56 in 1 : vector<8x17xf32>, vector<8x256xf32>, vector<8x17xf32> -> vector<8x290xf32>
    %64 = vector.extract_strided_slice %59 {offsets = [0, 0], sizes = [8, 256], strides = [1, 1]} : vector<8x290xf32> to vector<8x256xf32>
    %65 = vector.extract_strided_slice %60 {offsets = [0, 1], sizes = [8, 256], strides = [1, 1]} : vector<8x290xf32> to vector<8x256xf32>
    %66 = vector.extract_strided_slice %63 {offsets = [0, 2], sizes = [8, 256], strides = [1, 1]} : vector<8x290xf32> to vector<8x256xf32>
    %67 = vector.extract_strided_slice %59 {offsets = [0, 16], sizes = [8, 256], strides = [1, 1]} : vector<8x290xf32> to vector<8x256xf32>
    %68 = vector.extract_strided_slice %60 {offsets = [0, 17], sizes = [8, 256], strides = [1, 1]} : vector<8x290xf32> to vector<8x256xf32>
    %69 = vector.extract_strided_slice %63 {offsets = [0, 18], sizes = [8, 256], strides = [1, 1]} : vector<8x290xf32> to vector<8x256xf32>
    %70 = vector.extract_strided_slice %59 {offsets = [0, 32], sizes = [8, 256], strides = [1, 1]} : vector<8x290xf32> to vector<8x256xf32>
    %71 = vector.extract_strided_slice %60 {offsets = [0, 33], sizes = [8, 256], strides = [1, 1]} : vector<8x290xf32> to vector<8x256xf32>
    %72 = vector.extract_strided_slice %63 {offsets = [0, 34], sizes = [8, 256], strides = [1, 1]} : vector<8x290xf32> to vector<8x256xf32>
    %73 = tpu.concatenate %64, %65, %66, %67, %68, %69, %70, %71, %72 in 0 : vector<8x256xf32>, vector<8x256xf32>, vector<8x256xf32>, vector<8x256xf32>, vector<8x256xf32>, vector<8x256xf32>, vector<8x256xf32>, vector<8x256xf32>, vector<8x256xf32> -> vector<72x256xf32>
    %c72 = arith.constant 72 : index
    %c0_17 = arith.constant 0 : index
    %74 = vector.load %arg33[%c72, %c0_17] : memref<360x256xf32, #tpu.memory_space<vmem>>, vector<72x256xf32>
    tpu.vector_store %arg33[%c72, %c0_17], %73 {strides = array<i32>} : memref<360x256xf32, #tpu.memory_space<vmem>>, vector<72x256xf32>,
    %c0_18 = arith.constant 0 : index
    %c0_19 = arith.constant 0 : index
    %75 = vector.load %arg33[%c0_18, %c0_19] : memref<360x256xf32, #tpu.memory_space<vmem>>, vector<144x256xf32>
    %76 = arith.truncf %75 : vector<144x256xf32> to vector<144x256xbf16>
    %c0_20 = arith.constant 0 : index
    %c0_21 = arith.constant 0 : index
    %77 = vector.load %arg4[%c0_20, %c0_21] : memref<8x144xbf16, #tpu.memory_space<vmem>>, vector<8x144xbf16>
    %cst_22 = arith.constant dense<0.000000e+00> : vector<8x256xf32>
    %78 = tpu.matmul %77, %76, %cst_22 {dimension_numbers = #tpu.dot_dimension_numbers<[1], [0], [0], [1], [0, 0, 1, 1], [], []>} : vector<8x144xbf16>, vector<144x256xbf16>, vector<8x256xf32> -> vector<8x256xf32>
    %c0_23 = arith.constant 0 : index
    %c0_24 = arith.constant 0 : index
    %79 = vector.load %arg5[%c0_23, %c0_24] : memref<8x1xf32, #tpu.memory_space<vmem>>, vector<8x1xf32>
    %80 = vector.broadcast %79 : vector<8x1xf32> to vector<8x256xf32>
    %81 = arith.addf %78, %80 : vector<8x256xf32>
    %cst_25 = arith.constant 2.000000e-01 : f32
    %82 = vector.broadcast %cst_25 : f32 to vector<8x256xf32>
    %83 = arith.mulf %82, %81 : vector<8x256xf32>
    %84 = arith.maximumf %81, %83 : vector<8x256xf32>
    %cst_26 = arith.constant 0.000000e+00 : f32
    %85 = vector.broadcast %cst_26 : f32 to vector<8x17xf32>
    %86 = vector.broadcast %20 : vector<1x256xf32> to vector<8x256xf32>
    %87 = arith.mulf %84, %86 : vector<8x256xf32>
    %88 = tpu.concatenate %85, %87, %85 in 1 : vector<8x17xf32>, vector<8x256xf32>, vector<8x17xf32> -> vector<8x290xf32>
    %89 = tpu.concatenate %85, %84, %85 in 1 : vector<8x17xf32>, vector<8x256xf32>, vector<8x17xf32> -> vector<8x290xf32>
    %90 = vector.broadcast %24 : vector<1x256xf32> to vector<8x256xf32>
    %91 = arith.mulf %84, %90 : vector<8x256xf32>
    %92 = tpu.concatenate %85, %91, %85 in 1 : vector<8x17xf32>, vector<8x256xf32>, vector<8x17xf32> -> vector<8x290xf32>
    %93 = vector.extract_strided_slice %88 {offsets = [0, 0], sizes = [8, 256], strides = [1, 1]} : vector<8x290xf32> to vector<8x256xf32>
    %94 = vector.extract_strided_slice %89 {offsets = [0, 1], sizes = [8, 256], strides = [1, 1]} : vector<8x290xf32> to vector<8x256xf32>
    %95 = vector.extract_strided_slice %92 {offsets = [0, 2], sizes = [8, 256], strides = [1, 1]} : vector<8x290xf32> to vector<8x256xf32>
    %96 = vector.extract_strided_slice %88 {offsets = [0, 16], sizes = [8, 256], strides = [1, 1]} : vector<8x290xf32> to vector<8x256xf32>
    %97 = vector.extract_strided_slice %89 {offsets = [0, 17], sizes = [8, 256], strides = [1, 1]} : vector<8x290xf32> to vector<8x256xf32>
    %98 = vector.extract_strided_slice %92 {offsets = [0, 18], sizes = [8, 256], strides = [1, 1]} : vector<8x290xf32> to vector<8x256xf32>
    %99 = vector.extract_strided_slice %88 {offsets = [0, 32], sizes = [8, 256], strides = [1, 1]} : vector<8x290xf32> to vector<8x256xf32>
    %100 = vector.extract_strided_slice %89 {offsets = [0, 33], sizes = [8, 256], strides = [1, 1]} : vector<8x290xf32> to vector<8x256xf32>
    %101 = vector.extract_strided_slice %92 {offsets = [0, 34], sizes = [8, 256], strides = [1, 1]} : vector<8x290xf32> to vector<8x256xf32>
    %102 = tpu.concatenate %93, %94, %95, %96, %97, %98, %99, %100, %101 in 0 : vector<8x256xf32>, vector<8x256xf32>, vector<8x256xf32>, vector<8x256xf32>, vector<8x256xf32>, vector<8x256xf32>, vector<8x256xf32>, vector<8x256xf32>, vector<8x256xf32> -> vector<72x256xf32>
    %c144 = arith.constant 144 : index
    %c0_27 = arith.constant 0 : index
    %103 = vector.load %arg33[%c144, %c0_27] : memref<360x256xf32, #tpu.memory_space<vmem>>, vector<72x256xf32>
    tpu.vector_store %arg33[%c144, %c0_27], %102 {strides = array<i32>} : memref<360x256xf32, #tpu.memory_space<vmem>>, vector<72x256xf32>,
    %c0_28 = arith.constant 0 : index
    %c0_29 = arith.constant 0 : index
    %104 = vector.load %arg33[%c0_28, %c0_29] : memref<360x256xf32, #tpu.memory_space<vmem>>, vector<216x256xf32>
    %105 = arith.truncf %104 : vector<216x256xf32> to vector<216x256xbf16>
    %c0_30 = arith.constant 0 : index
    %c0_31 = arith.constant 0 : index
    %106 = vector.load %arg6[%c0_30, %c0_31] : memref<8x216xbf16, #tpu.memory_space<vmem>>, vector<8x216xbf16>
    %cst_32 = arith.constant dense<0.000000e+00> : vector<8x256xf32>
    %107 = tpu.matmul %106, %105, %cst_32 {dimension_numbers = #tpu.dot_dimension_numbers<[1], [0], [0], [1], [0, 0, 1, 1], [], []>} : vector<8x216xbf16>, vector<216x256xbf16>, vector<8x256xf32> -> vector<8x256xf32>
    %c0_33 = arith.constant 0 : index
    %c0_34 = arith.constant 0 : index
    %108 = vector.load %arg7[%c0_33, %c0_34] : memref<8x1xf32, #tpu.memory_space<vmem>>, vector<8x1xf32>
    %109 = vector.broadcast %108 : vector<8x1xf32> to vector<8x256xf32>
    %110 = arith.addf %107, %109 : vector<8x256xf32>
    %cst_35 = arith.constant 2.000000e-01 : f32
    %111 = vector.broadcast %cst_35 : f32 to vector<8x256xf32>
    %112 = arith.mulf %111, %110 : vector<8x256xf32>
    %113 = arith.maximumf %110, %112 : vector<8x256xf32>
    %cst_36 = arith.constant 0.000000e+00 : f32
    %114 = vector.broadcast %cst_36 : f32 to vector<8x17xf32>
    %115 = vector.broadcast %20 : vector<1x256xf32> to vector<8x256xf32>
    %116 = arith.mulf %113, %115 : vector<8x256xf32>
    %117 = tpu.concatenate %114, %116, %114 in 1 : vector<8x17xf32>, vector<8x256xf32>, vector<8x17xf32> -> vector<8x290xf32>
    %118 = tpu.concatenate %114, %113, %114 in 1 : vector<8x17xf32>, vector<8x256xf32>, vector<8x17xf32> -> vector<8x290xf32>
    %119 = vector.broadcast %24 : vector<1x256xf32> to vector<8x256xf32>
    %120 = arith.mulf %113, %119 : vector<8x256xf32>
    %121 = tpu.concatenate %114, %120, %114 in 1 : vector<8x17xf32>, vector<8x256xf32>, vector<8x17xf32> -> vector<8x290xf32>
    %122 = vector.extract_strided_slice %117 {offsets = [0, 0], sizes = [8, 256], strides = [1, 1]} : vector<8x290xf32> to vector<8x256xf32>
    %123 = vector.extract_strided_slice %118 {offsets = [0, 1], sizes = [8, 256], strides = [1, 1]} : vector<8x290xf32> to vector<8x256xf32>
    %124 = vector.extract_strided_slice %121 {offsets = [0, 2], sizes = [8, 256], strides = [1, 1]} : vector<8x290xf32> to vector<8x256xf32>
    %125 = vector.extract_strided_slice %117 {offsets = [0, 16], sizes = [8, 256], strides = [1, 1]} : vector<8x290xf32> to vector<8x256xf32>
    %126 = vector.extract_strided_slice %118 {offsets = [0, 17], sizes = [8, 256], strides = [1, 1]} : vector<8x290xf32> to vector<8x256xf32>
    %127 = vector.extract_strided_slice %121 {offsets = [0, 18], sizes = [8, 256], strides = [1, 1]} : vector<8x290xf32> to vector<8x256xf32>
    %128 = vector.extract_strided_slice %117 {offsets = [0, 32], sizes = [8, 256], strides = [1, 1]} : vector<8x290xf32> to vector<8x256xf32>
    %129 = vector.extract_strided_slice %118 {offsets = [0, 33], sizes = [8, 256], strides = [1, 1]} : vector<8x290xf32> to vector<8x256xf32>
    %130 = vector.extract_strided_slice %121 {offsets = [0, 34], sizes = [8, 256], strides = [1, 1]} : vector<8x290xf32> to vector<8x256xf32>
    %131 = tpu.concatenate %122, %123, %124, %125, %126, %127, %128, %129, %130 in 0 : vector<8x256xf32>, vector<8x256xf32>, vector<8x256xf32>, vector<8x256xf32>, vector<8x256xf32>, vector<8x256xf32>, vector<8x256xf32>, vector<8x256xf32>, vector<8x256xf32> -> vector<72x256xf32>
    %c216 = arith.constant 216 : index
    %c0_37 = arith.constant 0 : index
    %132 = vector.load %arg33[%c216, %c0_37] : memref<360x256xf32, #tpu.memory_space<vmem>>, vector<72x256xf32>
    tpu.vector_store %arg33[%c216, %c0_37], %131 {strides = array<i32>} : memref<360x256xf32, #tpu.memory_space<vmem>>, vector<72x256xf32>,
    %c0_38 = arith.constant 0 : index
    %c0_39 = arith.constant 0 : index
    %133 = vector.load %arg33[%c0_38, %c0_39] : memref<360x256xf32, #tpu.memory_space<vmem>>, vector<288x256xf32>
    %134 = arith.truncf %133 : vector<288x256xf32> to vector<288x256xbf16>
    %c0_40 = arith.constant 0 : index
    %c0_41 = arith.constant 0 : index
    %135 = vector.load %arg8[%c0_40, %c0_41] : memref<8x288xbf16, #tpu.memory_space<vmem>>, vector<8x288xbf16>
    %cst_42 = arith.constant dense<0.000000e+00> : vector<8x256xf32>
    %136 = tpu.matmul %135, %134, %cst_42 {dimension_numbers = #tpu.dot_dimension_numbers<[1], [0], [0], [1], [0, 0, 1, 1], [], []>} : vector<8x288xbf16>, vector<288x256xbf16>, vector<8x256xf32> -> vector<8x256xf32>
    %c0_43 = arith.constant 0 : index
    %c0_44 = arith.constant 0 : index
    %137 = vector.load %arg9[%c0_43, %c0_44] : memref<8x1xf32, #tpu.memory_space<vmem>>, vector<8x1xf32>
    %138 = vector.broadcast %137 : vector<8x1xf32> to vector<8x256xf32>
    %139 = arith.addf %136, %138 : vector<8x256xf32>
    %cst_45 = arith.constant 2.000000e-01 : f32
    %140 = vector.broadcast %cst_45 : f32 to vector<8x256xf32>
    %141 = arith.mulf %140, %139 : vector<8x256xf32>
    %142 = arith.maximumf %139, %141 : vector<8x256xf32>
    %cst_46 = arith.constant 0.000000e+00 : f32
    %143 = vector.broadcast %cst_46 : f32 to vector<8x17xf32>
    %144 = vector.broadcast %20 : vector<1x256xf32> to vector<8x256xf32>
    %145 = arith.mulf %142, %144 : vector<8x256xf32>
    %146 = tpu.concatenate %143, %145, %143 in 1 : vector<8x17xf32>, vector<8x256xf32>, vector<8x17xf32> -> vector<8x290xf32>
    %147 = tpu.concatenate %143, %142, %143 in 1 : vector<8x17xf32>, vector<8x256xf32>, vector<8x17xf32> -> vector<8x290xf32>
    %148 = vector.broadcast %24 : vector<1x256xf32> to vector<8x256xf32>
    %149 = arith.mulf %142, %148 : vector<8x256xf32>
    %150 = tpu.concatenate %143, %149, %143 in 1 : vector<8x17xf32>, vector<8x256xf32>, vector<8x17xf32> -> vector<8x290xf32>
    %151 = vector.extract_strided_slice %146 {offsets = [0, 0], sizes = [8, 256], strides = [1, 1]} : vector<8x290xf32> to vector<8x256xf32>
    %152 = vector.extract_strided_slice %147 {offsets = [0, 1], sizes = [8, 256], strides = [1, 1]} : vector<8x290xf32> to vector<8x256xf32>
    %153 = vector.extract_strided_slice %150 {offsets = [0, 2], sizes = [8, 256], strides = [1, 1]} : vector<8x290xf32> to vector<8x256xf32>
    %154 = vector.extract_strided_slice %146 {offsets = [0, 16], sizes = [8, 256], strides = [1, 1]} : vector<8x290xf32> to vector<8x256xf32>
    %155 = vector.extract_strided_slice %147 {offsets = [0, 17], sizes = [8, 256], strides = [1, 1]} : vector<8x290xf32> to vector<8x256xf32>
    %156 = vector.extract_strided_slice %150 {offsets = [0, 18], sizes = [8, 256], strides = [1, 1]} : vector<8x290xf32> to vector<8x256xf32>
    %157 = vector.extract_strided_slice %146 {offsets = [0, 32], sizes = [8, 256], strides = [1, 1]} : vector<8x290xf32> to vector<8x256xf32>
    %158 = vector.extract_strided_slice %147 {offsets = [0, 33], sizes = [8, 256], strides = [1, 1]} : vector<8x290xf32> to vector<8x256xf32>
    %159 = vector.extract_strided_slice %150 {offsets = [0, 34], sizes = [8, 256], strides = [1, 1]} : vector<8x290xf32> to vector<8x256xf32>
    %160 = tpu.concatenate %151, %152, %153, %154, %155, %156, %157, %158, %159 in 0 : vector<8x256xf32>, vector<8x256xf32>, vector<8x256xf32>, vector<8x256xf32>, vector<8x256xf32>, vector<8x256xf32>, vector<8x256xf32>, vector<8x256xf32>, vector<8x256xf32> -> vector<72x256xf32>
    %c288 = arith.constant 288 : index
    %c0_47 = arith.constant 0 : index
    %161 = vector.load %arg33[%c288, %c0_47] : memref<360x256xf32, #tpu.memory_space<vmem>>, vector<72x256xf32>
    tpu.vector_store %arg33[%c288, %c0_47], %160 {strides = array<i32>} : memref<360x256xf32, #tpu.memory_space<vmem>>, vector<72x256xf32>,
    %c0_48 = arith.constant 0 : index
    %c0_49 = arith.constant 0 : index
    %162 = vector.load %arg33[%c0_48, %c0_49] : memref<360x256xf32, #tpu.memory_space<vmem>>, vector<360x256xf32>
    %163 = arith.truncf %162 : vector<360x256xf32> to vector<360x256xbf16>
    %c0_50 = arith.constant 0 : index
    %c0_51 = arith.constant 0 : index
    %164 = vector.load %arg10[%c0_50, %c0_51] : memref<8x360xbf16, #tpu.memory_space<vmem>>, vector<8x360xbf16>
    %cst_52 = arith.constant dense<0.000000e+00> : vector<8x256xf32>
    %165 = tpu.matmul %164, %163, %cst_52 {dimension_numbers = #tpu.dot_dimension_numbers<[1], [0], [0], [1], [0, 0, 1, 1], [], []>} : vector<8x360xbf16>, vector<360x256xbf16>, vector<8x256xf32> -> vector<8x256xf32>
    %c0_53 = arith.constant 0 : index
    %c0_54 = arith.constant 0 : index
    %166 = vector.load %arg11[%c0_53, %c0_54] : memref<8x1xf32, #tpu.memory_space<vmem>>, vector<8x1xf32>
    %167 = vector.broadcast %166 : vector<8x1xf32> to vector<8x256xf32>
    %168 = arith.addf %165, %167 : vector<8x256xf32>
    %cst_55 = arith.constant 2.000000e-01 : f32
    %169 = vector.broadcast %cst_55 : f32 to vector<8x256xf32>
    %170 = arith.mulf %168, %169 : vector<8x256xf32>
    %171 = arith.addf %170, %26 : vector<8x256xf32>
    %cst_56 = arith.constant 0.000000e+00 : f32
    %172 = vector.broadcast %cst_56 : f32 to vector<8x17xf32>
    %173 = vector.broadcast %20 : vector<1x256xf32> to vector<8x256xf32>
    %174 = arith.mulf %171, %173 : vector<8x256xf32>
    %175 = tpu.concatenate %172, %174, %172 in 1 : vector<8x17xf32>, vector<8x256xf32>, vector<8x17xf32> -> vector<8x290xf32>
    %176 = tpu.concatenate %172, %171, %172 in 1 : vector<8x17xf32>, vector<8x256xf32>, vector<8x17xf32> -> vector<8x290xf32>
    %177 = vector.broadcast %24 : vector<1x256xf32> to vector<8x256xf32>
    %178 = arith.mulf %171, %177 : vector<8x256xf32>
    %179 = tpu.concatenate %172, %178, %172 in 1 : vector<8x17xf32>, vector<8x256xf32>, vector<8x17xf32> -> vector<8x290xf32>
    %180 = vector.extract_strided_slice %175 {offsets = [0, 0], sizes = [8, 256], strides = [1, 1]} : vector<8x290xf32> to vector<8x256xf32>
    %181 = vector.extract_strided_slice %176 {offsets = [0, 1], sizes = [8, 256], strides = [1, 1]} : vector<8x290xf32> to vector<8x256xf32>
    %182 = vector.extract_strided_slice %179 {offsets = [0, 2], sizes = [8, 256], strides = [1, 1]} : vector<8x290xf32> to vector<8x256xf32>
    %183 = vector.extract_strided_slice %175 {offsets = [0, 16], sizes = [8, 256], strides = [1, 1]} : vector<8x290xf32> to vector<8x256xf32>
    %184 = vector.extract_strided_slice %176 {offsets = [0, 17], sizes = [8, 256], strides = [1, 1]} : vector<8x290xf32> to vector<8x256xf32>
    %185 = vector.extract_strided_slice %179 {offsets = [0, 18], sizes = [8, 256], strides = [1, 1]} : vector<8x290xf32> to vector<8x256xf32>
    %186 = vector.extract_strided_slice %175 {offsets = [0, 32], sizes = [8, 256], strides = [1, 1]} : vector<8x290xf32> to vector<8x256xf32>
    %187 = vector.extract_strided_slice %176 {offsets = [0, 33], sizes = [8, 256], strides = [1, 1]} : vector<8x290xf32> to vector<8x256xf32>
    %188 = vector.extract_strided_slice %179 {offsets = [0, 34], sizes = [8, 256], strides = [1, 1]} : vector<8x290xf32> to vector<8x256xf32>
    %189 = tpu.concatenate %180, %181, %182, %183, %184, %185, %186, %187, %188 in 0 : vector<8x256xf32>, vector<8x256xf32>, vector<8x256xf32>, vector<8x256xf32>, vector<8x256xf32>, vector<8x256xf32>, vector<8x256xf32>, vector<8x256xf32>, vector<8x256xf32> -> vector<72x256xf32>
    %c0_57 = arith.constant 0 : index
    %c0_58 = arith.constant 0 : index
    %190 = vector.load %arg33[%c0_57, %c0_58] : memref<360x256xf32, #tpu.memory_space<vmem>>, vector<72x256xf32>
    tpu.vector_store %arg33[%c0_57, %c0_58], %189 {strides = array<i32>} : memref<360x256xf32, #tpu.memory_space<vmem>>, vector<72x256xf32>,
    %c0_59 = arith.constant 0 : index
    %c0_60 = arith.constant 0 : index
    %191 = vector.load %arg33[%c0_59, %c0_60] : memref<360x256xf32, #tpu.memory_space<vmem>>, vector<72x256xf32>
    %192 = arith.truncf %191 : vector<72x256xf32> to vector<72x256xbf16>
    %c0_61 = arith.constant 0 : index
    %c0_62 = arith.constant 0 : index
    %193 = vector.load %arg12[%c0_61, %c0_62] : memref<8x72xbf16, #tpu.memory_space<vmem>>, vector<8x72xbf16>
    %cst_63 = arith.constant dense<0.000000e+00> : vector<8x256xf32>
    %194 = tpu.matmul %193, %192, %cst_63 {dimension_numbers = #tpu.dot_dimension_numbers<[1], [0], [0], [1], [0, 0, 1, 1], [], []>} : vector<8x72xbf16>, vector<72x256xbf16>, vector<8x256xf32> -> vector<8x256xf32>
    %c0_64 = arith.constant 0 : index
    %c0_65 = arith.constant 0 : index
    %195 = vector.load %arg13[%c0_64, %c0_65] : memref<8x1xf32, #tpu.memory_space<vmem>>, vector<8x1xf32>
    %196 = vector.broadcast %195 : vector<8x1xf32> to vector<8x256xf32>
    %197 = arith.addf %194, %196 : vector<8x256xf32>
    %cst_66 = arith.constant 2.000000e-01 : f32
    %198 = vector.broadcast %cst_66 : f32 to vector<8x256xf32>
    %199 = arith.mulf %198, %197 : vector<8x256xf32>
    %200 = arith.maximumf %197, %199 : vector<8x256xf32>
    %cst_67 = arith.constant 0.000000e+00 : f32
    %201 = vector.broadcast %cst_67 : f32 to vector<8x17xf32>
    %202 = vector.broadcast %20 : vector<1x256xf32> to vector<8x256xf32>
    %203 = arith.mulf %200, %202 : vector<8x256xf32>
    %204 = tpu.concatenate %201, %203, %201 in 1 : vector<8x17xf32>, vector<8x256xf32>, vector<8x17xf32> -> vector<8x290xf32>
    %205 = tpu.concatenate %201, %200, %201 in 1 : vector<8x17xf32>, vector<8x256xf32>, vector<8x17xf32> -> vector<8x290xf32>
    %206 = vector.broadcast %24 : vector<1x256xf32> to vector<8x256xf32>
    %207 = arith.mulf %200, %206 : vector<8x256xf32>
    %208 = tpu.concatenate %201, %207, %201 in 1 : vector<8x17xf32>, vector<8x256xf32>, vector<8x17xf32> -> vector<8x290xf32>
    %209 = vector.extract_strided_slice %204 {offsets = [0, 0], sizes = [8, 256], strides = [1, 1]} : vector<8x290xf32> to vector<8x256xf32>
    %210 = vector.extract_strided_slice %205 {offsets = [0, 1], sizes = [8, 256], strides = [1, 1]} : vector<8x290xf32> to vector<8x256xf32>
    %211 = vector.extract_strided_slice %208 {offsets = [0, 2], sizes = [8, 256], strides = [1, 1]} : vector<8x290xf32> to vector<8x256xf32>
    %212 = vector.extract_strided_slice %204 {offsets = [0, 16], sizes = [8, 256], strides = [1, 1]} : vector<8x290xf32> to vector<8x256xf32>
    %213 = vector.extract_strided_slice %205 {offsets = [0, 17], sizes = [8, 256], strides = [1, 1]} : vector<8x290xf32> to vector<8x256xf32>
    %214 = vector.extract_strided_slice %208 {offsets = [0, 18], sizes = [8, 256], strides = [1, 1]} : vector<8x290xf32> to vector<8x256xf32>
    %215 = vector.extract_strided_slice %204 {offsets = [0, 32], sizes = [8, 256], strides = [1, 1]} : vector<8x290xf32> to vector<8x256xf32>
    %216 = vector.extract_strided_slice %205 {offsets = [0, 33], sizes = [8, 256], strides = [1, 1]} : vector<8x290xf32> to vector<8x256xf32>
    %217 = vector.extract_strided_slice %208 {offsets = [0, 34], sizes = [8, 256], strides = [1, 1]} : vector<8x290xf32> to vector<8x256xf32>
    %218 = tpu.concatenate %209, %210, %211, %212, %213, %214, %215, %216, %217 in 0 : vector<8x256xf32>, vector<8x256xf32>, vector<8x256xf32>, vector<8x256xf32>, vector<8x256xf32>, vector<8x256xf32>, vector<8x256xf32>, vector<8x256xf32>, vector<8x256xf32> -> vector<72x256xf32>
    %c72_68 = arith.constant 72 : index
    %c0_69 = arith.constant 0 : index
    %219 = vector.load %arg33[%c72_68, %c0_69] : memref<360x256xf32, #tpu.memory_space<vmem>>, vector<72x256xf32>
    tpu.vector_store %arg33[%c72_68, %c0_69], %218 {strides = array<i32>} : memref<360x256xf32, #tpu.memory_space<vmem>>, vector<72x256xf32>,
    %c0_70 = arith.constant 0 : index
    %c0_71 = arith.constant 0 : index
    %220 = vector.load %arg33[%c0_70, %c0_71] : memref<360x256xf32, #tpu.memory_space<vmem>>, vector<144x256xf32>
    %221 = arith.truncf %220 : vector<144x256xf32> to vector<144x256xbf16>
    %c0_72 = arith.constant 0 : index
    %c0_73 = arith.constant 0 : index
    %222 = vector.load %arg14[%c0_72, %c0_73] : memref<8x144xbf16, #tpu.memory_space<vmem>>, vector<8x144xbf16>
    %cst_74 = arith.constant dense<0.000000e+00> : vector<8x256xf32>
    %223 = tpu.matmul %222, %221, %cst_74 {dimension_numbers = #tpu.dot_dimension_numbers<[1], [0], [0], [1], [0, 0, 1, 1], [], []>} : vector<8x144xbf16>, vector<144x256xbf16>, vector<8x256xf32> -> vector<8x256xf32>
    %c0_75 = arith.constant 0 : index
    %c0_76 = arith.constant 0 : index
    %224 = vector.load %arg15[%c0_75, %c0_76] : memref<8x1xf32, #tpu.memory_space<vmem>>, vector<8x1xf32>
    %225 = vector.broadcast %224 : vector<8x1xf32> to vector<8x256xf32>
    %226 = arith.addf %223, %225 : vector<8x256xf32>
    %cst_77 = arith.constant 2.000000e-01 : f32
    %227 = vector.broadcast %cst_77 : f32 to vector<8x256xf32>
    %228 = arith.mulf %227, %226 : vector<8x256xf32>
    %229 = arith.maximumf %226, %228 : vector<8x256xf32>
    %cst_78 = arith.constant 0.000000e+00 : f32
    %230 = vector.broadcast %cst_78 : f32 to vector<8x17xf32>
    %231 = vector.broadcast %20 : vector<1x256xf32> to vector<8x256xf32>
    %232 = arith.mulf %229, %231 : vector<8x256xf32>
    %233 = tpu.concatenate %230, %232, %230 in 1 : vector<8x17xf32>, vector<8x256xf32>, vector<8x17xf32> -> vector<8x290xf32>
    %234 = tpu.concatenate %230, %229, %230 in 1 : vector<8x17xf32>, vector<8x256xf32>, vector<8x17xf32> -> vector<8x290xf32>
    %235 = vector.broadcast %24 : vector<1x256xf32> to vector<8x256xf32>
    %236 = arith.mulf %229, %235 : vector<8x256xf32>
    %237 = tpu.concatenate %230, %236, %230 in 1 : vector<8x17xf32>, vector<8x256xf32>, vector<8x17xf32> -> vector<8x290xf32>
    %238 = vector.extract_strided_slice %233 {offsets = [0, 0], sizes = [8, 256], strides = [1, 1]} : vector<8x290xf32> to vector<8x256xf32>
    %239 = vector.extract_strided_slice %234 {offsets = [0, 1], sizes = [8, 256], strides = [1, 1]} : vector<8x290xf32> to vector<8x256xf32>
    %240 = vector.extract_strided_slice %237 {offsets = [0, 2], sizes = [8, 256], strides = [1, 1]} : vector<8x290xf32> to vector<8x256xf32>
    %241 = vector.extract_strided_slice %233 {offsets = [0, 16], sizes = [8, 256], strides = [1, 1]} : vector<8x290xf32> to vector<8x256xf32>
    %242 = vector.extract_strided_slice %234 {offsets = [0, 17], sizes = [8, 256], strides = [1, 1]} : vector<8x290xf32> to vector<8x256xf32>
    %243 = vector.extract_strided_slice %237 {offsets = [0, 18], sizes = [8, 256], strides = [1, 1]} : vector<8x290xf32> to vector<8x256xf32>
    %244 = vector.extract_strided_slice %233 {offsets = [0, 32], sizes = [8, 256], strides = [1, 1]} : vector<8x290xf32> to vector<8x256xf32>
    %245 = vector.extract_strided_slice %234 {offsets = [0, 33], sizes = [8, 256], strides = [1, 1]} : vector<8x290xf32> to vector<8x256xf32>
    %246 = vector.extract_strided_slice %237 {offsets = [0, 34], sizes = [8, 256], strides = [1, 1]} : vector<8x290xf32> to vector<8x256xf32>
    %247 = tpu.concatenate %238, %239, %240, %241, %242, %243, %244, %245, %246 in 0 : vector<8x256xf32>, vector<8x256xf32>, vector<8x256xf32>, vector<8x256xf32>, vector<8x256xf32>, vector<8x256xf32>, vector<8x256xf32>, vector<8x256xf32>, vector<8x256xf32> -> vector<72x256xf32>
    %c144_79 = arith.constant 144 : index
    %c0_80 = arith.constant 0 : index
    %248 = vector.load %arg33[%c144_79, %c0_80] : memref<360x256xf32, #tpu.memory_space<vmem>>, vector<72x256xf32>
    tpu.vector_store %arg33[%c144_79, %c0_80], %247 {strides = array<i32>} : memref<360x256xf32, #tpu.memory_space<vmem>>, vector<72x256xf32>,
    %c0_81 = arith.constant 0 : index
    %c0_82 = arith.constant 0 : index
    %249 = vector.load %arg33[%c0_81, %c0_82] : memref<360x256xf32, #tpu.memory_space<vmem>>, vector<216x256xf32>
    %250 = arith.truncf %249 : vector<216x256xf32> to vector<216x256xbf16>
    %c0_83 = arith.constant 0 : index
    %c0_84 = arith.constant 0 : index
    %251 = vector.load %arg16[%c0_83, %c0_84] : memref<8x216xbf16, #tpu.memory_space<vmem>>, vector<8x216xbf16>
    %cst_85 = arith.constant dense<0.000000e+00> : vector<8x256xf32>
    %252 = tpu.matmul %251, %250, %cst_85 {dimension_numbers = #tpu.dot_dimension_numbers<[1], [0], [0], [1], [0, 0, 1, 1], [], []>} : vector<8x216xbf16>, vector<216x256xbf16>, vector<8x256xf32> -> vector<8x256xf32>
    %c0_86 = arith.constant 0 : index
    %c0_87 = arith.constant 0 : index
    %253 = vector.load %arg17[%c0_86, %c0_87] : memref<8x1xf32, #tpu.memory_space<vmem>>, vector<8x1xf32>
    %254 = vector.broadcast %253 : vector<8x1xf32> to vector<8x256xf32>
    %255 = arith.addf %252, %254 : vector<8x256xf32>
    %cst_88 = arith.constant 2.000000e-01 : f32
    %256 = vector.broadcast %cst_88 : f32 to vector<8x256xf32>
    %257 = arith.mulf %256, %255 : vector<8x256xf32>
    %258 = arith.maximumf %255, %257 : vector<8x256xf32>
    %cst_89 = arith.constant 0.000000e+00 : f32
    %259 = vector.broadcast %cst_89 : f32 to vector<8x17xf32>
    %260 = vector.broadcast %20 : vector<1x256xf32> to vector<8x256xf32>
    %261 = arith.mulf %258, %260 : vector<8x256xf32>
    %262 = tpu.concatenate %259, %261, %259 in 1 : vector<8x17xf32>, vector<8x256xf32>, vector<8x17xf32> -> vector<8x290xf32>
    %263 = tpu.concatenate %259, %258, %259 in 1 : vector<8x17xf32>, vector<8x256xf32>, vector<8x17xf32> -> vector<8x290xf32>
    %264 = vector.broadcast %24 : vector<1x256xf32> to vector<8x256xf32>
    %265 = arith.mulf %258, %264 : vector<8x256xf32>
    %266 = tpu.concatenate %259, %265, %259 in 1 : vector<8x17xf32>, vector<8x256xf32>, vector<8x17xf32> -> vector<8x290xf32>
    %267 = vector.extract_strided_slice %262 {offsets = [0, 0], sizes = [8, 256], strides = [1, 1]} : vector<8x290xf32> to vector<8x256xf32>
    %268 = vector.extract_strided_slice %263 {offsets = [0, 1], sizes = [8, 256], strides = [1, 1]} : vector<8x290xf32> to vector<8x256xf32>
    %269 = vector.extract_strided_slice %266 {offsets = [0, 2], sizes = [8, 256], strides = [1, 1]} : vector<8x290xf32> to vector<8x256xf32>
    %270 = vector.extract_strided_slice %262 {offsets = [0, 16], sizes = [8, 256], strides = [1, 1]} : vector<8x290xf32> to vector<8x256xf32>
    %271 = vector.extract_strided_slice %263 {offsets = [0, 17], sizes = [8, 256], strides = [1, 1]} : vector<8x290xf32> to vector<8x256xf32>
    %272 = vector.extract_strided_slice %266 {offsets = [0, 18], sizes = [8, 256], strides = [1, 1]} : vector<8x290xf32> to vector<8x256xf32>
    %273 = vector.extract_strided_slice %262 {offsets = [0, 32], sizes = [8, 256], strides = [1, 1]} : vector<8x290xf32> to vector<8x256xf32>
    %274 = vector.extract_strided_slice %263 {offsets = [0, 33], sizes = [8, 256], strides = [1, 1]} : vector<8x290xf32> to vector<8x256xf32>
    %275 = vector.extract_strided_slice %266 {offsets = [0, 34], sizes = [8, 256], strides = [1, 1]} : vector<8x290xf32> to vector<8x256xf32>
    %276 = tpu.concatenate %267, %268, %269, %270, %271, %272, %273, %274, %275 in 0 : vector<8x256xf32>, vector<8x256xf32>, vector<8x256xf32>, vector<8x256xf32>, vector<8x256xf32>, vector<8x256xf32>, vector<8x256xf32>, vector<8x256xf32>, vector<8x256xf32> -> vector<72x256xf32>
    %c216_90 = arith.constant 216 : index
    %c0_91 = arith.constant 0 : index
    %277 = vector.load %arg33[%c216_90, %c0_91] : memref<360x256xf32, #tpu.memory_space<vmem>>, vector<72x256xf32>
    tpu.vector_store %arg33[%c216_90, %c0_91], %276 {strides = array<i32>} : memref<360x256xf32, #tpu.memory_space<vmem>>, vector<72x256xf32>,
    %c0_92 = arith.constant 0 : index
    %c0_93 = arith.constant 0 : index
    %278 = vector.load %arg33[%c0_92, %c0_93] : memref<360x256xf32, #tpu.memory_space<vmem>>, vector<288x256xf32>
    %279 = arith.truncf %278 : vector<288x256xf32> to vector<288x256xbf16>
    %c0_94 = arith.constant 0 : index
    %c0_95 = arith.constant 0 : index
    %280 = vector.load %arg18[%c0_94, %c0_95] : memref<8x288xbf16, #tpu.memory_space<vmem>>, vector<8x288xbf16>
    %cst_96 = arith.constant dense<0.000000e+00> : vector<8x256xf32>
    %281 = tpu.matmul %280, %279, %cst_96 {dimension_numbers = #tpu.dot_dimension_numbers<[1], [0], [0], [1], [0, 0, 1, 1], [], []>} : vector<8x288xbf16>, vector<288x256xbf16>, vector<8x256xf32> -> vector<8x256xf32>
    %c0_97 = arith.constant 0 : index
    %c0_98 = arith.constant 0 : index
    %282 = vector.load %arg19[%c0_97, %c0_98] : memref<8x1xf32, #tpu.memory_space<vmem>>, vector<8x1xf32>
    %283 = vector.broadcast %282 : vector<8x1xf32> to vector<8x256xf32>
    %284 = arith.addf %281, %283 : vector<8x256xf32>
    %cst_99 = arith.constant 2.000000e-01 : f32
    %285 = vector.broadcast %cst_99 : f32 to vector<8x256xf32>
    %286 = arith.mulf %285, %284 : vector<8x256xf32>
    %287 = arith.maximumf %284, %286 : vector<8x256xf32>
    %cst_100 = arith.constant 0.000000e+00 : f32
    %288 = vector.broadcast %cst_100 : f32 to vector<8x17xf32>
    %289 = vector.broadcast %20 : vector<1x256xf32> to vector<8x256xf32>
    %290 = arith.mulf %287, %289 : vector<8x256xf32>
    %291 = tpu.concatenate %288, %290, %288 in 1 : vector<8x17xf32>, vector<8x256xf32>, vector<8x17xf32> -> vector<8x290xf32>
    %292 = tpu.concatenate %288, %287, %288 in 1 : vector<8x17xf32>, vector<8x256xf32>, vector<8x17xf32> -> vector<8x290xf32>
    %293 = vector.broadcast %24 : vector<1x256xf32> to vector<8x256xf32>
    %294 = arith.mulf %287, %293 : vector<8x256xf32>
    %295 = tpu.concatenate %288, %294, %288 in 1 : vector<8x17xf32>, vector<8x256xf32>, vector<8x17xf32> -> vector<8x290xf32>
    %296 = vector.extract_strided_slice %291 {offsets = [0, 0], sizes = [8, 256], strides = [1, 1]} : vector<8x290xf32> to vector<8x256xf32>
    %297 = vector.extract_strided_slice %292 {offsets = [0, 1], sizes = [8, 256], strides = [1, 1]} : vector<8x290xf32> to vector<8x256xf32>
    %298 = vector.extract_strided_slice %295 {offsets = [0, 2], sizes = [8, 256], strides = [1, 1]} : vector<8x290xf32> to vector<8x256xf32>
    %299 = vector.extract_strided_slice %291 {offsets = [0, 16], sizes = [8, 256], strides = [1, 1]} : vector<8x290xf32> to vector<8x256xf32>
    %300 = vector.extract_strided_slice %292 {offsets = [0, 17], sizes = [8, 256], strides = [1, 1]} : vector<8x290xf32> to vector<8x256xf32>
    %301 = vector.extract_strided_slice %295 {offsets = [0, 18], sizes = [8, 256], strides = [1, 1]} : vector<8x290xf32> to vector<8x256xf32>
    %302 = vector.extract_strided_slice %291 {offsets = [0, 32], sizes = [8, 256], strides = [1, 1]} : vector<8x290xf32> to vector<8x256xf32>
    %303 = vector.extract_strided_slice %292 {offsets = [0, 33], sizes = [8, 256], strides = [1, 1]} : vector<8x290xf32> to vector<8x256xf32>
    %304 = vector.extract_strided_slice %295 {offsets = [0, 34], sizes = [8, 256], strides = [1, 1]} : vector<8x290xf32> to vector<8x256xf32>
    %305 = tpu.concatenate %296, %297, %298, %299, %300, %301, %302, %303, %304 in 0 : vector<8x256xf32>, vector<8x256xf32>, vector<8x256xf32>, vector<8x256xf32>, vector<8x256xf32>, vector<8x256xf32>, vector<8x256xf32>, vector<8x256xf32>, vector<8x256xf32> -> vector<72x256xf32>
    %c288_101 = arith.constant 288 : index
    %c0_102 = arith.constant 0 : index
    %306 = vector.load %arg33[%c288_101, %c0_102] : memref<360x256xf32, #tpu.memory_space<vmem>>, vector<72x256xf32>
    tpu.vector_store %arg33[%c288_101, %c0_102], %305 {strides = array<i32>} : memref<360x256xf32, #tpu.memory_space<vmem>>, vector<72x256xf32>,
    %c0_103 = arith.constant 0 : index
    %c0_104 = arith.constant 0 : index
    %307 = vector.load %arg33[%c0_103, %c0_104] : memref<360x256xf32, #tpu.memory_space<vmem>>, vector<360x256xf32>
    %308 = arith.truncf %307 : vector<360x256xf32> to vector<360x256xbf16>
    %c0_105 = arith.constant 0 : index
    %c0_106 = arith.constant 0 : index
    %309 = vector.load %arg20[%c0_105, %c0_106] : memref<8x360xbf16, #tpu.memory_space<vmem>>, vector<8x360xbf16>
    %cst_107 = arith.constant dense<0.000000e+00> : vector<8x256xf32>
    %310 = tpu.matmul %309, %308, %cst_107 {dimension_numbers = #tpu.dot_dimension_numbers<[1], [0], [0], [1], [0, 0, 1, 1], [], []>} : vector<8x360xbf16>, vector<360x256xbf16>, vector<8x256xf32> -> vector<8x256xf32>
    %c0_108 = arith.constant 0 : index
    %c0_109 = arith.constant 0 : index
    %311 = vector.load %arg21[%c0_108, %c0_109] : memref<8x1xf32, #tpu.memory_space<vmem>>, vector<8x1xf32>
    %312 = vector.broadcast %311 : vector<8x1xf32> to vector<8x256xf32>
    %313 = arith.addf %310, %312 : vector<8x256xf32>
    %cst_110 = arith.constant 2.000000e-01 : f32
    %314 = vector.broadcast %cst_110 : f32 to vector<8x256xf32>
    %315 = arith.mulf %313, %314 : vector<8x256xf32>
    %316 = arith.addf %315, %171 : vector<8x256xf32>
    %cst_111 = arith.constant 0.000000e+00 : f32
    %317 = vector.broadcast %cst_111 : f32 to vector<8x17xf32>
    %318 = vector.broadcast %20 : vector<1x256xf32> to vector<8x256xf32>
    %319 = arith.mulf %316, %318 : vector<8x256xf32>
    %320 = tpu.concatenate %317, %319, %317 in 1 : vector<8x17xf32>, vector<8x256xf32>, vector<8x17xf32> -> vector<8x290xf32>
    %321 = tpu.concatenate %317, %316, %317 in 1 : vector<8x17xf32>, vector<8x256xf32>, vector<8x17xf32> -> vector<8x290xf32>
    %322 = vector.broadcast %24 : vector<1x256xf32> to vector<8x256xf32>
    %323 = arith.mulf %316, %322 : vector<8x256xf32>
    %324 = tpu.concatenate %317, %323, %317 in 1 : vector<8x17xf32>, vector<8x256xf32>, vector<8x17xf32> -> vector<8x290xf32>
    %325 = vector.extract_strided_slice %320 {offsets = [0, 0], sizes = [8, 256], strides = [1, 1]} : vector<8x290xf32> to vector<8x256xf32>
    %326 = vector.extract_strided_slice %321 {offsets = [0, 1], sizes = [8, 256], strides = [1, 1]} : vector<8x290xf32> to vector<8x256xf32>
    %327 = vector.extract_strided_slice %324 {offsets = [0, 2], sizes = [8, 256], strides = [1, 1]} : vector<8x290xf32> to vector<8x256xf32>
    %328 = vector.extract_strided_slice %320 {offsets = [0, 16], sizes = [8, 256], strides = [1, 1]} : vector<8x290xf32> to vector<8x256xf32>
    %329 = vector.extract_strided_slice %321 {offsets = [0, 17], sizes = [8, 256], strides = [1, 1]} : vector<8x290xf32> to vector<8x256xf32>
    %330 = vector.extract_strided_slice %324 {offsets = [0, 18], sizes = [8, 256], strides = [1, 1]} : vector<8x290xf32> to vector<8x256xf32>
    %331 = vector.extract_strided_slice %320 {offsets = [0, 32], sizes = [8, 256], strides = [1, 1]} : vector<8x290xf32> to vector<8x256xf32>
    %332 = vector.extract_strided_slice %321 {offsets = [0, 33], sizes = [8, 256], strides = [1, 1]} : vector<8x290xf32> to vector<8x256xf32>
    %333 = vector.extract_strided_slice %324 {offsets = [0, 34], sizes = [8, 256], strides = [1, 1]} : vector<8x290xf32> to vector<8x256xf32>
    %334 = tpu.concatenate %325, %326, %327, %328, %329, %330, %331, %332, %333 in 0 : vector<8x256xf32>, vector<8x256xf32>, vector<8x256xf32>, vector<8x256xf32>, vector<8x256xf32>, vector<8x256xf32>, vector<8x256xf32>, vector<8x256xf32>, vector<8x256xf32> -> vector<72x256xf32>
    %c0_112 = arith.constant 0 : index
    %c0_113 = arith.constant 0 : index
    %335 = vector.load %arg33[%c0_112, %c0_113] : memref<360x256xf32, #tpu.memory_space<vmem>>, vector<72x256xf32>
    tpu.vector_store %arg33[%c0_112, %c0_113], %334 {strides = array<i32>} : memref<360x256xf32, #tpu.memory_space<vmem>>, vector<72x256xf32>,
    %c0_114 = arith.constant 0 : index
    %c0_115 = arith.constant 0 : index
    %336 = vector.load %arg33[%c0_114, %c0_115] : memref<360x256xf32, #tpu.memory_space<vmem>>, vector<72x256xf32>
    %337 = arith.truncf %336 : vector<72x256xf32> to vector<72x256xbf16>
    %c0_116 = arith.constant 0 : index
    %c0_117 = arith.constant 0 : index
    %338 = vector.load %arg22[%c0_116, %c0_117] : memref<8x72xbf16, #tpu.memory_space<vmem>>, vector<8x72xbf16>
    %cst_118 = arith.constant dense<0.000000e+00> : vector<8x256xf32>
    %339 = tpu.matmul %338, %337, %cst_118 {dimension_numbers = #tpu.dot_dimension_numbers<[1], [0], [0], [1], [0, 0, 1, 1], [], []>} : vector<8x72xbf16>, vector<72x256xbf16>, vector<8x256xf32> -> vector<8x256xf32>
    %c0_119 = arith.constant 0 : index
    %c0_120 = arith.constant 0 : index
    %340 = vector.load %arg23[%c0_119, %c0_120] : memref<8x1xf32, #tpu.memory_space<vmem>>, vector<8x1xf32>
    %341 = vector.broadcast %340 : vector<8x1xf32> to vector<8x256xf32>
    %342 = arith.addf %339, %341 : vector<8x256xf32>
    %cst_121 = arith.constant 2.000000e-01 : f32
    %343 = vector.broadcast %cst_121 : f32 to vector<8x256xf32>
    %344 = arith.mulf %343, %342 : vector<8x256xf32>
    %345 = arith.maximumf %342, %344 : vector<8x256xf32>
    %cst_122 = arith.constant 0.000000e+00 : f32
    %346 = vector.broadcast %cst_122 : f32 to vector<8x17xf32>
    %347 = vector.broadcast %20 : vector<1x256xf32> to vector<8x256xf32>
    %348 = arith.mulf %345, %347 : vector<8x256xf32>
    %349 = tpu.concatenate %346, %348, %346 in 1 : vector<8x17xf32>, vector<8x256xf32>, vector<8x17xf32> -> vector<8x290xf32>
    %350 = tpu.concatenate %346, %345, %346 in 1 : vector<8x17xf32>, vector<8x256xf32>, vector<8x17xf32> -> vector<8x290xf32>
    %351 = vector.broadcast %24 : vector<1x256xf32> to vector<8x256xf32>
    %352 = arith.mulf %345, %351 : vector<8x256xf32>
    %353 = tpu.concatenate %346, %352, %346 in 1 : vector<8x17xf32>, vector<8x256xf32>, vector<8x17xf32> -> vector<8x290xf32>
    %354 = vector.extract_strided_slice %349 {offsets = [0, 0], sizes = [8, 256], strides = [1, 1]} : vector<8x290xf32> to vector<8x256xf32>
    %355 = vector.extract_strided_slice %350 {offsets = [0, 1], sizes = [8, 256], strides = [1, 1]} : vector<8x290xf32> to vector<8x256xf32>
    %356 = vector.extract_strided_slice %353 {offsets = [0, 2], sizes = [8, 256], strides = [1, 1]} : vector<8x290xf32> to vector<8x256xf32>
    %357 = vector.extract_strided_slice %349 {offsets = [0, 16], sizes = [8, 256], strides = [1, 1]} : vector<8x290xf32> to vector<8x256xf32>
    %358 = vector.extract_strided_slice %350 {offsets = [0, 17], sizes = [8, 256], strides = [1, 1]} : vector<8x290xf32> to vector<8x256xf32>
    %359 = vector.extract_strided_slice %353 {offsets = [0, 18], sizes = [8, 256], strides = [1, 1]} : vector<8x290xf32> to vector<8x256xf32>
    %360 = vector.extract_strided_slice %349 {offsets = [0, 32], sizes = [8, 256], strides = [1, 1]} : vector<8x290xf32> to vector<8x256xf32>
    %361 = vector.extract_strided_slice %350 {offsets = [0, 33], sizes = [8, 256], strides = [1, 1]} : vector<8x290xf32> to vector<8x256xf32>
    %362 = vector.extract_strided_slice %353 {offsets = [0, 34], sizes = [8, 256], strides = [1, 1]} : vector<8x290xf32> to vector<8x256xf32>
    %363 = tpu.concatenate %354, %355, %356, %357, %358, %359, %360, %361, %362 in 0 : vector<8x256xf32>, vector<8x256xf32>, vector<8x256xf32>, vector<8x256xf32>, vector<8x256xf32>, vector<8x256xf32>, vector<8x256xf32>, vector<8x256xf32>, vector<8x256xf32> -> vector<72x256xf32>
    %c72_123 = arith.constant 72 : index
    %c0_124 = arith.constant 0 : index
    %364 = vector.load %arg33[%c72_123, %c0_124] : memref<360x256xf32, #tpu.memory_space<vmem>>, vector<72x256xf32>
    tpu.vector_store %arg33[%c72_123, %c0_124], %363 {strides = array<i32>} : memref<360x256xf32, #tpu.memory_space<vmem>>, vector<72x256xf32>,
    %c0_125 = arith.constant 0 : index
    %c0_126 = arith.constant 0 : index
    %365 = vector.load %arg33[%c0_125, %c0_126] : memref<360x256xf32, #tpu.memory_space<vmem>>, vector<144x256xf32>
    %366 = arith.truncf %365 : vector<144x256xf32> to vector<144x256xbf16>
    %c0_127 = arith.constant 0 : index
    %c0_128 = arith.constant 0 : index
    %367 = vector.load %arg24[%c0_127, %c0_128] : memref<8x144xbf16, #tpu.memory_space<vmem>>, vector<8x144xbf16>
    %cst_129 = arith.constant dense<0.000000e+00> : vector<8x256xf32>
    %368 = tpu.matmul %367, %366, %cst_129 {dimension_numbers = #tpu.dot_dimension_numbers<[1], [0], [0], [1], [0, 0, 1, 1], [], []>} : vector<8x144xbf16>, vector<144x256xbf16>, vector<8x256xf32> -> vector<8x256xf32>
    %c0_130 = arith.constant 0 : index
    %c0_131 = arith.constant 0 : index
    %369 = vector.load %arg25[%c0_130, %c0_131] : memref<8x1xf32, #tpu.memory_space<vmem>>, vector<8x1xf32>
    %370 = vector.broadcast %369 : vector<8x1xf32> to vector<8x256xf32>
    %371 = arith.addf %368, %370 : vector<8x256xf32>
    %cst_132 = arith.constant 2.000000e-01 : f32
    %372 = vector.broadcast %cst_132 : f32 to vector<8x256xf32>
    %373 = arith.mulf %372, %371 : vector<8x256xf32>
    %374 = arith.maximumf %371, %373 : vector<8x256xf32>
    %cst_133 = arith.constant 0.000000e+00 : f32
    %375 = vector.broadcast %cst_133 : f32 to vector<8x17xf32>
    %376 = vector.broadcast %20 : vector<1x256xf32> to vector<8x256xf32>
    %377 = arith.mulf %374, %376 : vector<8x256xf32>
    %378 = tpu.concatenate %375, %377, %375 in 1 : vector<8x17xf32>, vector<8x256xf32>, vector<8x17xf32> -> vector<8x290xf32>
    %379 = tpu.concatenate %375, %374, %375 in 1 : vector<8x17xf32>, vector<8x256xf32>, vector<8x17xf32> -> vector<8x290xf32>
    %380 = vector.broadcast %24 : vector<1x256xf32> to vector<8x256xf32>
    %381 = arith.mulf %374, %380 : vector<8x256xf32>
    %382 = tpu.concatenate %375, %381, %375 in 1 : vector<8x17xf32>, vector<8x256xf32>, vector<8x17xf32> -> vector<8x290xf32>
    %383 = vector.extract_strided_slice %378 {offsets = [0, 0], sizes = [8, 256], strides = [1, 1]} : vector<8x290xf32> to vector<8x256xf32>
    %384 = vector.extract_strided_slice %379 {offsets = [0, 1], sizes = [8, 256], strides = [1, 1]} : vector<8x290xf32> to vector<8x256xf32>
    %385 = vector.extract_strided_slice %382 {offsets = [0, 2], sizes = [8, 256], strides = [1, 1]} : vector<8x290xf32> to vector<8x256xf32>
    %386 = vector.extract_strided_slice %378 {offsets = [0, 16], sizes = [8, 256], strides = [1, 1]} : vector<8x290xf32> to vector<8x256xf32>
    %387 = vector.extract_strided_slice %379 {offsets = [0, 17], sizes = [8, 256], strides = [1, 1]} : vector<8x290xf32> to vector<8x256xf32>
    %388 = vector.extract_strided_slice %382 {offsets = [0, 18], sizes = [8, 256], strides = [1, 1]} : vector<8x290xf32> to vector<8x256xf32>
    %389 = vector.extract_strided_slice %378 {offsets = [0, 32], sizes = [8, 256], strides = [1, 1]} : vector<8x290xf32> to vector<8x256xf32>
    %390 = vector.extract_strided_slice %379 {offsets = [0, 33], sizes = [8, 256], strides = [1, 1]} : vector<8x290xf32> to vector<8x256xf32>
    %391 = vector.extract_strided_slice %382 {offsets = [0, 34], sizes = [8, 256], strides = [1, 1]} : vector<8x290xf32> to vector<8x256xf32>
    %392 = tpu.concatenate %383, %384, %385, %386, %387, %388, %389, %390, %391 in 0 : vector<8x256xf32>, vector<8x256xf32>, vector<8x256xf32>, vector<8x256xf32>, vector<8x256xf32>, vector<8x256xf32>, vector<8x256xf32>, vector<8x256xf32>, vector<8x256xf32> -> vector<72x256xf32>
    %c144_134 = arith.constant 144 : index
    %c0_135 = arith.constant 0 : index
    %393 = vector.load %arg33[%c144_134, %c0_135] : memref<360x256xf32, #tpu.memory_space<vmem>>, vector<72x256xf32>
    tpu.vector_store %arg33[%c144_134, %c0_135], %392 {strides = array<i32>} : memref<360x256xf32, #tpu.memory_space<vmem>>, vector<72x256xf32>,
    %c0_136 = arith.constant 0 : index
    %c0_137 = arith.constant 0 : index
    %394 = vector.load %arg33[%c0_136, %c0_137] : memref<360x256xf32, #tpu.memory_space<vmem>>, vector<216x256xf32>
    %395 = arith.truncf %394 : vector<216x256xf32> to vector<216x256xbf16>
    %c0_138 = arith.constant 0 : index
    %c0_139 = arith.constant 0 : index
    %396 = vector.load %arg26[%c0_138, %c0_139] : memref<8x216xbf16, #tpu.memory_space<vmem>>, vector<8x216xbf16>
    %cst_140 = arith.constant dense<0.000000e+00> : vector<8x256xf32>
    %397 = tpu.matmul %396, %395, %cst_140 {dimension_numbers = #tpu.dot_dimension_numbers<[1], [0], [0], [1], [0, 0, 1, 1], [], []>} : vector<8x216xbf16>, vector<216x256xbf16>, vector<8x256xf32> -> vector<8x256xf32>
    %c0_141 = arith.constant 0 : index
    %c0_142 = arith.constant 0 : index
    %398 = vector.load %arg27[%c0_141, %c0_142] : memref<8x1xf32, #tpu.memory_space<vmem>>, vector<8x1xf32>
    %399 = vector.broadcast %398 : vector<8x1xf32> to vector<8x256xf32>
    %400 = arith.addf %397, %399 : vector<8x256xf32>
    %cst_143 = arith.constant 2.000000e-01 : f32
    %401 = vector.broadcast %cst_143 : f32 to vector<8x256xf32>
    %402 = arith.mulf %401, %400 : vector<8x256xf32>
    %403 = arith.maximumf %400, %402 : vector<8x256xf32>
    %cst_144 = arith.constant 0.000000e+00 : f32
    %404 = vector.broadcast %cst_144 : f32 to vector<8x17xf32>
    %405 = vector.broadcast %20 : vector<1x256xf32> to vector<8x256xf32>
    %406 = arith.mulf %403, %405 : vector<8x256xf32>
    %407 = tpu.concatenate %404, %406, %404 in 1 : vector<8x17xf32>, vector<8x256xf32>, vector<8x17xf32> -> vector<8x290xf32>
    %408 = tpu.concatenate %404, %403, %404 in 1 : vector<8x17xf32>, vector<8x256xf32>, vector<8x17xf32> -> vector<8x290xf32>
    %409 = vector.broadcast %24 : vector<1x256xf32> to vector<8x256xf32>
    %410 = arith.mulf %403, %409 : vector<8x256xf32>
    %411 = tpu.concatenate %404, %410, %404 in 1 : vector<8x17xf32>, vector<8x256xf32>, vector<8x17xf32> -> vector<8x290xf32>
    %412 = vector.extract_strided_slice %407 {offsets = [0, 0], sizes = [8, 256], strides = [1, 1]} : vector<8x290xf32> to vector<8x256xf32>
    %413 = vector.extract_strided_slice %408 {offsets = [0, 1], sizes = [8, 256], strides = [1, 1]} : vector<8x290xf32> to vector<8x256xf32>
    %414 = vector.extract_strided_slice %411 {offsets = [0, 2], sizes = [8, 256], strides = [1, 1]} : vector<8x290xf32> to vector<8x256xf32>
    %415 = vector.extract_strided_slice %407 {offsets = [0, 16], sizes = [8, 256], strides = [1, 1]} : vector<8x290xf32> to vector<8x256xf32>
    %416 = vector.extract_strided_slice %408 {offsets = [0, 17], sizes = [8, 256], strides = [1, 1]} : vector<8x290xf32> to vector<8x256xf32>
    %417 = vector.extract_strided_slice %411 {offsets = [0, 18], sizes = [8, 256], strides = [1, 1]} : vector<8x290xf32> to vector<8x256xf32>
    %418 = vector.extract_strided_slice %407 {offsets = [0, 32], sizes = [8, 256], strides = [1, 1]} : vector<8x290xf32> to vector<8x256xf32>
    %419 = vector.extract_strided_slice %408 {offsets = [0, 33], sizes = [8, 256], strides = [1, 1]} : vector<8x290xf32> to vector<8x256xf32>
    %420 = vector.extract_strided_slice %411 {offsets = [0, 34], sizes = [8, 256], strides = [1, 1]} : vector<8x290xf32> to vector<8x256xf32>
    %421 = tpu.concatenate %412, %413, %414, %415, %416, %417, %418, %419, %420 in 0 : vector<8x256xf32>, vector<8x256xf32>, vector<8x256xf32>, vector<8x256xf32>, vector<8x256xf32>, vector<8x256xf32>, vector<8x256xf32>, vector<8x256xf32>, vector<8x256xf32> -> vector<72x256xf32>
    %c216_145 = arith.constant 216 : index
    %c0_146 = arith.constant 0 : index
    %422 = vector.load %arg33[%c216_145, %c0_146] : memref<360x256xf32, #tpu.memory_space<vmem>>, vector<72x256xf32>
    tpu.vector_store %arg33[%c216_145, %c0_146], %421 {strides = array<i32>} : memref<360x256xf32, #tpu.memory_space<vmem>>, vector<72x256xf32>,
    %c0_147 = arith.constant 0 : index
    %c0_148 = arith.constant 0 : index
    %423 = vector.load %arg33[%c0_147, %c0_148] : memref<360x256xf32, #tpu.memory_space<vmem>>, vector<288x256xf32>
    %424 = arith.truncf %423 : vector<288x256xf32> to vector<288x256xbf16>
    %c0_149 = arith.constant 0 : index
    %c0_150 = arith.constant 0 : index
    %425 = vector.load %arg28[%c0_149, %c0_150] : memref<8x288xbf16, #tpu.memory_space<vmem>>, vector<8x288xbf16>
    %cst_151 = arith.constant dense<0.000000e+00> : vector<8x256xf32>
    %426 = tpu.matmul %425, %424, %cst_151 {dimension_numbers = #tpu.dot_dimension_numbers<[1], [0], [0], [1], [0, 0, 1, 1], [], []>} : vector<8x288xbf16>, vector<288x256xbf16>, vector<8x256xf32> -> vector<8x256xf32>
    %c0_152 = arith.constant 0 : index
    %c0_153 = arith.constant 0 : index
    %427 = vector.load %arg29[%c0_152, %c0_153] : memref<8x1xf32, #tpu.memory_space<vmem>>, vector<8x1xf32>
    %428 = vector.broadcast %427 : vector<8x1xf32> to vector<8x256xf32>
    %429 = arith.addf %426, %428 : vector<8x256xf32>
    %cst_154 = arith.constant 2.000000e-01 : f32
    %430 = vector.broadcast %cst_154 : f32 to vector<8x256xf32>
    %431 = arith.mulf %430, %429 : vector<8x256xf32>
    %432 = arith.maximumf %429, %431 : vector<8x256xf32>
    %cst_155 = arith.constant 0.000000e+00 : f32
    %433 = vector.broadcast %cst_155 : f32 to vector<8x17xf32>
    %434 = vector.broadcast %20 : vector<1x256xf32> to vector<8x256xf32>
    %435 = arith.mulf %432, %434 : vector<8x256xf32>
    %436 = tpu.concatenate %433, %435, %433 in 1 : vector<8x17xf32>, vector<8x256xf32>, vector<8x17xf32> -> vector<8x290xf32>
    %437 = tpu.concatenate %433, %432, %433 in 1 : vector<8x17xf32>, vector<8x256xf32>, vector<8x17xf32> -> vector<8x290xf32>
    %438 = vector.broadcast %24 : vector<1x256xf32> to vector<8x256xf32>
    %439 = arith.mulf %432, %438 : vector<8x256xf32>
    %440 = tpu.concatenate %433, %439, %433 in 1 : vector<8x17xf32>, vector<8x256xf32>, vector<8x17xf32> -> vector<8x290xf32>
    %441 = vector.extract_strided_slice %436 {offsets = [0, 0], sizes = [8, 256], strides = [1, 1]} : vector<8x290xf32> to vector<8x256xf32>
    %442 = vector.extract_strided_slice %437 {offsets = [0, 1], sizes = [8, 256], strides = [1, 1]} : vector<8x290xf32> to vector<8x256xf32>
    %443 = vector.extract_strided_slice %440 {offsets = [0, 2], sizes = [8, 256], strides = [1, 1]} : vector<8x290xf32> to vector<8x256xf32>
    %444 = vector.extract_strided_slice %436 {offsets = [0, 16], sizes = [8, 256], strides = [1, 1]} : vector<8x290xf32> to vector<8x256xf32>
    %445 = vector.extract_strided_slice %437 {offsets = [0, 17], sizes = [8, 256], strides = [1, 1]} : vector<8x290xf32> to vector<8x256xf32>
    %446 = vector.extract_strided_slice %440 {offsets = [0, 18], sizes = [8, 256], strides = [1, 1]} : vector<8x290xf32> to vector<8x256xf32>
    %447 = vector.extract_strided_slice %436 {offsets = [0, 32], sizes = [8, 256], strides = [1, 1]} : vector<8x290xf32> to vector<8x256xf32>
    %448 = vector.extract_strided_slice %437 {offsets = [0, 33], sizes = [8, 256], strides = [1, 1]} : vector<8x290xf32> to vector<8x256xf32>
    %449 = vector.extract_strided_slice %440 {offsets = [0, 34], sizes = [8, 256], strides = [1, 1]} : vector<8x290xf32> to vector<8x256xf32>
    %450 = tpu.concatenate %441, %442, %443, %444, %445, %446, %447, %448, %449 in 0 : vector<8x256xf32>, vector<8x256xf32>, vector<8x256xf32>, vector<8x256xf32>, vector<8x256xf32>, vector<8x256xf32>, vector<8x256xf32>, vector<8x256xf32>, vector<8x256xf32> -> vector<72x256xf32>
    %c288_156 = arith.constant 288 : index
    %c0_157 = arith.constant 0 : index
    %451 = vector.load %arg33[%c288_156, %c0_157] : memref<360x256xf32, #tpu.memory_space<vmem>>, vector<72x256xf32>
    tpu.vector_store %arg33[%c288_156, %c0_157], %450 {strides = array<i32>} : memref<360x256xf32, #tpu.memory_space<vmem>>, vector<72x256xf32>,
    %c0_158 = arith.constant 0 : index
    %c0_159 = arith.constant 0 : index
    %452 = vector.load %arg33[%c0_158, %c0_159] : memref<360x256xf32, #tpu.memory_space<vmem>>, vector<360x256xf32>
    %453 = arith.truncf %452 : vector<360x256xf32> to vector<360x256xbf16>
    %c0_160 = arith.constant 0 : index
    %c0_161 = arith.constant 0 : index
    %454 = vector.load %arg30[%c0_160, %c0_161] : memref<8x360xbf16, #tpu.memory_space<vmem>>, vector<8x360xbf16>
    %cst_162 = arith.constant dense<0.000000e+00> : vector<8x256xf32>
    %455 = tpu.matmul %454, %453, %cst_162 {dimension_numbers = #tpu.dot_dimension_numbers<[1], [0], [0], [1], [0, 0, 1, 1], [], []>} : vector<8x360xbf16>, vector<360x256xbf16>, vector<8x256xf32> -> vector<8x256xf32>
    %c0_163 = arith.constant 0 : index
    %c0_164 = arith.constant 0 : index
    %456 = vector.load %arg31[%c0_163, %c0_164] : memref<8x1xf32, #tpu.memory_space<vmem>>, vector<8x1xf32>
    %457 = vector.broadcast %456 : vector<8x1xf32> to vector<8x256xf32>
    %458 = arith.addf %455, %457 : vector<8x256xf32>
    %cst_165 = arith.constant 2.000000e-01 : f32
    %459 = vector.broadcast %cst_165 : f32 to vector<8x256xf32>
    %460 = arith.mulf %458, %459 : vector<8x256xf32>
    %461 = arith.addf %460, %316 : vector<8x256xf32>
    %cst_166 = arith.constant 2.000000e-01 : f32
    %462 = vector.broadcast %cst_166 : f32 to vector<8x256xf32>
    %463 = arith.mulf %461, %462 : vector<8x256xf32>
    %464 = arith.addf %463, %26 : vector<8x256xf32>
    %c0_167 = arith.constant 0 : index
    %c0_168 = arith.constant 0 : index
    %c0_169 = arith.constant 0 : index
    %465 = vector.load %arg32[%c0_167, %c0_168, %c0_169] : memref<1x8x256xf32, #tpu.memory_space<vmem>>, vector<1x8x256xf32>
    %466 = vector.shape_cast %465 : vector<1x8x256xf32> to vector<8x256xf32>
    %467 = vector.shape_cast %464 : vector<8x256xf32> to vector<1x8x256xf32>
    tpu.vector_store %arg32[%c0_167, %c0_168, %c0_169], %467 {strides = array<i32>} : memref<1x8x256xf32, #tpu.memory_space<vmem>>, vector<1x8x256xf32>,
    return
  }
  func.func @transform_0(%arg0: i32) -> (i32, i32, i32) {
    %c0_i32 = arith.constant 0 : i32
    %c0_i32_0 = arith.constant 0 : i32
    %c0_i32_1 = arith.constant 0 : i32
    return %arg0, %c0_i32, %c0_i32_0 : i32, i32, i32
  }
  func.func @transform_1(%arg0: i32) -> (i32, i32) {
    %c0_i32 = arith.constant 0 : i32
    %c0_i32_0 = arith.constant 0 : i32
    %c0_i32_1 = arith.constant 0 : i32
    return %c0_i32, %c0_i32_0 : i32, i32
  }
  func.func @transform_2(%arg0: i32) -> (i32, i32) {
    %c0_i32 = arith.constant 0 : i32
    %c0_i32_0 = arith.constant 0 : i32
    %c0_i32_1 = arith.constant 0 : i32
    return %c0_i32, %c0_i32_0 : i32, i32
  }
  func.func @transform_3(%arg0: i32) -> (i32, i32) {
    %c0_i32 = arith.constant 0 : i32
    %c0_i32_0 = arith.constant 0 : i32
    %c0_i32_1 = arith.constant 0 : i32
    return %c0_i32, %c0_i32_0 : i32, i32
  }
  func.func @transform_4(%arg0: i32) -> (i32, i32) {
    %c0_i32 = arith.constant 0 : i32
    %c0_i32_0 = arith.constant 0 : i32
    %c0_i32_1 = arith.constant 0 : i32
    return %c0_i32, %c0_i32_0 : i32, i32
  }
  func.func @transform_5(%arg0: i32) -> (i32, i32) {
    %c0_i32 = arith.constant 0 : i32
    %c0_i32_0 = arith.constant 0 : i32
    %c0_i32_1 = arith.constant 0 : i32
    return %c0_i32, %c0_i32_0 : i32, i32
  }
  func.func @transform_6(%arg0: i32) -> (i32, i32) {
    %c0_i32 = arith.constant 0 : i32
    %c0_i32_0 = arith.constant 0 : i32
    %c0_i32_1 = arith.constant 0 : i32
    return %c0_i32, %c0_i32_0 : i32, i32
  }
  func.func @transform_7(%arg0: i32) -> (i32, i32) {
    %c0_i32 = arith.constant 0 : i32
    %c0_i32_0 = arith.constant 0 : i32
    %c0_i32_1 = arith.constant 0 : i32
    return %c0_i32, %c0_i32_0 : i32, i32
  }
  func.func @transform_8(%arg0: i32) -> (i32, i32) {
    %c0_i32 = arith.constant 0 : i32
    %c0_i32_0 = arith.constant 0 : i32
    %c0_i32_1 = arith.constant 0 : i32
    return %c0_i32, %c0_i32_0 : i32, i32
  }
  func.func @transform_9(%arg0: i32) -> (i32, i32) {
    %c0_i32 = arith.constant 0 : i32
    %c0_i32_0 = arith.constant 0 : i32
    %c0_i32_1 = arith.constant 0 : i32
    return %c0_i32, %c0_i32_0 : i32, i32
  }
  func.func @transform_10(%arg0: i32) -> (i32, i32) {
    %c0_i32 = arith.constant 0 : i32
    %c0_i32_0 = arith.constant 0 : i32
    %c0_i32_1 = arith.constant 0 : i32
    return %c0_i32, %c0_i32_0 : i32, i32
  }
  func.func @transform_11(%arg0: i32) -> (i32, i32) {
    %c0_i32 = arith.constant 0 : i32
    %c0_i32_0 = arith.constant 0 : i32
    %c0_i32_1 = arith.constant 0 : i32
    return %c0_i32, %c0_i32_0 : i32, i32
  }
  func.func @transform_12(%arg0: i32) -> (i32, i32) {
    %c0_i32 = arith.constant 0 : i32
    %c0_i32_0 = arith.constant 0 : i32
    %c0_i32_1 = arith.constant 0 : i32
    return %c0_i32, %c0_i32_0 : i32, i32
  }
  func.func @transform_13(%arg0: i32) -> (i32, i32) {
    %c0_i32 = arith.constant 0 : i32
    %c0_i32_0 = arith.constant 0 : i32
    %c0_i32_1 = arith.constant 0 : i32
    return %c0_i32, %c0_i32_0 : i32, i32
  }
  func.func @transform_14(%arg0: i32) -> (i32, i32) {
    %c0_i32 = arith.constant 0 : i32
    %c0_i32_0 = arith.constant 0 : i32
    %c0_i32_1 = arith.constant 0 : i32
    return %c0_i32, %c0_i32_0 : i32, i32
  }
  func.func @transform_15(%arg0: i32) -> (i32, i32) {
    %c0_i32 = arith.constant 0 : i32
    %c0_i32_0 = arith.constant 0 : i32
    %c0_i32_1 = arith.constant 0 : i32
    return %c0_i32, %c0_i32_0 : i32, i32
  }
  func.func @transform_16(%arg0: i32) -> (i32, i32) {
    %c0_i32 = arith.constant 0 : i32
    %c0_i32_0 = arith.constant 0 : i32
    %c0_i32_1 = arith.constant 0 : i32
    return %c0_i32, %c0_i32_0 : i32, i32
  }
  func.func @transform_17(%arg0: i32) -> (i32, i32) {
    %c0_i32 = arith.constant 0 : i32
    %c0_i32_0 = arith.constant 0 : i32
    %c0_i32_1 = arith.constant 0 : i32
    return %c0_i32, %c0_i32_0 : i32, i32
  }
  func.func @transform_18(%arg0: i32) -> (i32, i32) {
    %c0_i32 = arith.constant 0 : i32
    %c0_i32_0 = arith.constant 0 : i32
    %c0_i32_1 = arith.constant 0 : i32
    return %c0_i32, %c0_i32_0 : i32, i32
  }
  func.func @transform_19(%arg0: i32) -> (i32, i32) {
    %c0_i32 = arith.constant 0 : i32
    %c0_i32_0 = arith.constant 0 : i32
    %c0_i32_1 = arith.constant 0 : i32
    return %c0_i32, %c0_i32_0 : i32, i32
  }
  func.func @transform_20(%arg0: i32) -> (i32, i32) {
    %c0_i32 = arith.constant 0 : i32
    %c0_i32_0 = arith.constant 0 : i32
    %c0_i32_1 = arith.constant 0 : i32
    return %c0_i32, %c0_i32_0 : i32, i32
  }
  func.func @transform_21(%arg0: i32) -> (i32, i32) {
    %c0_i32 = arith.constant 0 : i32
    %c0_i32_0 = arith.constant 0 : i32
    %c0_i32_1 = arith.constant 0 : i32
    return %c0_i32, %c0_i32_0 : i32, i32
  }
  func.func @transform_22(%arg0: i32) -> (i32, i32) {
    %c0_i32 = arith.constant 0 : i32
    %c0_i32_0 = arith.constant 0 : i32
    %c0_i32_1 = arith.constant 0 : i32
    return %c0_i32, %c0_i32_0 : i32, i32
  }
  func.func @transform_23(%arg0: i32) -> (i32, i32) {
    %c0_i32 = arith.constant 0 : i32
    %c0_i32_0 = arith.constant 0 : i32
    %c0_i32_1 = arith.constant 0 : i32
    return %c0_i32, %c0_i32_0 : i32, i32
  }
  func.func @transform_24(%arg0: i32) -> (i32, i32) {
    %c0_i32 = arith.constant 0 : i32
    %c0_i32_0 = arith.constant 0 : i32
    %c0_i32_1 = arith.constant 0 : i32
    return %c0_i32, %c0_i32_0 : i32, i32
  }
  func.func @transform_25(%arg0: i32) -> (i32, i32) {
    %c0_i32 = arith.constant 0 : i32
    %c0_i32_0 = arith.constant 0 : i32
    %c0_i32_1 = arith.constant 0 : i32
    return %c0_i32, %c0_i32_0 : i32, i32
  }
  func.func @transform_26(%arg0: i32) -> (i32, i32) {
    %c0_i32 = arith.constant 0 : i32
    %c0_i32_0 = arith.constant 0 : i32
    %c0_i32_1 = arith.constant 0 : i32
    return %c0_i32, %c0_i32_0 : i32, i32
  }
  func.func @transform_27(%arg0: i32) -> (i32, i32) {
    %c0_i32 = arith.constant 0 : i32
    %c0_i32_0 = arith.constant 0 : i32
    %c0_i32_1 = arith.constant 0 : i32
    return %c0_i32, %c0_i32_0 : i32, i32
  }
  func.func @transform_28(%arg0: i32) -> (i32, i32) {
    %c0_i32 = arith.constant 0 : i32
    %c0_i32_0 = arith.constant 0 : i32
    %c0_i32_1 = arith.constant 0 : i32
    return %c0_i32, %c0_i32_0 : i32, i32
  }
  func.func @transform_29(%arg0: i32) -> (i32, i32) {
    %c0_i32 = arith.constant 0 : i32
    %c0_i32_0 = arith.constant 0 : i32
    %c0_i32_1 = arith.constant 0 : i32
    return %c0_i32, %c0_i32_0 : i32, i32
  }
  func.func @transform_30(%arg0: i32) -> (i32, i32) {
    %c0_i32 = arith.constant 0 : i32
    %c0_i32_0 = arith.constant 0 : i32
    %c0_i32_1 = arith.constant 0 : i32
    return %c0_i32, %c0_i32_0 : i32, i32
  }
  func.func @transform_31(%arg0: i32) -> (i32, i32, i32) {
    %c0_i32 = arith.constant 0 : i32
    %c0_i32_0 = arith.constant 0 : i32
    %c0_i32_1 = arith.constant 0 : i32
    return %arg0, %c0_i32, %c0_i32_0 : i32, i32, i32
  }
}

</mosaic_0001>

<bundles_post_ra>
// kernel: rrdb_forward_nchw.1
= control target key start
LH: loop header
LB: loop body
LE: loop exit
PB: predicated region body
PF: predicated region fallthrough
CT: control target
= control target key end

     0   :  { %s6860_s6 = smov 1   ;;  %s6861_s10 = smov 2   ;;  %s8868_s0 = inlined_call_operand.smem [shape: u32[32], index: -1, kind: input, shape index: {}] }
   0x1   :  { %s6911_s5 = sld [smem:[%s8868_s0]]   ;;  %s6862_s14 = smov 3  }
   0x2   :  { %s6916_s9 = sld [smem:[%s8868_s0 + %s6860_s6]]   ;;  %s6863_s18 = smov 4  }
   0x3   :  { %s6921_s13 = sld [smem:[%s8868_s0 + %s6861_s10]]   ;;  %s6864_s22 = smov 5  }
   0x4   :  { %s6926_s17 = sld [smem:[%s8868_s0 + %s6862_s14]]   ;;  %s6865_s26 = smov 6  }
   0x5   :  { %s6931_s21 = sld [smem:[%s8868_s0 + %s6863_s18]]   ;;  %s6866_s30 = smov 7  }
   0x6   :  { %s6936_s25 = sld [smem:[%s8868_s0 + %s6864_s22]]   ;;  %s6867_s4 = smov 8  }
   0x7   :  { %s6941_s29 = sld [smem:[%s8868_s0 + %s6865_s26]]   ;;  %s6868_s10 = smov 9  }
   0x8   :  { %s6946_s3 = sld [smem:[%s8868_s0 + %s6866_s30]]   ;;  %s6869_s15 = smov 10  }
   0x9   :  { %s6951_s8 = sld [smem:[%s8868_s0 + %s6867_s4]]   ;;  %s6870_s20 = smov 11  }
   0xa   :  { %s6956_s14 = sld [smem:[%s8868_s0 + %s6868_s10]]   ;;  %s6871_s26 = smov 12  }
   0xb   :  { %s6961_s19 = sld [smem:[%s8868_s0 + %s6869_s15]]   ;;  %s6872_s1 = smov 13  }
   0xc   :  { %s6966_s24 = sld [smem:[%s8868_s0 + %s6870_s20]]   ;;  %s6873_s7 = smov 14  }
   0xd   :  { %s6971_s30 = sld [smem:[%s8868_s0 + %s6871_s26]]   ;;  %s6874_s15 = smov 15  }
   0xe   :  { %8896 = sst [smem:[#allocation3_spill]] %s6946_s3  ;;  %s6875_s22 = smov 16  }
   0xf   :  { %s6976_s6 = sld [smem:[%s8868_s0 + %s6872_s1]]   ;;  %s6876_s28 = smov 17  }
  0x10   :  { %s6981_s12 = sld [smem:[%s8868_s0 + %s6873_s7]]   ;;  %s6877_s7 = smov 18  }
  0x11   :  { %s6986_s20 = sld [smem:[%s8868_s0 + %s6874_s15]]   ;;  %s6878_s15 = smov 19  }
  0x12   :  { %s6991_s27 = sld [smem:[%s8868_s0 + %s6875_s22]]   ;;  %s6879_s22 = smov 20  }
  0x13   :  { %s6996_s4 = sld [smem:[%s8868_s0 + %s6876_s28]]   ;;  %s6880_s28 = smov 21  }
  0x15   :  { %8897 = sst [smem:[#allocation4_spill]] %s6976_s6 }
  0x16   :  { %s7001_s6 = sld [smem:[%s8868_s0 + %s6877_s7]]   ;;  %s6881_s7 = smov 22  }
  0x17   :  { %8898 = sst [smem:[#allocation5_spill]] %s6986_s20 }
  0x18   :  { %8899 = sst [smem:[#allocation6_spill]] %s6991_s27 }
  0x19   :  { %8900 = sst [smem:[#allocation7_spill]] %s6996_s4 }
  0x1a   :  { %s7006_s20 = sld [smem:[%s8868_s0 + %s6878_s15]]   ;;  %s6882_s15 = smov 23  }
  0x1b   :  { %s7011_s27 = sld [smem:[%s8868_s0 + %s6879_s22]]   ;;  %s6883_s22 = smov 24  }
  0x1c   :  { %8901 = sst [smem:[#allocation8_spill]] %s7001_s6 }
  0x1d   :  { %s7016_s4 = sld [smem:[%s8868_s0 + %s6880_s28]]   ;;  %s6884_s28 = smov 25  }
  0x1e   :  { %s7021_s6 = sld [smem:[%s8868_s0 + %s6881_s7]]   ;;  %s6885_s7 = smov 26  }
  0x20   :  { %8902 = sst [smem:[#allocation9_spill]] %s7006_s20 }
  0x21   :  { %8903 = sst [smem:[#allocation10_spill]] %s7011_s27 }
  0x22   :  { %s7026_s20 = sld [smem:[%s8868_s0 + %s6882_s15]]   ;;  %s6886_s15 = smov 27  }
  0x23   :  { %8904 = sst [smem:[#allocation11_spill]] %s7016_s4 }
  0x24   :  { %8905 = sst [smem:[#allocation12_spill]] %s7021_s6 }
  0x25   :  { %s7031_s27 = sld [smem:[%s8868_s0 + %s6883_s22]]   ;;  %s6887_s22 = smov 28  }
  0x26   :  { %s7036_s4 = sld [smem:[%s8868_s0 + %s6884_s28]]   ;;  %s6888_s28 = smov 29  }
  0x27   :  { %s7041_s6 = sld [smem:[%s8868_s0 + %s6885_s7]]   ;;  %s6889_s7 = smov 30  }
  0x28   :  { %8906 = sst [smem:[#allocation13_spill]] %s7026_s20 }
  0x29   :  { %s7046_s20 = sld [smem:[%s8868_s0 + %s6886_s15]]   ;;  %s6890_s15 = smov 31  }
  0x2b   :  { %8907 = sst [smem:[#allocation14_spill]] %s7031_s27 }
  0x2c   :  { %8908 = sst [smem:[#allocation15_spill]] %s7036_s4 }
  0x2d   :  { %8909 = sst [smem:[#allocation16_spill]] %s7041_s6 }
  0x2e   :  { %s7051_s27 = sld [smem:[%s8868_s0 + %s6887_s22]]   ;;  %s7068_s22 = smov 0  }
  0x2f   :  { %8910 = sst [smem:[#allocation17_spill]] %s7046_s20 }
  0x30   :  { %s7056_s4 = sld [smem:[%s8868_s0 + %s6888_s28]]  }
  0x31   :  { %s7061_s6 = sld [smem:[%s8868_s0 + %s6889_s7]]  }
  0x32   :  { %s7066_s20 = sld [smem:[%s8868_s0 + %s6890_s15]]  }
  0x33 LB: > { %s8911_s3 = sld [smem:[#allocation3_spill]]  ;;  %s5689_s23 = sadd.s32 4294967295, %s6858_s22   ;;  %s6858_s22 = sphi %s7068_s22, %s73_s22  }
  0x34   : > { %p5693_p0 = scmp.ge.s32.totalorder %s6858_s22, 1  ;;  %p869_p1 = scmp.lt.s32.totalorder %s6858_s22, 3 }
  0x36   : > { %p870_p2 = pnand %p5693_p0, %p869_p1 }
  0x37   : > { %p949_p3 = scmp.lt.s32.totalorder (!%p870_p2), %s5689_s23, 1  ;;  %s8876_s28 = smov (!%p870_p2), 17  }
  0x38   : > { %873 = sbr.rel (%p870_p2) target bundleno = 7337 (0x1ca9), region = 144  ;;  %s8883_s1 = smov (!%p870_p2), 111  }
  0x39   : > { %s8874_s2 = smov (!%p870_p2), 95   ;;  %s8885_s7 = smov (!%p870_p2), 94  }
  0x3a   : > { %s8891_s10 = smov (!%p870_p2), 96   ;;  %s8889_s11 = smov (!%p870_p2), 110  }
  0x3b   : > { %s8887_s15 = smov (!%p870_p2), 112   ;;  %s8881_s16 = smov (!%p870_p2), 126  }
  0x3c   : > { %s8879_s18 = smov (!%p870_p2), 127  }
  0x3d   : > { %v960_v0 = vlaneseq  ;;  %s8946_s23 = smov (!%p949_p3, %s5689_s23), 1  ;;  %v6891_v8 = vmov 0.0   ;;  %vm1009_vm4 = vcmask 138240   ;;  %v6900_v41 = vmov 0   ;;  %v1181_v42 = vld [vmem:[%s6921_s13] sm:$0xff] }
  0x3e   : > { %s8873_s0 = sshll.u32 %s8946_s23, 4  ;;  %1230 = vmatprep.mubr.bf16.mxu0 %v6900_v41  ;;  %6046 = vset.pattern.permute.xlu1 %v6900_v41  ;;  %vm1129_vm5 = vcmask 769024   ;;  %vm1118_vm6 = vcmask 777216   ;;  %vm1096_vm7 = vcmask 900096   ;;  %vm1107_vm8 = vcmask 785408   ;;  %vm7178_vm14 = vmneg %vm1009_vm4 }
  0x3f   : > { %v961_v1 = vand.u32 127, %v960_v0  ;;  %s7082_s26 = scalar_lea.vmem %s6911_s5, %s8873_s0  ;;  %6817 = vset.pattern.permute.xlu0 %v6900_v41  ;;  %vm1191_vm9 = vcmask 1043456   ;;  %vm1085_vm10 = vcmask 908288   ;;  %vm1074_vm11 = vcmask 916480   ;;  %s8918_s0 = sld [smem:[#allocation4_spill]] }
  0x40   : > { %v999_v4 = vld [vmem:[%s7082_s26] sm:$0xff]  ;;  %v1000_v5 = vld [vmem:[%s7082_s26 + $0x8] sm:$0xff]  ;;  %vm1061_vm12 = vcmask 1031168   ;;  %vm1048_vm13 = vcmask 1039360   ;;  %vm6902_vm15 = vmmov 1  }
  0x41   : > { %v962_v2 = vadd.s32 128, %v961_v1  ;;  %v967_v3 = vand.u32 15, %v961_v1  ;;  %v6001_v7 = vpack.i.bf16 %v1000_v5, %v999_v4 }
  0x43   : > { %v974_v6 = vand.u32 15, %v962_v2  ;;  %vm993_vm0 = vcmp.ge.s32.totalorder %v967_v3, 1  ;;  %vm987_vm1 = vcmp.le.s32.totalorder %v967_v3, 14  ;;  %6002 = vrot.lane.b32.xlu1 %v6001_v7, %s8876_s28 }
  0x44   : > { %v7086_v9 = vsel %vm993_vm0, 1.0, %v6891_v8  ;;  %v7088_v10 = vsel %vm987_vm1, 1.0, %v6891_v8  ;;  %vm7195_vm0 = vmpackc.low %vm6902_vm15, %vm7178_vm14  ;;  %vm1187_vm1 = vcmask 588800  }
  0x45   : > { %vm994_vm2 = vcmp.ge.s32.totalorder %v974_v6, 1  ;;  %v1027_v11 = vmul.f32 %v7086_v9, %v999_v4  ;;  %vm988_vm3 = vcmp.le.s32.totalorder %v974_v6, 14  ;;  %v1001_v15 = vmul.f32 %v7088_v10, %v999_v4 }
  0x46   : > { %v7092_v12 = vsel %vm994_vm2, 1.0, %v6891_v8  ;;  %v7094_v13 = vsel %vm988_vm3, 1.0, %v6891_v8  ;;  %vm1452_vm2 = vcmask 130048   ;;  %vm7296_vm3 = vmpackc.low %vm7178_vm14, %vm6902_vm15  ;;  %vm8878_vm14 = vcmask 719872  }
  0x47   : > { %v1028_v14 = vmul.f32 %v7092_v12, %v1000_v5  ;;  %v1002_v16 = vmul.f32 %v7094_v13, %v1000_v5  ;;  %vm8872_vm15 = vcmask 261120  }
  0x49   : > { %v5991_v17 = vpack.i.bf16 %v1028_v14, %v1027_v11  ;;  %v5996_v18 = vpack.i.bf16 %v1002_v16, %v1001_v15 }
  0x4b   : > { %5992 = vrot.lane.b32.xlu0 %v5991_v17, %s8876_s28 }
  0x4f   : > { %5997 = vrot.lane.b32.xlu0 %v5996_v18, %s8876_s28 }
  0xb5   : > { %v6003_v19 = vpop.permute.xlu1 %6002 }
  0xb6   : > { %v6005_v20 = vunpack.i.h.bf16 %v6003_v19  ;;  %v6004_v21 = vunpack.i.l.bf16 %v6003_v19 }
  0xb8   : > { %v1026_v22 = vsel %vm1009_vm4, %v6005_v20, 0.0  ;;  %v1022_v23 = vsel %vm1009_vm4, %v6004_v21, %v6005_v20  ;;  %v1025_v28 = vsel %vm1009_vm4, 0.0, %v6004_v21 }
  0xb9   : > { %v6011_v24 = vpack.i.bf16 %v1026_v22, %v1022_v23 }
  0xbb   : > { %6012 = vrot.lane.b32.xlu1 %v6011_v24, %s8883_s1  ;;  %6007 = vrot.lane.b32.xlu0 %v6011_v24, %s8874_s2 }
  0xbd   : > { %v5993_v25 = vpop.permute.xlu0 %5992 }
  0xbe   : > { %v5995_v26 = vunpack.i.h.bf16 %v5993_v25  ;;  %v5994_v27 = vunpack.i.l.bf16 %v5993_v25 }
  0xbf   : > { %1079 = vrot.lane.b32.xlu1 %v1025_v28, %s8883_s1  ;;  %1112 = vrot.lane.b32.xlu0 %v1025_v28, %s8874_s2 }
  0xc0   : > { %v1039_v33 = vsel %vm1009_vm4, %v5995_v26, 0.0  ;;  %v1038_v34 = vsel %vm1009_vm4, 0.0, %v5994_v27  ;;  %v1035_v35 = vsel %vm1009_vm4, %v5994_v27, %v5995_v26 }
  0xc1   : > { %v5998_v29 = vpop.permute.xlu0 %5997  ;;  %v6016_v36 = vpack.i.bf16 %v1035_v35, %v1038_v34  ;;  %v6026_v39 = vpack.i.bf16 %v1039_v33, %v1035_v35 }
  0xc2   : > { %v7108_v30 = vunpack.i.l.bf16 %v5998_v29  ;;  %v6000_v32 = vunpack.i.h.bf16 %v5998_v29 }
  0xc3   : > { %1127 = vrot.lane.b32.xlu0 %v1039_v33, %s8885_s7 }
  0xc4   : > { %v1014_v31 = vsel %vm1009_vm4, 0.0, %v7108_v30  ;;  %v7119_v37 = vsel %vm1009_vm4, %v7108_v30, %v6000_v32  ;;  %v1015_v38 = vsel %vm1009_vm4, %v6000_v32, 0.0 }
  0xc5   : > { %1101 = vrot.lane.b32.xlu1 %v1014_v31, %s8891_s10  ;;  %v6021_v40 = vpack.i.bf16 %v1015_v38, %v7119_v37 }
  0xc7   : > { %1090 = vrot.lane.b32.xlu0 %v1038_v34, %s8889_s11 }
  0xc9   : > { %6017 = vrot.lane.b32.xlu1 %v6016_v36, %s8885_s7 }
  0xcb   : > { %6027 = vrot.lane.b32.xlu0 %v6026_v39, %s8889_s11 }
  0xcd   : > { %6022 = vrot.lane.b32.xlu1 %v6021_v40, %s8891_s10 }
  0xcf   : > { %6037 = vrot.lane.b32.xlu0 %v6021_v40, %s8887_s15 }
  0xd1   : > { %1055 = vrot.lane.b32.xlu1 %v1038_v34, %s8881_s16 }
  0xd3   : > { %1068 = vrot.lane.b32.xlu0 %v1014_v31, %s8887_s15 }
  0xd5   : > { %6032 = vrot.lane.b32.xlu1 %v6026_v39, %s8881_s16 }
  0xd7   : > { %1042 = vrot.lane.b32.xlu0 %v1025_v28, %s8879_s18 }
  0xd9   : > { %6042 = vrot.lane.b32.xlu1 %v6011_v24, %s8879_s18 }
  0xdd   : > { %1184 = vperm.xlu1 %6046, %v1181_v42  }
 0x12d   : > { %v6013_v43 = vpop.permute.xlu1 %6012  ;;  %v6008_v44 = vpop.permute.xlu0 %6007 }
 0x12e   : > { %v6010_v53 = vunpack.i.h.bf16 %v6008_v44  ;;  %v6009_v54 = vunpack.i.l.bf16 %v6008_v44  ;;  %v6015_v57 = vunpack.i.h.bf16 %v6013_v43  ;;  %v6014_v58 = vunpack.i.l.bf16 %v6013_v43 }
 0x130   : > { %v1120_v3 = vsel %vm1118_vm6, %v6009_v54, %v6010_v53  ;;  %v1087_v17 = vsel %vm1085_vm10, %v6014_v58, %v6015_v57 }
 0x131   : > { %v1080_v45 = vpop.permute.xlu1 %1079  ;;  %v1113_v46 = vpop.permute.xlu0 %1112 }
 0x132   : > { %v1119_v5 = vsel %vm1118_vm6, %v1113_v46, %v6009_v54  ;;  %v1086_v22 = vsel %vm1085_vm10, %v1080_v45, %v6014_v58 }
 0x135   : > { %v1128_v47 = vpop.permute.xlu0 %1127 }
 0x137   : > { %v1102_v48 = vpop.permute.xlu1 %1101 }
 0x139   : > { %v1091_v49 = vpop.permute.xlu0 %1090 }
 0x13b   : > { %v6018_v50 = vpop.permute.xlu1 %6017 }
 0x13c   : > { %v6020_v51 = vunpack.i.h.bf16 %v6018_v50  ;;  %v6019_v52 = vunpack.i.l.bf16 %v6018_v50 }
 0x13d   : > { %v6028_v59 = vpop.permute.xlu0 %6027 }
 0x13e   : > { %v7138_v55 = vsel %vm1129_vm5, %v6020_v51, %v1128_v47  ;;  %v7141_v56 = vsel %vm1129_vm5, %v6019_v52, %v6020_v51  ;;  %v6030_v63 = vunpack.i.h.bf16 %v6028_v59  ;;  %v6029_v0 = vunpack.i.l.bf16 %v6028_v59  ;;  %v1180_v47 = vld [vmem:[%s6916_s9] sm:$0xf] }
 0x13f   : > { %v6023_v60 = vpop.permute.xlu1 %6022  ;;  %v1179_v61 = vpack.c.bf16 %v7138_v55, %v7138_v55  ;;  %v1178_v62 = vpack.c.bf16 %v7141_v56, %v7141_v56 }
 0x140   : > { %v6025_v1 = vunpack.i.h.bf16 %v6023_v60  ;;  %v6024_v2 = vunpack.i.l.bf16 %v6023_v60  ;;  %v1098_v6 = vsel %vm1096_vm7, %v6029_v0, %v6030_v63  ;;  %v1097_v18 = vsel %vm1096_vm7, %v1091_v49, %v6029_v0 }
 0x141   : > { %5702 = vmatprep.subr.msk.bf16.mxu0 %vm1191_vm9, %v1179_v61  ;;  %v1193_v4 = vsel %vm1191_vm9, %v1178_v62, 0  ;;  %v6038_v15 = vpop.permute.xlu0 %6037  ;;  %v7160_v19 = vpack.c.bf16 %v1098_v6, %v1087_v17  ;;  %v7166_v25 = vpack.c.bf16 %v1097_v18, %v1086_v22 }
 0x142   : > { %v1108_v7 = vsel %vm1107_vm8, %v1102_v48, %v6024_v2  ;;  %v1109_v8 = vsel %vm1107_vm8, %v6024_v2, %v6025_v1  ;;  %1205 = vmatpush1.bf16.msra.mxu0 %v1193_v4  ;;  %v6040_v20 = vunpack.i.h.bf16 %v6038_v15  ;;  %v6039_v21 = vunpack.i.l.bf16 %v6038_v15 }
 0x143   : > { %v7154_v11 = vpack.c.bf16 %v1119_v5, %v1108_v7  ;;  %v7156_v14 = vpack.c.bf16 %v1120_v3, %v1109_v8  ;;  %v1056_v16 = vpop.permute.xlu1 %1055 }
 0x144   : > { %v1076_v28 = vsel %vm1074_vm11, %v6039_v21, %v6040_v20 }
 0x145   : > { %1206 = vmatprep.subr.bf16.mxu0 %v7156_v14  ;;  %v1069_v23 = vpop.permute.xlu0 %1068 }
 0x146   : > { %1207 = vmatpush1.bf16.msra.mxu0 %v7154_v11  ;;  %v1075_v29 = vsel %vm1074_vm11, %v1069_v23, %v6039_v21 }
 0x147   : > { %v6033_v24 = vpop.permute.xlu1 %6032  ;;  %1208 = vmatprep.subr.bf16.mxu0 %v7160_v19 }
 0x148   : > { %v6035_v26 = vunpack.i.h.bf16 %v6033_v24  ;;  %v6034_v27 = vunpack.i.l.bf16 %v6033_v24 }
 0x149   : > { %v1043_v40 = vpop.permute.xlu0 %1042 }
 0x14a   : > { %v1062_v31 = vsel %vm1061_vm12, %v1056_v16, %v6034_v27  ;;  %v1063_v32 = vsel %vm1061_vm12, %v6034_v27, %v6035_v26  ;;  %1209 = vmatpush1.bf16.msra.mxu0 %v7166_v25 }
 0x14b   : > { %v7173_v33 = vpack.c.bf16 %v1075_v29, %v1062_v31  ;;  %v7175_v34 = vpack.c.bf16 %v1076_v28, %v1063_v32  ;;  %v6043_v35 = vpop.permute.xlu1 %6042  ;;  %v1440_v32 = vld [vmem:[%s6931_s21] sm:$0xff] }
 0x14c   : > { %v6045_v36 = vunpack.i.h.bf16 %v6043_v35  ;;  %v6044_v38 = vunpack.i.l.bf16 %v6043_v35  ;;  %v7246_v35 = vld [vmem:[%s6926_s17] sm:$0xff] }
 0x14d   : > { %1210 = vmatprep.subr.bf16.mxu0 %v7175_v34 }
 0x14e   : > { %v1049_v42 = vsel %vm1048_vm13, %v1043_v40, %v6044_v38  ;;  %v1050_v43 = vsel %vm1048_vm13, %v6044_v38, %v6045_v36  ;;  %1211 = vmatpush1.bf16.msra.mxu0 %v7173_v33  ;;  %v5705_v36 = vcombine.high %v7246_v35, %v7246_v35 }
 0x14f   : > { %v7187_v44 = vpack.c.bf16 %v1050_v43, %v7119_v37  ;;  %v7190_v45 = vpack.c.bf16 %v1049_v42, %v7108_v30 }
 0x150   : > { %5706 = vmatprep.mubr.msk.bf16.mxu1 %vm1452_vm2, %v5705_v36 }
 0x151   : > { %1212 = vmatprep.subr.bf16.mxu0 %v7187_v44 }
 0x152   : > { %5763 = vmatpush1.bf16.msk.msra.mxu0 %vm7195_vm0, %v7190_v45 }
 0x155   : > { %5703 = vmatmul.mubr.msk.bf16.vlgmr.msra.gmra.mxu0 %vm1187_vm1, %v1180_v47 }
 0x158   : > { %v1185_v30 = vpop.permute.xlu1 %1184 }
 0x215   : > { %v1232_v37 = vpop.f32.mrf.mxu0 }
 0x216   : > { %v1233_v48 = vadd.f32 %v1232_v37, %v1185_v30 }
 0x217   : > { %v1234_v49 = vpop.f32.mrf.mxu0 }
 0x218   : > { %v1239_v50 = vmul.f32 0.2, %v1233_v48  ;;  %v1235_v51 = vadd.f32 %v1234_v49, %v1185_v30 }
 0x219   : > { %v1236_v52 = vpop.f32.mrf.mxu0 }
 0x21a   : > { %v1241_v53 = vmax.f32 %v1233_v48, %v1239_v50  ;;  %v1240_v54 = vmul.f32 0.2, %v1235_v51 }
 0x21b   : > { %v1237_v57 = vpop.f32.mrf.mxu0 }
 0x21c   : > { %v1242_v58 = vmax.f32 %v1235_v51, %v1240_v54  ;;  %v1268_v59 = vmul.f32 %v7086_v9, %v1241_v53  ;;  %v1243_v61 = vmul.f32 %v7088_v10, %v1241_v53 }
 0x21e   : > { %v1269_v60 = vmul.f32 %v7092_v12, %v1242_v58  ;;  %v1244_v62 = vmul.f32 %v7094_v13, %v1242_v58  ;;  %v6057_v1 = vpack.i.bf16 %v1242_v58, %v1241_v53 }
 0x220   : > { %v6052_v63 = vpack.i.bf16 %v1269_v60, %v1268_v59  ;;  %v6047_v0 = vpack.i.bf16 %v1244_v62, %v1243_v61 }
 0x222   : > { %6053 = vrot.lane.b32.xlu1 %v6052_v63, %s8876_s28  ;;  %6048 = vrot.lane.b32.xlu0 %v6047_v0, %s8876_s28 }
 0x226   : > { %6058 = vrot.lane.b32.xlu0 %v6057_v1, %s8876_s28 }
 0x294   : > { %v6054_v2 = vpop.permute.xlu1 %6053  ;;  %v6049_v3 = vpop.permute.xlu0 %6048 }
 0x295   : > { %v6055_v4 = vunpack.i.l.bf16 %v6054_v2  ;;  %v7212_v5 = vunpack.i.l.bf16 %v6049_v3  ;;  %v6056_v6 = vunpack.i.h.bf16 %v6054_v2  ;;  %v6051_v16 = vunpack.i.h.bf16 %v6049_v3 }
 0x297   : > { %v1279_v7 = vsel %vm1009_vm4, 0.0, %v6055_v4  ;;  %v1255_v8 = vsel %vm1009_vm4, 0.0, %v7212_v5  ;;  %v1280_v20 = vsel %vm1009_vm4, %v6056_v6, 0.0  ;;  %v1276_v23 = vsel %vm1009_vm4, %v6055_v4, %v6056_v6 }
 0x298   : > { %1327 = vrot.lane.b32.xlu1 %v1279_v7, %s8889_s11  ;;  %v6059_v15 = vpop.permute.xlu0 %6058  ;;  %1337 = vrot.lane.b32.xlu0 %v1255_v8, %s8891_s10  ;;  %v7226_v26 = vsel %vm1009_vm4, %v7212_v5, %v6051_v16  ;;  %v1256_v27 = vsel %vm1009_vm4, %v6051_v16, 0.0  ;;  %v6067_v28 = vpack.i.bf16 %v1280_v20, %v1276_v23 }
 0x299   : > { %v6061_v17 = vunpack.i.h.bf16 %v6059_v15  ;;  %v6060_v18 = vunpack.i.l.bf16 %v6059_v15  ;;  %v6072_v29 = vpack.i.bf16 %v1256_v27, %v7226_v26 }
 0x29b   : > { %v1267_v21 = vsel %vm1009_vm4, %v6061_v17, 0.0  ;;  %v1263_v22 = vsel %vm1009_vm4, %v6060_v18, %v6061_v17  ;;  %v1266_v31 = vsel %vm1009_vm4, 0.0, %v6060_v18 }
 0x29c   : > { %1307 = vrot.lane.b32.xlu1 %v1255_v8, %s8887_s15  ;;  %v6062_v24 = vpack.i.bf16 %v1267_v21, %v1263_v22 }
 0x29e   : > { %6063 = vrot.lane.b32.xlu0 %v6062_v24, %s8883_s1 }
 0x2a0   : > { %6068 = vrot.lane.b32.xlu1 %v6067_v28, %s8889_s11 }
 0x2a2   : > { %6073 = vrot.lane.b32.xlu0 %v6072_v29, %s8891_s10 }
 0x2a4   : > { %6078 = vrot.lane.b32.xlu1 %v6072_v29, %s8887_s15 }
 0x2a6   : > { %1317 = vrot.lane.b32.xlu0 %v1266_v31, %s8883_s1 }
 0x2a8   : > { %6083 = vrot.lane.b32.xlu1 %v6062_v24, %s8879_s18 }
 0x2aa   : > { %6088 = vrot.lane.b32.xlu0 %v6067_v28, %s8881_s16 }
 0x2ac   : > { %1283 = vrot.lane.b32.xlu1 %v1266_v31, %s8879_s18 }
 0x2ae   : > { %1295 = vrot.lane.b32.xlu0 %v1279_v7, %s8881_s16 }
 0x2b0   : > { %6093 = vrot.lane.b32.xlu1 %v6062_v24, %s8874_s2 }
 0x2b2   : > { %6098 = vrot.lane.b32.xlu0 %v6067_v28, %s8885_s7 }
 0x2b4   : > { %1347 = vrot.lane.b32.xlu1 %v1266_v31, %s8874_s2 }
 0x2b6   : > { %1357 = vrot.lane.b32.xlu0 %v1279_v7, %s8885_s7 }
 0x2b8   : > { %1443 = vperm.xlu1 %6046, %v1440_v32   ;;  %v7287_v32 = vpack.c.bf16 %v7226_v26, %v7138_v55 }
 0x30a   : > { %v1328_v38 = vpop.permute.xlu1 %1327  ;;  %v1338_v40 = vpop.permute.xlu0 %1337 }
 0x30e   : > { %v1308_v42 = vpop.permute.xlu1 %1307 }
 0x310   : > { %v6064_v43 = vpop.permute.xlu0 %6063 }
 0x311   : > { %v6066_v49 = vunpack.i.h.bf16 %v6064_v43  ;;  %v6065_v50 = vunpack.i.l.bf16 %v6064_v43 }
 0x312   : > { %v6069_v47 = vpop.permute.xlu1 %6068 }
 0x313   : > { %v6071_v30 = vunpack.i.h.bf16 %v6069_v47  ;;  %v6070_v37 = vunpack.i.l.bf16 %v6069_v47  ;;  %v1324_v1 = vsel %vm1085_vm10, %v6065_v50, %v6066_v49 }
 0x314   : > { %v6074_v48 = vpop.permute.xlu0 %6073 }
 0x315   : > { %v6076_v51 = vunpack.i.h.bf16 %v6074_v48  ;;  %v6075_v52 = vunpack.i.l.bf16 %v6074_v48  ;;  %v1333_v53 = vsel %vm1096_vm7, %v1328_v38, %v6070_v37  ;;  %v1334_v54 = vsel %vm1096_vm7, %v6070_v37, %v6071_v30 }
 0x316   : > { %v6079_v57 = vpop.permute.xlu1 %6078  ;;  %v7302_v38 = vpack.c.bf16 %v7212_v5, %v7141_v56 }
 0x317   : > { %v1343_v58 = vsel %vm1107_vm8, %v1338_v40, %v6075_v52  ;;  %v1344_v59 = vsel %vm1107_vm8, %v6075_v52, %v6076_v51  ;;  %v6081_v60 = vunpack.i.h.bf16 %v6079_v57  ;;  %v6080_v61 = vunpack.i.l.bf16 %v6079_v57 }
 0x318   : > { %v1318_v62 = vpop.permute.xlu0 %1317  ;;  %v7255_v63 = vpack.c.bf16 %v1344_v59, %v1334_v54  ;;  %v7257_v0 = vpack.c.bf16 %v1343_v58, %v1333_v53  ;;  %v5704_v51 = vcombine.low %v7246_v35, %v7246_v35 }
 0x319   : > { %v1314_v2 = vsel %vm1074_vm11, %v6080_v61, %v6081_v60  ;;  %v1313_v3 = vsel %vm1074_vm11, %v1308_v42, %v6080_v61  ;;  %v1323_v4 = vsel %vm1085_vm10, %v1318_v62, %v6065_v50 }
 0x31a   : > { %v6084_v6 = vpop.permute.xlu1 %6083  ;;  %1456 = vmatprep.subr.bf16.mxu1 %v7255_v63  ;;  %1748 = vmatprep.subr.bf16.mxu0 %v7255_v63  ;;  %v7265_v7 = vpack.c.bf16 %v1324_v1, %v1314_v2  ;;  %v7271_v17 = vpack.c.bf16 %v1323_v4, %v1313_v3 }
 0x31b   : > { %v6086_v8 = vunpack.i.h.bf16 %v6084_v6  ;;  %v6085_v15 = vunpack.i.l.bf16 %v6084_v6  ;;  %1457 = vmatpush1.bf16.msra.mxu1 %v7257_v0  ;;  %1749 = vmatpush1.bf16.msra.mxu0 %v7257_v0 }
 0x31c   : > { %v6089_v16 = vpop.permute.xlu0 %6088  ;;  %1458 = vmatprep.subr.bf16.mxu1 %v7265_v7  ;;  %1750 = vmatprep.subr.bf16.mxu0 %v7265_v7 }
 0x31d   : > { %v6091_v18 = vunpack.i.h.bf16 %v6089_v16  ;;  %v6090_v20 = vunpack.i.l.bf16 %v6089_v16  ;;  %v1290_v22 = vsel %vm1048_vm13, %v6085_v15, %v6086_v8 }
 0x31e   : > { %v1284_v21 = vpop.permute.xlu1 %1283 }
 0x31f   : > { %v1302_v23 = vsel %vm1061_vm12, %v6090_v20, %v6091_v18  ;;  %1459 = vmatpush1.bf16.msra.mxu1 %v7271_v17  ;;  %1751 = vmatpush1.bf16.msra.mxu0 %v7271_v17  ;;  %v1289_v28 = vsel %vm1048_vm13, %v1284_v21, %v6085_v15 }
 0x320   : > { %v1296_v24 = vpop.permute.xlu0 %1295  ;;  %v7277_v27 = vpack.c.bf16 %v1302_v23, %v1290_v22 }
 0x321   : > { %v1301_v29 = vsel %vm1061_vm12, %v1296_v24, %v6090_v20 }
 0x322   : > { %v7281_v31 = vpack.c.bf16 %v1301_v29, %v1289_v28  ;;  %1460 = vmatprep.subr.bf16.mxu1 %v7277_v27  ;;  %1752 = vmatprep.subr.bf16.mxu0 %v7277_v27  ;;  %v6094_v56 = vpop.permute.xlu1 %6093 }
 0x323   : > { %v6096_v26 = vunpack.i.h.bf16 %v6094_v56  ;;  %v6095_v40 = vunpack.i.l.bf16 %v6094_v56 }
 0x324   : > { %1461 = vmatpush1.bf16.msra.mxu1 %v7281_v31  ;;  %1753 = vmatpush1.bf16.msra.mxu0 %v7281_v31  ;;  %v6099_v55 = vpop.permute.xlu0 %6098 }
 0x325   : > { %1462 = vmatprep.subr.bf16.mxu1 %v7287_v32  ;;  %1754 = vmatprep.subr.bf16.mxu0 %v7287_v32  ;;  %v6101_v39 = vunpack.i.h.bf16 %v6099_v55  ;;  %v6100_v5 = vunpack.i.l.bf16 %v6099_v55  ;;  %v1354_v47 = vsel %vm1118_vm6, %v6095_v40, %v6096_v26 }
 0x326   : > { %v1348_v30 = vpop.permute.xlu1 %1347 }
 0x327   : > { %v1364_v42 = vsel %vm1129_vm5, %v6100_v5, %v6101_v39  ;;  %v1353_v49 = vsel %vm1118_vm6, %v1348_v30, %v6095_v40 }
 0x328   : > { %5767 = vmatpush1.bf16.msk.msra.mxu1 %vm7296_vm3, %v7302_v38  ;;  %5775 = vmatpush1.bf16.msk.msra.mxu0 %vm7296_vm3, %v7302_v38  ;;  %v1358_v43 = vpop.permute.xlu0 %1357  ;;  %v7327_v48 = vpack.c.bf16 %v1364_v42, %v1354_v47 }
 0x329   : > { %1464 = vmatprep.subr.bf16.mxu1 %v7156_v14  ;;  %1756 = vmatprep.subr.bf16.mxu0 %v7156_v14  ;;  %v1363_v37 = vsel %vm1129_vm5, %v1358_v43, %v6100_v5 }
 0x32a   : > { %v7337_v50 = vpack.c.bf16 %v1363_v37, %v1353_v49 }
 0x32c   : > { %1465 = vmatpush1.bf16.msra.mxu1 %v7154_v11  ;;  %1757 = vmatpush1.bf16.msra.mxu0 %v7154_v11 }
 0x32d   : > { %1466 = vmatprep.subr.bf16.mxu1 %v7160_v19  ;;  %1758 = vmatprep.subr.bf16.mxu0 %v7160_v19 }
 0x330   : > { %1467 = vmatpush1.bf16.msra.mxu1 %v7166_v25  ;;  %1759 = vmatpush1.bf16.msra.mxu0 %v7166_v25 }
 0x331   : > { %1468 = vmatprep.subr.bf16.mxu1 %v7175_v34  ;;  %1760 = vmatprep.subr.bf16.mxu0 %v7175_v34 }
 0x333   : > { %v1444_v35 = vpop.permute.xlu1 %1443 }
 0x334   : > { %1469 = vmatpush1.bf16.msra.mxu1 %v7173_v33  ;;  %1761 = vmatpush1.bf16.msra.mxu0 %v7173_v33 }
 0x335   : > { %1470 = vmatprep.subr.bf16.mxu1 %v7187_v44  ;;  %1762 = vmatprep.subr.bf16.mxu0 %v7187_v44 }
 0x338   : > { %5771 = vmatpush1.bf16.msk.msra.mxu1 %vm7195_vm0, %v7190_v45  ;;  %5779 = vmatpush1.bf16.msk.msra.mxu0 %vm7195_vm0, %v7190_v45 }
 0x339   : > { %1486 = vmatprep.subr.bf16.mxu1 %v7327_v48 }
 0x33c   : > { %1487 = vmatpush2.bf16.msra.mxu1 %v7337_v50 }
 0x33d   : > { %2065 = vmatprep.subr.bf16.mxu1 %v7255_v63 }
 0x33f   : > { %1489 = vmatmul.mubr.bf16.vlgmr.msra.gmra.mxu1 %v5704_v51 }
 0x340   : > { %2066 = vmatpush1.bf16.msra.mxu1 %v7257_v0 }
 0x341   : > { %2067 = vmatprep.subr.bf16.mxu1 %v7265_v7 }
 0x344   : > { %2068 = vmatpush1.bf16.msra.mxu1 %v7271_v17 }
 0x345   : > { %2069 = vmatprep.subr.bf16.mxu1 %v7277_v27 }
 0x348   : > { %2070 = vmatpush1.bf16.msra.mxu1 %v7281_v31 }
 0x349   : > { %2071 = vmatprep.subr.bf16.mxu1 %v7287_v32 }
 0x34c   : > { %5787 = vmatpush1.bf16.msk.msra.mxu1 %vm7296_vm3, %v7302_v38 }
 0x34d   : > { %2073 = vmatprep.subr.bf16.mxu1 %v7156_v14 }
 0x350   : > { %2074 = vmatpush1.bf16.msra.mxu1 %v7154_v11 }
 0x351   : > { %2075 = vmatprep.subr.bf16.mxu1 %v7160_v19 }
 0x354   : > { %2076 = vmatpush1.bf16.msra.mxu1 %v7166_v25 }
 0x355   : > { %2077 = vmatprep.subr.bf16.mxu1 %v7175_v34 }
 0x358   : > { %2078 = vmatpush1.bf16.msra.mxu1 %v7173_v33 }
 0x359   : > { %2079 = vmatprep.subr.bf16.mxu1 %v7187_v44 }
 0x35c   : > { %5791 = vmatpush1.bf16.msk.msra.mxu1 %vm7195_vm0, %v7190_v45 }
 0x3ff   : > { %v1490_v52 = vpop.f32.mrf.mxu1 }
 0x400   : > { %v1491_v53 = vadd.f32 %v1490_v52, %v1444_v35  ;;  %v7400_v52 = vld [vmem:[%s6936_s25] sm:$0xff] }
 0x401   : > { %v1492_v54 = vpop.f32.mrf.mxu1 }
 0x402   : > { %v1497_v57 = vmul.f32 0.2, %v1491_v53  ;;  %v1493_v58 = vadd.f32 %v1492_v54, %v1444_v35  ;;  %v1726_v54 = vld [vmem:[%s6941_s29] sm:$0xff] }
 0x403   : > { %v1494_v59 = vpop.f32.mrf.mxu1 }
 0x404   : > { %v1499_v60 = vmax.f32 %v1491_v53, %v1497_v57  ;;  %v1498_v61 = vmul.f32 0.2, %v1493_v58  ;;  %v5708_v53 = vcombine.high %v7400_v52, %v7400_v52 }
 0x405   : > { %v1495_v62 = vpop.f32.mrf.mxu1 }
 0x406   : > { %v1500_v1 = vmax.f32 %v1493_v58, %v1498_v61  ;;  %v1526_v2 = vmul.f32 %v7086_v9, %v1499_v60  ;;  %v1501_v4 = vmul.f32 %v7088_v10, %v1499_v60  ;;  %5710 = vmatprep.mubr.msk.bf16.mxu0 %vm8878_vm14, %v5708_v53 }
 0x408   : > { %v1527_v3 = vmul.f32 %v7092_v12, %v1500_v1  ;;  %v1502_v6 = vmul.f32 %v7094_v13, %v1500_v1  ;;  %v6112_v16 = vpack.i.bf16 %v1500_v1, %v1499_v60 }
 0x40a   : > { %v6102_v8 = vpack.i.bf16 %v1527_v3, %v1526_v2  ;;  %v6107_v15 = vpack.i.bf16 %v1502_v6, %v1501_v4 }
 0x40c   : > { %6103 = vrot.lane.b32.xlu0 %v6102_v8, %s8876_s28  ;;  %6108 = vrot.lane.b32.xlu1 %v6107_v15, %s8876_s28 }
 0x410   : > { %6113 = vrot.lane.b32.xlu0 %v6112_v16, %s8876_s28 }
 0x47e   : > { %v6104_v18 = vpop.permute.xlu0 %6103  ;;  %v6109_v20 = vpop.permute.xlu1 %6108 }
 0x47f   : > { %v7369_v24 = vunpack.i.l.bf16 %v6109_v20  ;;  %v6106_v39 = vunpack.i.h.bf16 %v6104_v18  ;;  %v6105_v5 = vunpack.i.l.bf16 %v6104_v18  ;;  %v6111_v40 = vunpack.i.h.bf16 %v6109_v20 }
 0x481   : > { %v1513_v26 = vsel %vm1009_vm4, 0.0, %v7369_v24  ;;  %v1538_v42 = vsel %vm1009_vm4, %v6106_v39, 0.0  ;;  %v1537_v43 = vsel %vm1009_vm4, 0.0, %v6105_v5  ;;  %v1534_v47 = vsel %vm1009_vm4, %v6105_v5, %v6106_v39 }
 0x482   : > { %v6114_v21 = vpop.permute.xlu0 %6113  ;;  %v6127_v30 = vpack.i.bf16 %v1534_v47, %v1537_v43  ;;  %v7387_v37 = vsel %vm1009_vm4, %v7369_v24, %v6111_v40  ;;  %v1514_v49 = vsel %vm1009_vm4, %v6111_v40, 0.0  ;;  %v6137_v51 = vpack.i.bf16 %v1538_v42, %v1534_v47 }
 0x483   : > { %v6116_v22 = vunpack.i.h.bf16 %v6114_v21  ;;  %v6115_v23 = vunpack.i.l.bf16 %v6114_v21  ;;  %v6132_v35 = vpack.i.bf16 %v1514_v49, %v7387_v37 }
 0x485   : > { %v1525_v28 = vsel %vm1009_vm4, %v6116_v22, 0.0  ;;  %v1524_v29 = vsel %vm1009_vm4, 0.0, %v6115_v23  ;;  %v1521_v55 = vsel %vm1009_vm4, %v6115_v23, %v6116_v22 }
 0x486   : > { %1605 = vrot.lane.b32.xlu0 %v1524_v29, %s8874_s2  ;;  %1575 = vrot.lane.b32.xlu1 %v1524_v29, %s8883_s1  ;;  %v6117_v56 = vpack.i.bf16 %v1525_v28, %v1521_v55 }
 0x48a   : > { %6118 = vrot.lane.b32.xlu0 %v6117_v56, %s8874_s2  ;;  %1595 = vrot.lane.b32.xlu1 %v1513_v26, %s8891_s10 }
 0x48e   : > { %1619 = vrot.lane.b32.xlu0 %v1538_v42, %s8885_s7  ;;  %6123 = vrot.lane.b32.xlu1 %v6117_v56, %s8883_s1 }
 0x492   : > { %1585 = vrot.lane.b32.xlu0 %v1537_v43, %s8889_s11  ;;  %6128 = vrot.lane.b32.xlu1 %v6127_v30, %s8885_s7 }
 0x496   : > { %6138 = vrot.lane.b32.xlu0 %v6137_v51, %s8889_s11  ;;  %6133 = vrot.lane.b32.xlu1 %v6132_v35, %s8891_s10 }
 0x49a   : > { %6148 = vrot.lane.b32.xlu0 %v6132_v35, %s8887_s15  ;;  %1553 = vrot.lane.b32.xlu1 %v1537_v43, %s8881_s16 }
 0x49e   : > { %1565 = vrot.lane.b32.xlu0 %v1513_v26, %s8887_s15  ;;  %6143 = vrot.lane.b32.xlu1 %v6137_v51, %s8881_s16 }
 0x4a2   : > { %1541 = vrot.lane.b32.xlu0 %v1524_v29, %s8879_s18  ;;  %6153 = vrot.lane.b32.xlu1 %v6117_v56, %s8879_s18 }
 0x4a6   : > { %1729 = vperm.xlu1 %6046, %v1726_v54  }
 0x4f8   : > { %v1606_v57 = vpop.permute.xlu0 %1605  ;;  %v1576_v58 = vpop.permute.xlu1 %1575 }
 0x4fc   : > { %v6119_v59 = vpop.permute.xlu0 %6118  ;;  %v1596_v60 = vpop.permute.xlu1 %1595 }
 0x4fd   : > { %v6120_v6 = vunpack.i.l.bf16 %v6119_v59  ;;  %v6121_v8 = vunpack.i.h.bf16 %v6119_v59 }
 0x4ff   : > { %v1611_v5 = vsel %vm1118_vm6, %v1606_v57, %v6120_v6  ;;  %v1612_v43 = vsel %vm1118_vm6, %v6120_v6, %v6121_v8 }
 0x500   : > { %v1620_v61 = vpop.permute.xlu0 %1619  ;;  %v6124_v62 = vpop.permute.xlu1 %6123 }
 0x501   : > { %v6126_v18 = vunpack.i.h.bf16 %v6124_v62  ;;  %v6125_v20 = vunpack.i.l.bf16 %v6124_v62 }
 0x503   : > { %v1582_v53 = vsel %vm1085_vm10, %v6125_v20, %v6126_v18 }
 0x504   : > { %v1586_v1 = vpop.permute.xlu0 %1585  ;;  %v6129_v2 = vpop.permute.xlu1 %6128 }
 0x505   : > { %v6131_v3 = vunpack.i.h.bf16 %v6129_v2  ;;  %v6130_v4 = vunpack.i.l.bf16 %v6129_v2 }
 0x507   : > { %v7409_v15 = vsel %vm1129_vm5, %v6131_v3, %v1620_v61  ;;  %v7412_v16 = vsel %vm1129_vm5, %v6130_v4, %v6131_v3  ;;  %v1581_v61 = vsel %vm1085_vm10, %v1576_v58, %v6125_v20 }
 0x508   : > { %v6139_v21 = vpop.permute.xlu0 %6138  ;;  %v6134_v22 = vpop.permute.xlu1 %6133  ;;  %v1724_v23 = vpack.c.bf16 %v7409_v15, %v7409_v15  ;;  %v1723_v28 = vpack.c.bf16 %v7412_v16, %v7412_v16 }
 0x509   : > { %v6141_v29 = vunpack.i.h.bf16 %v6139_v21  ;;  %v6140_v55 = vunpack.i.l.bf16 %v6139_v21  ;;  %v6136_v56 = vunpack.i.h.bf16 %v6134_v22  ;;  %v6135_v39 = vunpack.i.l.bf16 %v6134_v22 }
 0x50a   : > { %5709 = vmatprep.subr.msk.bf16.mxu0 %vm1191_vm9, %v1724_v23  ;;  %v1743_v26 = vsel %vm1191_vm9, %v1723_v28, 0 }
 0x50b   : > { %v1601_v40 = vsel %vm1107_vm8, %v1596_v60, %v6135_v39  ;;  %1769 = vmatpush2.bf16.msra.mxu0 %v1743_v26  ;;  %v1602_v42 = vsel %vm1107_vm8, %v6135_v39, %v6136_v56  ;;  %v1592_v47 = vsel %vm1096_vm7, %v6140_v55, %v6141_v29  ;;  %v1591_v54 = vsel %vm1096_vm7, %v1586_v1, %v6140_v55 }
 0x50c   : > { %v6149_v30 = vpop.permute.xlu0 %6148  ;;  %v1554_v49 = vpop.permute.xlu1 %1553  ;;  %v7425_v51 = vpack.c.bf16 %v1612_v43, %v1602_v42  ;;  %v7427_v35 = vpack.c.bf16 %v1611_v5, %v1601_v40  ;;  %v7432_v57 = vpack.c.bf16 %v1592_v47, %v1582_v53  ;;  %v7437_v6 = vpack.c.bf16 %v1591_v54, %v1581_v61 }
 0x50d   : > { %v6151_v59 = vunpack.i.h.bf16 %v6149_v30  ;;  %v6150_v60 = vunpack.i.l.bf16 %v6149_v30  ;;  %v5707_v26 = vcombine.low %v7400_v52, %v7400_v52 }
 0x50e   : > { %1770 = vmatprep.subr.bf16.mxu0 %v7425_v51 }
 0x50f   : > { %1771 = vmatpush2.bf16.msra.mxu0 %v7427_v35  ;;  %v1572_v21 = vsel %vm1074_vm11, %v6150_v60, %v6151_v59 }
 0x510   : > { %v1566_v62 = vpop.permute.xlu0 %1565  ;;  %v6144_v2 = vpop.permute.xlu1 %6143  ;;  %1772 = vmatprep.subr.bf16.mxu0 %v7432_v57 }
 0x511   : > { %v6146_v3 = vunpack.i.h.bf16 %v6144_v2  ;;  %v6145_v4 = vunpack.i.l.bf16 %v6144_v2  ;;  %v1571_v1 = vsel %vm1074_vm11, %v1566_v62, %v6150_v60 }
 0x513   : > { %v1559_v8 = vsel %vm1061_vm12, %v1554_v49, %v6145_v4  ;;  %1773 = vmatpush2.bf16.msra.mxu0 %v7437_v6  ;;  %v1560_v18 = vsel %vm1061_vm12, %v6145_v4, %v6146_v3 }
 0x514   : > { %v6154_v22 = vpop.permute.xlu1 %6153  ;;  %v7444_v58 = vpack.c.bf16 %v1572_v21, %v1560_v18  ;;  %v7446_v20 = vpack.c.bf16 %v1571_v1, %v1559_v8  ;;  %v1542_v29 = vpop.permute.xlu0 %1541 }
 0x515   : > { %v6156_v23 = vunpack.i.h.bf16 %v6154_v22  ;;  %v6155_v28 = vunpack.i.l.bf16 %v6154_v22 }
 0x516   : > { %1774 = vmatprep.subr.bf16.mxu0 %v7444_v58 }
 0x517   : > { %v1547_v55 = vsel %vm1048_vm13, %v1542_v29, %v6155_v28  ;;  %1775 = vmatpush2.bf16.msra.mxu0 %v7446_v20  ;;  %v1548_v56 = vsel %vm1048_vm13, %v6155_v28, %v6156_v23  ;;  %v7525_v23 = vld [vmem:[%s8911_s3] sm:$0xff] }
 0x518   : > { %v7453_v39 = vpack.c.bf16 %v1547_v55, %v7369_v24  ;;  %v7456_v5 = vpack.c.bf16 %v1548_v56, %v7387_v37  ;;  %v5712_v28 = vcombine.high %v7525_v23, %v7525_v23  ;;  %v2045_v29 = vld [vmem:[%s6951_s8] sm:$0xff] }
 0x51a   : > { %1776 = vmatprep.subr.bf16.mxu0 %v7456_v5  ;;  %2097 = vmatprep.mubr.bf16.mxu1 %v5712_v28 }
 0x51b   : > { %5783 = vmatpush2.bf16.msk.msra.mxu0 %vm7195_vm0, %v7453_v39 }
 0x51c   : > { %1778 = vmatprep.subr.bf16.mxu0 %v7327_v48 }
 0x51f   : > { %1779 = vmatpush2.bf16.msra.mxu0 %v7337_v50 }
 0x520   : > { %2457 = vmatprep.subr.bf16.mxu0 %v7255_v63 }
 0x521   : > { %v1730_v63 = vpop.permute.xlu1 %1729 }
 0x522   : > { %1781 = vmatmul.mubr.bf16.vlgmr.msra.gmra.mxu0 %v5707_v26 }
 0x523   : > { %2458 = vmatpush1.bf16.msra.mxu0 %v7257_v0 }
 0x524   : > { %2459 = vmatprep.subr.bf16.mxu0 %v7265_v7 }
 0x527   : > { %2460 = vmatpush1.bf16.msra.mxu0 %v7271_v17 }
 0x528   : > { %2461 = vmatprep.subr.bf16.mxu0 %v7277_v27 }
 0x52b   : > { %2462 = vmatpush1.bf16.msra.mxu0 %v7281_v31 }
 0x52c   : > { %2463 = vmatprep.subr.bf16.mxu0 %v7287_v32 }
 0x52f   : > { %5803 = vmatpush1.bf16.msk.msra.mxu0 %vm7296_vm3, %v7302_v38 }
 0x530   : > { %2465 = vmatprep.subr.bf16.mxu0 %v7156_v14 }
 0x533   : > { %2466 = vmatpush1.bf16.msra.mxu0 %v7154_v11 }
 0x534   : > { %2467 = vmatprep.subr.bf16.mxu0 %v7160_v19 }
 0x537   : > { %2468 = vmatpush1.bf16.msra.mxu0 %v7166_v25 }
 0x538   : > { %2469 = vmatprep.subr.bf16.mxu0 %v7175_v34 }
 0x53b   : > { %2470 = vmatpush1.bf16.msra.mxu0 %v7173_v33 }
 0x53c   : > { %2471 = vmatprep.subr.bf16.mxu0 %v7187_v44 }
 0x53f   : > { %5807 = vmatpush1.bf16.msk.msra.mxu0 %vm7195_vm0, %v7190_v45 }
 0x5e2   : > { %v1782_v0 = vpop.f32.mrf.mxu0 }
 0x5e3   : > { %v1783_v7 = vadd.f32 %v1782_v0, %v1730_v63 }
 0x5e4   : > { %v1784_v14 = vpop.f32.mrf.mxu0 }
 0x5e5   : > { %v1789_v17 = vmul.f32 0.2, %v1783_v7  ;;  %v1785_v11 = vadd.f32 %v1784_v14, %v1730_v63 }
 0x5e6   : > { %v1786_v27 = vpop.f32.mrf.mxu0 }
 0x5e7   : > { %v1791_v19 = vmax.f32 %v1783_v7, %v1789_v17  ;;  %v1790_v31 = vmul.f32 0.2, %v1785_v11 }
 0x5e8   : > { %v1787_v25 = vpop.f32.mrf.mxu0 }
 0x5e9   : > { %v1792_v32 = vmax.f32 %v1785_v11, %v1790_v31  ;;  %v1793_v33 = vmul.f32 %v7088_v10, %v1791_v19  ;;  %v1818_v24 = vmul.f32 %v7086_v9, %v1791_v19 }
 0x5eb   : > { %v6157_v34 = vpack.i.bf16 %v1792_v32, %v1791_v19  ;;  %v1794_v44 = vmul.f32 %v7094_v13, %v1792_v32  ;;  %v1819_v45 = vmul.f32 %v7092_v12, %v1792_v32 }
 0x5ed   : > { %6158 = vrot.lane.b32.xlu1 %v6157_v34, %s8876_s28  ;;  %v6162_v38 = vpack.i.bf16 %v1794_v44, %v1793_v33  ;;  %v6167_v37 = vpack.i.bf16 %v1819_v45, %v1818_v24 }
 0x5ef   : > { %6163 = vrot.lane.b32.xlu0 %v6162_v38, %s8876_s28 }
 0x5f3   : > { %6168 = vrot.lane.b32.xlu0 %v6167_v37, %s8876_s28 }
 0x65f   : > { %v6159_v52 = vpop.permute.xlu1 %6158 }
 0x660   : > { %v6161_v40 = vunpack.i.h.bf16 %v6159_v52  ;;  %v6160_v42 = vunpack.i.l.bf16 %v6159_v52 }
 0x661   : > { %v6164_v43 = vpop.permute.xlu0 %6163 }
 0x662   : > { %v1817_v47 = vsel %vm1009_vm4, %v6161_v40, 0.0  ;;  %v6166_v30 = vunpack.i.h.bf16 %v6164_v43  ;;  %v7494_v49 = vunpack.i.l.bf16 %v6164_v43  ;;  %v1816_v53 = vsel %vm1009_vm4, 0.0, %v6160_v42 }
 0x663   : > { %1867 = vrot.lane.b32.xlu0 %v1816_v53, %s8883_s1  ;;  %v1813_v54 = vsel %vm1009_vm4, %v6160_v42, %v6161_v40 }
 0x664   : > { %v1805_v59 = vsel %vm1009_vm4, 0.0, %v7494_v49  ;;  %v7503_v60 = vsel %vm1009_vm4, %v7494_v49, %v6166_v30  ;;  %v6172_v62 = vpack.i.bf16 %v1817_v47, %v1813_v54  ;;  %v1806_v2 = vsel %vm1009_vm4, %v6166_v30, 0.0 }
 0x665   : > { %v6169_v61 = vpop.permute.xlu0 %6168  ;;  %1857 = vrot.lane.b32.xlu1 %v1805_v59, %s8887_s15  ;;  %v6177_v1 = vpack.i.bf16 %v1806_v2, %v7503_v60  ;;  %v2034_v54 = vpack.c.bf16 %v7503_v60, %v7409_v15 }
 0x666   : > { %v6171_v3 = vunpack.i.h.bf16 %v6169_v61  ;;  %v6170_v4 = vunpack.i.l.bf16 %v6169_v61 }
 0x667   : > { %6173 = vrot.lane.b32.xlu0 %v6172_v62, %s8883_s1 }
 0x668   : > { %v1830_v8 = vsel %vm1009_vm4, %v6171_v3, 0.0  ;;  %v1826_v18 = vsel %vm1009_vm4, %v6170_v4, %v6171_v3  ;;  %v1829_v22 = vsel %vm1009_vm4, 0.0, %v6170_v4 }
 0x669   : > { %6178 = vrot.lane.b32.xlu1 %v6177_v1, %s8887_s15  ;;  %v6187_v21 = vpack.i.bf16 %v1830_v8, %v1826_v18 }
 0x66b   : > { %6188 = vrot.lane.b32.xlu0 %v6187_v21, %s8881_s16 }
 0x66d   : > { %6183 = vrot.lane.b32.xlu1 %v6172_v62, %s8879_s18 }
 0x66f   : > { %1845 = vrot.lane.b32.xlu0 %v1829_v22, %s8881_s16 }
 0x671   : > { %1833 = vrot.lane.b32.xlu1 %v1816_v53, %s8879_s18 }
 0x673   : > { %1907 = vrot.lane.b32.xlu0 %v1829_v22, %s8885_s7 }
 0x675   : > { %6193 = vrot.lane.b32.xlu1 %v6172_v62, %s8874_s2 }
 0x677   : > { %6198 = vrot.lane.b32.xlu0 %v6187_v21, %s8885_s7 }
 0x679   : > { %1897 = vrot.lane.b32.xlu1 %v1816_v53, %s8874_s2 }
 0x67b   : > { %6208 = vrot.lane.b32.xlu0 %v6177_v1, %s8891_s10 }
 0x67d   : > { %6203 = vrot.lane.b32.xlu1 %v6187_v21, %s8889_s11  ;;  %v5711_v21 = vcombine.low %v7525_v23, %v7525_v23 }
 0x67f   : > { %1887 = vrot.lane.b32.xlu0 %v1805_v59, %s8891_s10  ;;  %v5794_v59 = vpack.c.bf16 %v7494_v49, %v7412_v16 }
 0x681   : > { %1877 = vrot.lane.b32.xlu1 %v1829_v22, %s8889_s11 }
 0x685   : > { %2048 = vperm.xlu1 %6046, %v2045_v29  }
 0x6d5   : > { %v1868_v55 = vpop.permute.xlu0 %1867 }
 0x6d7   : > { %v1858_v56 = vpop.permute.xlu1 %1857 }
 0x6d9   : > { %v6174_v26 = vpop.permute.xlu0 %6173 }
 0x6da   : > { %v6176_v63 = vunpack.i.h.bf16 %v6174_v26  ;;  %v6175_v0 = vunpack.i.l.bf16 %v6174_v26  ;;  %v6824_v26 = vld [vmem:[%s8911_s3 + $0x8] ss:$0 sps:$4 sm:$0xff]   ;;  %s8938_s3 = sld [smem:[#allocation13_spill]] }
 0x6db   : > { %v6179_v7 = vpop.permute.xlu1 %6178 }
 0x6dc   : > { %v6181_v14 = vunpack.i.h.bf16 %v6179_v7  ;;  %v6180_v17 = vunpack.i.l.bf16 %v6179_v7  ;;  %v1873_v11 = vsel %vm1085_vm10, %v1868_v55, %v6175_v0  ;;  %v1874_v19 = vsel %vm1085_vm10, %v6175_v0, %v6176_v63  ;;  %v2429_v63 = vld [vmem:[%s6956_s14] sm:$0xff] }
 0x6dd   : > { %v6189_v27 = vpop.permute.xlu0 %6188  ;;  %v5715_v0 = vcombine.low %v2429_v63, %v2429_v63  ;;  %v5716_v7 = vcombine.high %v2429_v63, %v2429_v63 }
 0x6de   : > { %v1863_v31 = vsel %vm1074_vm11, %v1858_v56, %v6180_v17  ;;  %v6191_v25 = vunpack.i.h.bf16 %v6189_v27  ;;  %v6190_v32 = vunpack.i.l.bf16 %v6189_v27  ;;  %v1864_v34 = vsel %vm1074_vm11, %v6180_v17, %v6181_v14 }
 0x6df   : > { %v6184_v33 = vpop.permute.xlu1 %6183  ;;  %v2038_v44 = vpack.c.bf16 %v1874_v19, %v1864_v34  ;;  %v2037_v38 = vpack.c.bf16 %v1873_v11, %v1863_v31  ;;  %2489 = vmatprep.mubr.bf16.mxu0 %v5716_v7 }
 0x6e0   : > { %v6186_v45 = vunpack.i.h.bf16 %v6184_v33  ;;  %v6185_v24 = vunpack.i.l.bf16 %v6184_v33  ;;  %v1852_v40 = vsel %vm1061_vm12, %v6190_v32, %v6191_v25 }
 0x6e1   : > { %v1846_v37 = vpop.permute.xlu0 %1845  ;;  %2081 = vmatprep.subr.bf16.mxu1 %v2038_v44  ;;  %2473 = vmatprep.subr.bf16.mxu0 %v2038_v44 }
 0x6e2   : > { %2082 = vmatpush2.bf16.msra.mxu1 %v2037_v38  ;;  %2474 = vmatpush2.bf16.msra.mxu0 %v2037_v38  ;;  %v1840_v52 = vsel %vm1048_vm13, %v6185_v24, %v6186_v45  ;;  %v1851_v47 = vsel %vm1061_vm12, %v1846_v37, %v6190_v32 }
 0x6e3   : > { %v1834_v42 = vpop.permute.xlu1 %1833  ;;  %v2036_v43 = vpack.c.bf16 %v1852_v40, %v1840_v52 }
 0x6e4   : > { %v1839_v30 = vsel %vm1048_vm13, %v1834_v42, %v6185_v24 }
 0x6e5   : > { %v2035_v53 = vpack.c.bf16 %v1851_v47, %v1839_v30  ;;  %2083 = vmatprep.subr.bf16.mxu1 %v2036_v43  ;;  %2475 = vmatprep.subr.bf16.mxu0 %v2036_v43  ;;  %v1908_v62 = vpop.permute.xlu0 %1907 }
 0x6e7   : > { %2084 = vmatpush2.bf16.msra.mxu1 %v2035_v53  ;;  %2476 = vmatpush2.bf16.msra.mxu0 %v2035_v53  ;;  %v6194_v61 = vpop.permute.xlu1 %6193 }
 0x6e8   : > { %2085 = vmatprep.subr.bf16.mxu1 %v2034_v54  ;;  %2477 = vmatprep.subr.bf16.mxu0 %v2034_v54  ;;  %v6195_v60 = vunpack.i.l.bf16 %v6194_v61 }
 0x6e9   : > { %v6199_v16 = vpop.permute.xlu0 %6198 }
 0x6ea   : > { %v6200_v49 = vunpack.i.l.bf16 %v6199_v16 }
 0x6eb   : > { %5795 = vmatpush2.bf16.msk.msra.mxu1 %vm7296_vm3, %v5794_v59  ;;  %5811 = vmatpush2.bf16.msk.msra.mxu0 %vm7296_vm3, %v5794_v59  ;;  %v1898_v15 = vpop.permute.xlu1 %1897 }
 0x6ec   : > { %2087 = vmatprep.subr.bf16.mxu1 %v7425_v51  ;;  %2479 = vmatprep.subr.bf16.mxu0 %v7425_v51  ;;  %v6201_v51 = vunpack.i.h.bf16 %v6199_v16  ;;  %v1913_v1 = vsel %vm1129_vm5, %v1908_v62, %v6200_v49  ;;  %v1903_v8 = vsel %vm1118_vm6, %v1898_v15, %v6195_v60 }
 0x6ed   : > { %v6209_v2 = vpop.permute.xlu0 %6208  ;;  %v7581_v22 = vpack.c.bf16 %v1913_v1, %v1903_v8 }
 0x6ef   : > { %2088 = vmatpush2.bf16.msra.mxu1 %v7427_v35  ;;  %2480 = vmatpush2.bf16.msra.mxu0 %v7427_v35  ;;  %v6204_v35 = vpop.permute.xlu1 %6203 }
 0x6f0   : > { %2089 = vmatprep.subr.bf16.mxu1 %v7432_v57  ;;  %2481 = vmatprep.subr.bf16.mxu0 %v7432_v57  ;;  %v6196_v57 = vunpack.i.h.bf16 %v6194_v61  ;;  %v6205_v3 = vunpack.i.l.bf16 %v6204_v35 }
 0x6f1   : > { %v1888_v28 = vpop.permute.xlu0 %1887 }
 0x6f2   : > { %v1904_v4 = vsel %vm1118_vm6, %v6195_v60, %v6196_v57 }
 0x6f3   : > { %2090 = vmatpush2.bf16.msra.mxu1 %v7437_v6  ;;  %2482 = vmatpush2.bf16.msra.mxu0 %v7437_v6  ;;  %v6206_v6 = vunpack.i.h.bf16 %v6204_v35 }
 0x6f4   : > { %2091 = vmatprep.subr.bf16.mxu1 %v7444_v58  ;;  %2483 = vmatprep.subr.bf16.mxu0 %v7444_v58  ;;  %v1914_v58 = vsel %vm1129_vm5, %v6200_v49, %v6201_v51 }
 0x6f5   : > { %v7573_v18 = vpack.c.bf16 %v1914_v58, %v1904_v4 }
 0x6f7   : > { %2092 = vmatpush2.bf16.msra.mxu1 %v7446_v20  ;;  %2484 = vmatpush2.bf16.msra.mxu0 %v7446_v20  ;;  %v6211_v20 = vunpack.i.h.bf16 %v6209_v2 }
 0x6f8   : > { %2093 = vmatprep.subr.bf16.mxu1 %v7456_v5  ;;  %2485 = vmatprep.subr.bf16.mxu0 %v7456_v5  ;;  %v6210_v5 = vunpack.i.l.bf16 %v6209_v2 }
 0x6fa   : > { %v1894_v29 = vsel %vm1107_vm8, %v6210_v5, %v6211_v20 }
 0x6fb   : > { %5799 = vmatpush2.bf16.msk.msra.mxu1 %vm7195_vm0, %v7453_v39  ;;  %5815 = vmatpush2.bf16.msk.msra.mxu0 %vm7195_vm0, %v7453_v39  ;;  %v1878_v39 = vpop.permute.xlu1 %1877 }
 0x6fc   : > { %2095 = vmatprep.subr.bf16.mxu1 %v7327_v48  ;;  %2487 = vmatprep.subr.bf16.mxu0 %v7327_v48  ;;  %v1884_v48 = vsel %vm1096_vm7, %v6205_v3, %v6206_v6  ;;  %v1883_v55 = vsel %vm1096_vm7, %v1878_v39, %v6205_v3 }
 0x6fd   : > { %v7585_v23 = vpack.c.bf16 %v1894_v29, %v1884_v48 }
 0x6ff   : > { %2096 = vmatpush2.bf16.msra.mxu1 %v7337_v50  ;;  %2488 = vmatpush2.bf16.msra.mxu0 %v7337_v50  ;;  %v1893_v50 = vsel %vm1107_vm8, %v1888_v28, %v6210_v5 }
 0x700   : > { %2118 = vmatprep.subr.bf16.mxu1 %v7573_v18  ;;  %v7591_v56 = vpack.c.bf16 %v1893_v50, %v1883_v55  ;;  %v2049_v27 = vpop.permute.xlu1 %2048 }
 0x702   : > { %2098 = vmatmul.mubr.bf16.vlgmr.msra.gmra.mxu1 %v5711_v21  ;;  %2490 = vmatmul.mubr.bf16.vlgmr.msra.gmra.mxu0 %v5715_v0 }
 0x703   : > { %2119 = vmatpush1.bf16.msra.mxu1 %v7581_v22  ;;  %2138 = vmatprep.mubr.bf16.mxu1 %v6900_v41 }
 0x704   : > { %2120 = vmatprep.subr.bf16.mxu1 %v7585_v23 }
 0x707   : > { %2121 = vmatpush1.bf16.msra.mxu1 %v7591_v56 }
 0x70a   : > { %5714 = vmatmul.mubr.msk.bf16.vlgmr.msra.gmra.mxu1 %vm8872_vm15, %v6824_v26  ;;  %v2431_v26 = vld [vmem:[%s6961_s19] sm:$0xff]  ;;  %vm2447_vm15 = vcmask 850944  }
 0x70b   : > { %2530 = vmatprep.mubr.bf16.mxu1 %v6900_v41 }
 0x7c2   : > { %v2099_v14 = vpop.f32.mrf.mxu1  ;;  %v7633_v29 = vpop.f32.mrf.mxu0 }
 0x7c3   : > { %v2100_v31 = vadd.f32 %v2099_v14, %v2049_v27 }
 0x7c4   : > { %v2101_v17 = vpop.f32.mrf.mxu1  ;;  %v7637_v55 = vpop.f32.mrf.mxu0 }
 0x7c5   : > { %v2102_v32 = vadd.f32 %v2101_v17, %v2049_v27 }
 0x7c6   : > { %v2103_v11 = vpop.f32.mrf.mxu1  ;;  %v2495_v50 = vpop.f32.mrf.mxu0 }
 0x7c8   : > { %v2104_v19 = vpop.f32.mrf.mxu1  ;;  %v2496_v63 = vpop.f32.mrf.mxu0 }
 0x7ca   : > { %v2140_v25 = vpop.f32.mrf.mxu1 }
 0x7cb   : > { %v2141_v34 = vadd.f32 %v2140_v25, %v2100_v31 }
 0x7cc   : > { %v2142_v33 = vpop.f32.mrf.mxu1 }
 0x7cd   : > { %v2147_v44 = vmul.f32 0.2, %v2141_v34  ;;  %v2143_v38 = vadd.f32 %v2142_v33, %v2102_v32 }
 0x7ce   : > { %v2144_v45 = vpop.f32.mrf.mxu1 }
 0x7cf   : > { %v2149_v24 = vmax.f32 %v2141_v34, %v2147_v44  ;;  %v2148_v37 = vmul.f32 0.2, %v2143_v38 }
 0x7d0   : > { %v2145_v52 = vpop.f32.mrf.mxu1 }
 0x7d1   : > { %v2150_v40 = vmax.f32 %v2143_v38, %v2148_v37  ;;  %v2176_v42 = vmul.f32 %v7086_v9, %v2149_v24  ;;  %v2151_v47 = vmul.f32 %v7088_v10, %v2149_v24 }
 0x7d3   : > { %v2177_v43 = vmul.f32 %v7092_v12, %v2150_v40  ;;  %v2152_v30 = vmul.f32 %v7094_v13, %v2150_v40  ;;  %v6222_v59 = vpack.i.bf16 %v2150_v40, %v2149_v24 }
 0x7d5   : > { %v6212_v53 = vpack.i.bf16 %v2177_v43, %v2176_v42  ;;  %v6217_v54 = vpack.i.bf16 %v2152_v30, %v2151_v47 }
 0x7d7   : > { %6213 = vrot.lane.b32.xlu0 %v6212_v53, %s8876_s28  ;;  %6218 = vrot.lane.b32.xlu1 %v6217_v54, %s8876_s28 }
 0x7db   : > { %6223 = vrot.lane.b32.xlu0 %v6222_v59, %s8876_s28 }
 0x849   : > { %v6214_v61 = vpop.permute.xlu0 %6213  ;;  %v6219_v62 = vpop.permute.xlu1 %6218 }
 0x84a   : > { %v7605_v49 = vunpack.i.l.bf16 %v6219_v62  ;;  %v6216_v6 = vunpack.i.h.bf16 %v6214_v61  ;;  %v6215_v3 = vunpack.i.l.bf16 %v6214_v61  ;;  %v6221_v20 = vunpack.i.h.bf16 %v6219_v62 }
 0x84c   : > { %v2163_v58 = vsel %vm1009_vm4, 0.0, %v7605_v49  ;;  %v2188_v5 = vsel %vm1009_vm4, %v6216_v6, 0.0  ;;  %v2187_v4 = vsel %vm1009_vm4, 0.0, %v6215_v3  ;;  %v2184_v1 = vsel %vm1009_vm4, %v6215_v3, %v6216_v6 }
 0x84d   : > { %v6224_v15 = vpop.permute.xlu0 %6223  ;;  %v6237_v8 = vpack.i.bf16 %v2184_v1, %v2187_v4  ;;  %v7623_v21 = vsel %vm1009_vm4, %v7605_v49, %v6221_v20  ;;  %v2164_v39 = vsel %vm1009_vm4, %v6221_v20, 0.0  ;;  %v6247_v48 = vpack.i.bf16 %v2188_v5, %v2184_v1 }
 0x84e   : > { %v6226_v16 = vunpack.i.h.bf16 %v6224_v15  ;;  %v6225_v51 = vunpack.i.l.bf16 %v6224_v15  ;;  %v6242_v28 = vpack.i.bf16 %v2164_v39, %v7623_v21 }
 0x850   : > { %v2175_v35 = vsel %vm1009_vm4, %v6226_v16, 0.0  ;;  %v2174_v57 = vsel %vm1009_vm4, 0.0, %v6225_v51  ;;  %v2171_v60 = vsel %vm1009_vm4, %v6225_v51, %v6226_v16 }
 0x851   : > { %2255 = vrot.lane.b32.xlu0 %v2174_v57, %s8874_s2  ;;  %2225 = vrot.lane.b32.xlu1 %v2174_v57, %s8883_s1  ;;  %v6227_v2 = vpack.i.bf16 %v2175_v35, %v2171_v60 }
 0x855   : > { %6228 = vrot.lane.b32.xlu0 %v6227_v2, %s8874_s2  ;;  %2245 = vrot.lane.b32.xlu1 %v2163_v58, %s8891_s10 }
 0x859   : > { %2269 = vrot.lane.b32.xlu0 %v2188_v5, %s8885_s7  ;;  %6233 = vrot.lane.b32.xlu1 %v6227_v2, %s8883_s1 }
 0x85d   : > { %2235 = vrot.lane.b32.xlu0 %v2187_v4, %s8889_s11  ;;  %6238 = vrot.lane.b32.xlu1 %v6237_v8, %s8885_s7 }
 0x861   : > { %6248 = vrot.lane.b32.xlu0 %v6247_v48, %s8889_s11  ;;  %6243 = vrot.lane.b32.xlu1 %v6242_v28, %s8891_s10 }
 0x865   : > { %6258 = vrot.lane.b32.xlu0 %v6242_v28, %s8887_s15  ;;  %2203 = vrot.lane.b32.xlu1 %v2187_v4, %s8881_s16 }
 0x869   : > { %2215 = vrot.lane.b32.xlu0 %v2163_v58, %s8887_s15  ;;  %6253 = vrot.lane.b32.xlu1 %v6247_v48, %s8881_s16 }
 0x86d   : > { %2191 = vrot.lane.b32.xlu0 %v2174_v57, %s8879_s18  ;;  %6263 = vrot.lane.b32.xlu1 %v6227_v2, %s8879_s18 }
 0x871   : > { %2434 = vperm.xlu1 %6046, %v2431_v26  }
 0x8c3   : > { %v2256_v0 = vpop.permute.xlu0 %2255  ;;  %v2226_v7 = vpop.permute.xlu1 %2225 }
 0x8c7   : > { %v6229_v14 = vpop.permute.xlu0 %6228  ;;  %v2246_v17 = vpop.permute.xlu1 %2245 }
 0x8c8   : > { %v6230_v34 = vunpack.i.l.bf16 %v6229_v14  ;;  %v6231_v33 = vunpack.i.h.bf16 %v6229_v14 }
 0x8ca   : > { %v2261_v54 = vsel %vm1118_vm6, %v2256_v0, %v6230_v34  ;;  %v2262_v15 = vsel %vm1118_vm6, %v6230_v34, %v6231_v33  ;;  %v6827_v34 = vld [vmem:[%s6956_s14 + $0x8] ss:$0 sps:$4 sm:$0xff]  }
 0x8cb   : > { %v2270_v11 = vpop.permute.xlu0 %2269  ;;  %v6234_v27 = vpop.permute.xlu1 %6233 }
 0x8cc   : > { %v6236_v45 = vunpack.i.h.bf16 %v6234_v27  ;;  %v6235_v24 = vunpack.i.l.bf16 %v6234_v27 }
 0x8ce   : > { %v2232_v2 = vsel %vm1085_vm10, %v6235_v24, %v6236_v45  ;;  %v2231_v5 = vsel %vm1085_vm10, %v2226_v7, %v6235_v24  ;;  %v6848_v24 = vld [vmem:[%s7082_s26] sm:$0xff] }
 0x8cf   : > { %v2236_v19 = vpop.permute.xlu0 %2235  ;;  %v6239_v31 = vpop.permute.xlu1 %6238 }
 0x8d0   : > { %v6241_v25 = vunpack.i.h.bf16 %v6239_v31  ;;  %v6240_v32 = vunpack.i.l.bf16 %v6239_v31 }
 0x8d2   : > { %v2272_v44 = vsel %vm1129_vm5, %v6241_v25, %v2270_v11  ;;  %v2271_v38 = vsel %vm1129_vm5, %v6240_v32, %v6241_v25 }
 0x8d3   : > { %v6249_v37 = vpop.permute.xlu0 %6248  ;;  %v6244_v52 = vpop.permute.xlu1 %6243  ;;  %v2428_v40 = vpack.c.bf16 %v2272_v44, %v2272_v44  ;;  %v2427_v42 = vpack.c.bf16 %v2271_v38, %v2271_v38 }
 0x8d4   : > { %v6251_v43 = vunpack.i.h.bf16 %v6249_v37  ;;  %v6250_v47 = vunpack.i.l.bf16 %v6249_v37  ;;  %v6246_v30 = vunpack.i.h.bf16 %v6244_v52  ;;  %v6245_v53 = vunpack.i.l.bf16 %v6244_v52 }
 0x8d5   : > { %5718 = vmatprep.subr.msk.bf16.mxu1 %vm1191_vm9, %v2428_v40  ;;  %v2452_v59 = vsel %vm1191_vm9, %v2427_v42, 0  ;;  %v6849_v40 = vld [vmem:[%s7082_s26 + $0x8] sm:$0xff] }
 0x8d6   : > { %v2251_v61 = vsel %vm1107_vm8, %v2246_v17, %v6245_v53  ;;  %2501 = vmatpush1.bf16.msra.mxu1 %v2452_v59  ;;  %v2252_v62 = vsel %vm1107_vm8, %v6245_v53, %v6246_v30  ;;  %v2242_v16 = vsel %vm1096_vm7, %v6250_v47, %v6251_v43  ;;  %v2241_v6 = vsel %vm1096_vm7, %v2236_v19, %v6250_v47 }
 0x8d7   : > { %v6259_v51 = vpop.permute.xlu0 %6258  ;;  %v2204_v35 = vpop.permute.xlu1 %2203  ;;  %v2426_v57 = vpack.c.bf16 %v2262_v15, %v2252_v62  ;;  %v2425_v60 = vpack.c.bf16 %v2261_v54, %v2251_v61  ;;  %v2424_v3 = vpack.c.bf16 %v2242_v16, %v2232_v2  ;;  %v2423_v48 = vpack.c.bf16 %v2241_v6, %v2231_v5 }
 0x8d8   : > { %v6261_v58 = vunpack.i.h.bf16 %v6259_v51  ;;  %v6260_v20 = vunpack.i.l.bf16 %v6259_v51 }
 0x8d9   : > { %2502 = vmatprep.subr.bf16.mxu1 %v2426_v57 }
 0x8da   : > { %2503 = vmatpush1.bf16.msra.mxu1 %v2425_v60  ;;  %v2222_v63 = vsel %vm1074_vm11, %v6260_v20, %v6261_v58 }
 0x8db   : > { %v2216_v4 = vpop.permute.xlu0 %2215  ;;  %v6254_v1 = vpop.permute.xlu1 %6253  ;;  %2504 = vmatprep.subr.bf16.mxu1 %v2424_v3 }
 0x8dc   : > { %v6256_v8 = vunpack.i.h.bf16 %v6254_v1  ;;  %v6255_v39 = vunpack.i.l.bf16 %v6254_v1  ;;  %v2221_v28 = vsel %vm1074_vm11, %v2216_v4, %v6260_v20 }
 0x8de   : > { %v2209_v50 = vsel %vm1061_vm12, %v2204_v35, %v6255_v39  ;;  %2505 = vmatpush1.bf16.msra.mxu1 %v2423_v48  ;;  %v2210_v26 = vsel %vm1061_vm12, %v6255_v39, %v6256_v8 }
 0x8df   : > { %v6264_v0 = vpop.permute.xlu1 %6263  ;;  %v2422_v14 = vpack.c.bf16 %v2222_v63, %v2210_v26  ;;  %v2421_v17 = vpack.c.bf16 %v2221_v28, %v2209_v50  ;;  %v2192_v27 = vpop.permute.xlu0 %2191  ;;  %v2714_v26 = vld [vmem:[%s6971_s30] sm:$0xff] }
 0x8e0   : > { %v6266_v7 = vunpack.i.h.bf16 %v6264_v0  ;;  %v6265_v11 = vunpack.i.l.bf16 %v6264_v0 }
 0x8e1   : > { %2506 = vmatprep.subr.bf16.mxu1 %v2422_v14 }
 0x8e2   : > { %v2197_v19 = vsel %vm1048_vm13, %v2192_v27, %v6265_v11  ;;  %2507 = vmatpush1.bf16.msra.mxu1 %v2421_v17  ;;  %v2198_v31 = vsel %vm1048_vm13, %v6265_v11, %v6266_v7 }
 0x8e3   : > { %v5818_v25 = vpack.c.bf16 %v2197_v19, %v7605_v49  ;;  %v2420_v32 = vpack.c.bf16 %v2198_v31, %v7623_v21 }
 0x8e5   : > { %2508 = vmatprep.subr.bf16.mxu1 %v2420_v32 }
 0x8e6   : > { %5819 = vmatpush1.bf16.msk.msra.mxu1 %vm7195_vm0, %v5818_v25 }
 0x8e7   : > { %2510 = vmatprep.subr.bf16.mxu1 %v7573_v18 }
 0x8ea   : > { %2511 = vmatpush1.bf16.msra.mxu1 %v7581_v22 }
 0x8eb   : > { %2512 = vmatprep.subr.bf16.mxu1 %v7585_v23 }
 0x8ec   : > { %v2435_v49 = vpop.permute.xlu1 %2434 }
 0x8ed   : > { %v2492_v21 = vadd.f32 %v7633_v29, %v2435_v49  ;;  %v2494_v18 = vadd.f32 %v7637_v55, %v2435_v49 }
 0x8ee   : > { %2513 = vmatpush1.bf16.msra.mxu1 %v7591_v56 }
 0x8f1   : > { %5719 = vmatmul.mubr.msk.bf16.vlgmr.msra.gmra.mxu1 %vm2447_vm15, %v6827_v34 }
 0x8f2   : > { %2761 = vmatprep.mubr.bf16.mxu1 %v6900_v41 }
 0x9b1   : > { %v2532_v33 = vpop.f32.mrf.mxu1 }
 0x9b2   : > { %v2533_v44 = vadd.f32 %v2532_v33, %v2492_v21 }
 0x9b3   : > { %v2534_v22 = vpop.f32.mrf.mxu1 }
 0x9b4   : > { %v2539_v38 = vmul.f32 0.2, %v2533_v44  ;;  %v2535_v45 = vadd.f32 %v2534_v22, %v2494_v18 }
 0x9b5   : > { %v2536_v23 = vpop.f32.mrf.mxu1 }
 0x9b6   : > { %v7674_v37 = vadd.f32 %v6848_v24, %v2539_v38  ;;  %v2540_v56 = vmul.f32 0.2, %v2535_v45 }
 0x9b7   : > { %v2537_v52 = vpop.f32.mrf.mxu1 }
 0x9b8   : > { %v7677_v42 = vadd.f32 %v6849_v40, %v2540_v56  ;;  %v2568_v43 = vmul.f32 %v7086_v9, %v7674_v37  ;;  %v2543_v55 = vmul.f32 %v7088_v10, %v7674_v37 }
 0x9ba   : > { %v2569_v29 = vmul.f32 %v7092_v12, %v7677_v42  ;;  %v2544_v47 = vmul.f32 %v7094_v13, %v7677_v42  ;;  %v6277_v54 = vpack.i.bf16 %v7677_v42, %v7674_v37 }
 0x9bc   : > { %v6267_v30 = vpack.i.bf16 %v2569_v29, %v2568_v43  ;;  %v6272_v53 = vpack.i.bf16 %v2544_v47, %v2543_v55 }
 0x9be   : > { %6268 = vrot.lane.b32.xlu0 %v6267_v30, %s8876_s28  ;;  %6273 = vrot.lane.b32.xlu1 %v6272_v53, %s8876_s28 }
 0x9c2   : > { %6278 = vrot.lane.b32.xlu0 %v6277_v54, %s8876_s28 }
 0xa30   : > { %v6269_v59 = vpop.permute.xlu0 %6268  ;;  %v6274_v61 = vpop.permute.xlu1 %6273 }
 0xa31   : > { %v7692_v51 = vunpack.i.l.bf16 %v6274_v61  ;;  %v6271_v6 = vunpack.i.h.bf16 %v6269_v59  ;;  %v6270_v3 = vunpack.i.l.bf16 %v6269_v59  ;;  %v6276_v20 = vunpack.i.h.bf16 %v6274_v61 }
 0xa33   : > { %v2555_v58 = vsel %vm1009_vm4, 0.0, %v7692_v51  ;;  %v2580_v5 = vsel %vm1009_vm4, %v6271_v6, 0.0  ;;  %v2576_v4 = vsel %vm1009_vm4, %v6270_v3, %v6271_v6  ;;  %v2579_v1 = vsel %vm1009_vm4, 0.0, %v6270_v3 }
 0xa34   : > { %v6279_v62 = vpop.permute.xlu0 %6278  ;;  %v6292_v8 = vpack.i.bf16 %v2576_v4, %v2579_v1  ;;  %v2556_v39 = vsel %vm1009_vm4, %v6276_v20, 0.0  ;;  %v7711_v48 = vsel %vm1009_vm4, %v7692_v51, %v6276_v20  ;;  %v6302_v50 = vpack.i.bf16 %v2580_v5, %v2576_v4 }
 0xa35   : > { %v6281_v15 = vunpack.i.h.bf16 %v6279_v62  ;;  %v6280_v16 = vunpack.i.l.bf16 %v6279_v62  ;;  %v6297_v28 = vpack.i.bf16 %v2556_v39, %v7711_v48 }
 0xa37   : > { %v2567_v35 = vsel %vm1009_vm4, %v6281_v15, 0.0  ;;  %v2563_v57 = vsel %vm1009_vm4, %v6280_v16, %v6281_v15  ;;  %v2566_v60 = vsel %vm1009_vm4, 0.0, %v6280_v16 }
 0xa38   : > { %2647 = vrot.lane.b32.xlu0 %v2566_v60, %s8874_s2  ;;  %2617 = vrot.lane.b32.xlu1 %v2566_v60, %s8883_s1  ;;  %v6282_v2 = vpack.i.bf16 %v2567_v35, %v2563_v57 }
 0xa3c   : > { %6283 = vrot.lane.b32.xlu0 %v6282_v2, %s8874_s2  ;;  %2637 = vrot.lane.b32.xlu1 %v2555_v58, %s8891_s10 }
 0xa40   : > { %2661 = vrot.lane.b32.xlu0 %v2580_v5, %s8885_s7  ;;  %6288 = vrot.lane.b32.xlu1 %v6282_v2, %s8883_s1 }
 0xa44   : > { %2627 = vrot.lane.b32.xlu0 %v2579_v1, %s8889_s11  ;;  %6293 = vrot.lane.b32.xlu1 %v6292_v8, %s8885_s7 }
 0xa48   : > { %6303 = vrot.lane.b32.xlu0 %v6302_v50, %s8889_s11  ;;  %6298 = vrot.lane.b32.xlu1 %v6297_v28, %s8891_s10 }
 0xa4c   : > { %6313 = vrot.lane.b32.xlu0 %v6297_v28, %s8887_s15  ;;  %2595 = vrot.lane.b32.xlu1 %v2579_v1, %s8881_s16 }
 0xa50   : > { %2607 = vrot.lane.b32.xlu0 %v2555_v58, %s8887_s15  ;;  %6308 = vrot.lane.b32.xlu1 %v6302_v50, %s8881_s16 }
 0xa54   : > { %2583 = vrot.lane.b32.xlu0 %v2566_v60, %s8879_s18  ;;  %6318 = vrot.lane.b32.xlu1 %v6282_v2, %s8879_s18 }
 0xa58   : > { %2717 = vperm.xlu1 %6046, %v2714_v26  }
 0xaaa   : > { %v2648_v63 = vpop.permute.xlu0 %2647  ;;  %v2618_v0 = vpop.permute.xlu1 %2617 }
 0xaae   : > { %v6284_v14 = vpop.permute.xlu0 %6283  ;;  %v2638_v17 = vpop.permute.xlu1 %2637 }
 0xaaf   : > { %v6285_v32 = vunpack.i.l.bf16 %v6284_v14  ;;  %v6286_v34 = vunpack.i.h.bf16 %v6284_v14 }
 0xab1   : > { %v2653_v40 = vsel %vm1118_vm6, %v2648_v63, %v6285_v32  ;;  %v2654_v29 = vsel %vm1118_vm6, %v6285_v32, %v6286_v34 }
 0xab2   : > { %v2662_v7 = vpop.permute.xlu0 %2661  ;;  %v6289_v11 = vpop.permute.xlu1 %6288 }
 0xab3   : > { %v6291_v33 = vunpack.i.h.bf16 %v6289_v11  ;;  %v6290_v44 = vunpack.i.l.bf16 %v6289_v11 }
 0xab5   : > { %v2624_v62 = vsel %vm1085_vm10, %v6290_v44, %v6291_v33  ;;  %v2623_v60 = vsel %vm1085_vm10, %v2618_v0, %v6290_v44 }
 0xab6   : > { %v2628_v27 = vpop.permute.xlu0 %2627  ;;  %v6294_v19 = vpop.permute.xlu1 %6293 }
 0xab7   : > { %v6296_v31 = vunpack.i.h.bf16 %v6294_v19  ;;  %v6295_v25 = vunpack.i.l.bf16 %v6294_v19 }
 0xab9   : > { %v7726_v49 = vsel %vm1129_vm5, %v6296_v31, %v2662_v7  ;;  %v7729_v21 = vsel %vm1129_vm5, %v6295_v25, %v6296_v31 }
 0xaba   : > { %v6304_v18 = vpop.permute.xlu0 %6303  ;;  %v6299_v22 = vpop.permute.xlu1 %6298  ;;  %v2712_v38 = vpack.c.bf16 %v7726_v49, %v7726_v49  ;;  %v2711_v45 = vpack.c.bf16 %v7729_v21, %v7729_v21 }
 0xabb   : > { %v6306_v23 = vunpack.i.h.bf16 %v6304_v18  ;;  %v6305_v24 = vunpack.i.l.bf16 %v6304_v18  ;;  %v6301_v56 = vunpack.i.h.bf16 %v6299_v22  ;;  %v6300_v52 = vunpack.i.l.bf16 %v6299_v22 }
 0xabc   : > { %5720 = vmatprep.subr.msk.bf16.mxu1 %vm1191_vm9, %v2712_v38  ;;  %v2724_v43 = vsel %vm1191_vm9, %v2711_v45, 0 }
 0xabd   : > { %v2634_v55 = vsel %vm1096_vm7, %v6305_v24, %v6306_v23  ;;  %v2643_v47 = vsel %vm1107_vm8, %v2638_v17, %v6300_v52  ;;  %v2644_v30 = vsel %vm1107_vm8, %v6300_v52, %v6301_v56  ;;  %2736 = vmatpush1.bf16.msra.mxu1 %v2724_v43  ;;  %v2633_v15 = vsel %vm1096_vm7, %v2628_v27, %v6305_v24  ;;  %v2713_v27 = vld [vmem:[%s6966_s24] sm:$0xf] }
 0xabe   : > { %v7742_v53 = vpack.c.bf16 %v2653_v40, %v2643_v47  ;;  %v7744_v54 = vpack.c.bf16 %v2654_v29, %v2644_v30  ;;  %v6314_v59 = vpop.permute.xlu0 %6313  ;;  %v2596_v61 = vpop.permute.xlu1 %2595  ;;  %v7748_v16 = vpack.c.bf16 %v2634_v55, %v2624_v62  ;;  %v7754_v3 = vpack.c.bf16 %v2633_v15, %v2623_v60 }
 0xabf   : > { %v6316_v35 = vunpack.i.h.bf16 %v6314_v59  ;;  %v6315_v57 = vunpack.i.l.bf16 %v6314_v59 }
 0xac0   : > { %2737 = vmatprep.subr.bf16.mxu1 %v7744_v54 }
 0xac1   : > { %2738 = vmatpush1.bf16.msra.mxu1 %v7742_v53  ;;  %v2614_v5 = vsel %vm1074_vm11, %v6315_v57, %v6316_v35 }
 0xac2   : > { %v2608_v2 = vpop.permute.xlu0 %2607  ;;  %v6309_v6 = vpop.permute.xlu1 %6308  ;;  %2739 = vmatprep.subr.bf16.mxu1 %v7748_v16 }
 0xac3   : > { %v6311_v58 = vunpack.i.h.bf16 %v6309_v6  ;;  %v6310_v20 = vunpack.i.l.bf16 %v6309_v6  ;;  %v2613_v4 = vsel %vm1074_vm11, %v2608_v2, %v6315_v57 }
 0xac5   : > { %v2601_v1 = vsel %vm1061_vm12, %v2596_v61, %v6310_v20  ;;  %v2602_v8 = vsel %vm1061_vm12, %v6310_v20, %v6311_v58  ;;  %2740 = vmatpush1.bf16.msra.mxu1 %v7754_v3 }
 0xac6   : > { %v7761_v39 = vpack.c.bf16 %v2613_v4, %v2601_v1  ;;  %v7763_v28 = vpack.c.bf16 %v2614_v5, %v2602_v8  ;;  %v6319_v50 = vpop.permute.xlu1 %6318  ;;  %v2584_v0 = vpop.permute.xlu0 %2583 }
 0xac7   : > { %v6321_v26 = vunpack.i.h.bf16 %v6319_v50  ;;  %v6320_v63 = vunpack.i.l.bf16 %v6319_v50 }
 0xac8   : > { %2741 = vmatprep.subr.bf16.mxu1 %v7763_v28 }
 0xac9   : > { %v2589_v14 = vsel %vm1048_vm13, %v2584_v0, %v6320_v63  ;;  %v2590_v17 = vsel %vm1048_vm13, %v6320_v63, %v6321_v26  ;;  %2742 = vmatpush1.bf16.msra.mxu1 %v7761_v39  ;;  %v2971_v26 = vld [vmem:[%s6981_s12] sm:$0xff] }
 0xaca   : > { %v7770_v7 = vpack.c.bf16 %v2590_v17, %v7711_v48  ;;  %v7773_v11 = vpack.c.bf16 %v2589_v14, %v7692_v51  ;;  %v7822_v63 = vld [vmem:[%s8918_s0] sm:$0xff]  ;;  %s8919_s0 = sld [smem:[#allocation5_spill]] }
 0xacb   : > { %v5723_v0 = vcombine.high %v7822_v63, %v7822_v63 }
 0xacc   : > { %2743 = vmatprep.subr.bf16.mxu1 %v7770_v7 }
 0xacd   : > { %5823 = vmatpush1.bf16.msk.msra.mxu1 %vm7195_vm0, %v7773_v11  ;;  %5724 = vmatprep.mubr.msk.bf16.mxu0 %vm1452_vm2, %v5723_v0 }
 0xad0   : > { %5721 = vmatmul.mubr.msk.bf16.vlgmr.msra.gmra.mxu1 %vm1187_vm1, %v2713_v27 }
 0xad3   : > { %v2718_v19 = vpop.permute.xlu1 %2717 }
 0xb90   : > { %v2763_v31 = vpop.f32.mrf.mxu1 }
 0xb91   : > { %v2764_v25 = vadd.f32 %v2763_v31, %v2718_v19 }
 0xb92   : > { %v2765_v32 = vpop.f32.mrf.mxu1 }
 0xb93   : > { %v2770_v34 = vmul.f32 0.2, %v2764_v25  ;;  %v2766_v33 = vadd.f32 %v2765_v32, %v2718_v19 }
 0xb94   : > { %v2767_v48 = vpop.f32.mrf.mxu1 }
 0xb95   : > { %v2772_v44 = vmax.f32 %v2764_v25, %v2770_v34  ;;  %v2771_v18 = vmul.f32 0.2, %v2766_v33 }
 0xb96   : > { %v2768_v51 = vpop.f32.mrf.mxu1 }
 0xb97   : > { %v2773_v22 = vmax.f32 %v2766_v33, %v2771_v18  ;;  %v2774_v38 = vmul.f32 %v7088_v10, %v2772_v44  ;;  %v2799_v45 = vmul.f32 %v7086_v9, %v2772_v44 }
 0xb99   : > { %v2775_v23 = vmul.f32 %v7094_v13, %v2773_v22  ;;  %v2800_v24 = vmul.f32 %v7092_v12, %v2773_v22  ;;  %v6332_v40 = vpack.i.bf16 %v2773_v22, %v2772_v44 }
 0xb9b   : > { %v6327_v56 = vpack.i.bf16 %v2800_v24, %v2799_v45  ;;  %v6322_v52 = vpack.i.bf16 %v2775_v23, %v2774_v38 }
 0xb9d   : > { %6328 = vrot.lane.b32.xlu1 %v6327_v56, %s8876_s28  ;;  %6323 = vrot.lane.b32.xlu0 %v6322_v52, %s8876_s28 }
 0xba1   : > { %6333 = vrot.lane.b32.xlu0 %v6332_v40, %s8876_s28 }
 0xc0f   : > { %v6329_v43 = vpop.permute.xlu1 %6328  ;;  %v6324_v29 = vpop.permute.xlu0 %6323 }
 0xc10   : > { %v6330_v55 = vunpack.i.l.bf16 %v6329_v43  ;;  %v7788_v47 = vunpack.i.l.bf16 %v6324_v29  ;;  %v6331_v30 = vunpack.i.h.bf16 %v6329_v43  ;;  %v6326_v62 = vunpack.i.h.bf16 %v6324_v29 }
 0xc12   : > { %v2810_v59 = vsel %vm1009_vm4, 0.0, %v6330_v55  ;;  %v2786_v57 = vsel %vm1009_vm4, 0.0, %v7788_v47  ;;  %v2811_v6 = vsel %vm1009_vm4, %v6331_v30, 0.0  ;;  %v2807_v58 = vsel %vm1009_vm4, %v6330_v55, %v6331_v30 }
 0xc13   : > { %v6334_v61 = vpop.permute.xlu0 %6333  ;;  %2858 = vrot.lane.b32.xlu1 %v2810_v59, %s8889_s11  ;;  %2868 = vrot.lane.b32.xlu0 %v2786_v57, %s8891_s10  ;;  %v2787_v5 = vsel %vm1009_vm4, %v6326_v62, 0.0  ;;  %v7802_v4 = vsel %vm1009_vm4, %v7788_v47, %v6326_v62  ;;  %v6342_v1 = vpack.i.bf16 %v2811_v6, %v2807_v58 }
 0xc14   : > { %v6336_v15 = vunpack.i.h.bf16 %v6334_v61  ;;  %v6335_v35 = vunpack.i.l.bf16 %v6334_v61  ;;  %v6347_v8 = vpack.i.bf16 %v2787_v5, %v7802_v4 }
 0xc16   : > { %v2798_v60 = vsel %vm1009_vm4, %v6336_v15, 0.0  ;;  %v2794_v2 = vsel %vm1009_vm4, %v6335_v35, %v6336_v15  ;;  %v2797_v50 = vsel %vm1009_vm4, 0.0, %v6335_v35 }
 0xc17   : > { %v6337_v20 = vpack.i.bf16 %v2798_v60, %v2794_v2  ;;  %2838 = vrot.lane.b32.xlu1 %v2786_v57, %s8887_s15 }
 0xc19   : > { %6338 = vrot.lane.b32.xlu0 %v6337_v20, %s8883_s1 }
 0xc1b   : > { %6343 = vrot.lane.b32.xlu1 %v6342_v1, %s8889_s11 }
 0xc1d   : > { %6348 = vrot.lane.b32.xlu0 %v6347_v8, %s8891_s10 }
 0xc1f   : > { %6353 = vrot.lane.b32.xlu1 %v6347_v8, %s8887_s15 }
 0xc21   : > { %2848 = vrot.lane.b32.xlu0 %v2797_v50, %s8883_s1 }
 0xc23   : > { %6358 = vrot.lane.b32.xlu1 %v6337_v20, %s8879_s18 }
 0xc25   : > { %6363 = vrot.lane.b32.xlu0 %v6342_v1, %s8881_s16 }
 0xc27   : > { %2814 = vrot.lane.b32.xlu1 %v2797_v50, %s8879_s18 }
 0xc29   : > { %2826 = vrot.lane.b32.xlu0 %v2810_v59, %s8881_s16 }
 0xc2b   : > { %6368 = vrot.lane.b32.xlu1 %v6337_v20, %s8874_s2 }
 0xc2d   : > { %6373 = vrot.lane.b32.xlu0 %v6342_v1, %s8885_s7 }
 0xc2f   : > { %2878 = vrot.lane.b32.xlu1 %v2797_v50, %s8874_s2 }
 0xc31   : > { %2888 = vrot.lane.b32.xlu0 %v2810_v59, %s8885_s7 }
 0xc33   : > { %2974 = vperm.xlu1 %6046, %v2971_v26  }
 0xc85   : > { %v2859_v14 = vpop.permute.xlu1 %2858  ;;  %v2869_v17 = vpop.permute.xlu0 %2868 }
 0xc89   : > { %v2839_v27 = vpop.permute.xlu1 %2838 }
 0xc8b   : > { %v6339_v19 = vpop.permute.xlu0 %6338 }
 0xc8c   : > { %v6341_v33 = vunpack.i.h.bf16 %v6339_v19  ;;  %v6340_v48 = vunpack.i.l.bf16 %v6339_v19 }
 0xc8d   : > { %v6344_v31 = vpop.permute.xlu1 %6343 }
 0xc8e   : > { %v6346_v25 = vunpack.i.h.bf16 %v6344_v31  ;;  %v6345_v32 = vunpack.i.l.bf16 %v6344_v31  ;;  %v2855_v29 = vsel %vm1085_vm10, %v6340_v48, %v6341_v33 }
 0xc8f   : > { %v6349_v34 = vpop.permute.xlu0 %6348 }
 0xc90   : > { %v6351_v44 = vunpack.i.h.bf16 %v6349_v34  ;;  %v6350_v18 = vunpack.i.l.bf16 %v6349_v34  ;;  %v2864_v51 = vsel %vm1096_vm7, %v2859_v14, %v6345_v32  ;;  %v2865_v22 = vsel %vm1096_vm7, %v6345_v32, %v6346_v25 }
 0xc91   : > { %v6354_v23 = vpop.permute.xlu1 %6353  ;;  %v7863_v14 = vpack.c.bf16 %v7802_v4, %v7726_v49 }
 0xc92   : > { %v2874_v38 = vsel %vm1107_vm8, %v2869_v17, %v6350_v18  ;;  %v2875_v45 = vsel %vm1107_vm8, %v6350_v18, %v6351_v44  ;;  %v6356_v24 = vunpack.i.h.bf16 %v6354_v23  ;;  %v6355_v56 = vunpack.i.l.bf16 %v6354_v23 }
 0xc93   : > { %v2849_v52 = vpop.permute.xlu0 %2848  ;;  %v7831_v40 = vpack.c.bf16 %v2875_v45, %v2865_v22  ;;  %v7833_v43 = vpack.c.bf16 %v2874_v38, %v2864_v51  ;;  %v7871_v17 = vpack.c.bf16 %v7788_v47, %v7729_v21  ;;  %v5722_v51 = vcombine.low %v7822_v63, %v7822_v63 }
 0xc94   : > { %v2845_v55 = vsel %vm1074_vm11, %v6355_v56, %v6356_v24  ;;  %v2844_v30 = vsel %vm1074_vm11, %v2839_v27, %v6355_v56  ;;  %v2854_v59 = vsel %vm1085_vm10, %v2849_v52, %v6340_v48 }
 0xc95   : > { %2986 = vmatprep.subr.bf16.mxu0 %v7831_v40  ;;  %3277 = vmatprep.subr.bf16.mxu1 %v7831_v40  ;;  %v6359_v61 = vpop.permute.xlu1 %6358  ;;  %v7843_v62 = vpack.c.bf16 %v2855_v29, %v2845_v55  ;;  %v7845_v60 = vpack.c.bf16 %v2854_v59, %v2844_v30 }
 0xc96   : > { %2987 = vmatpush1.bf16.msra.mxu0 %v7833_v43  ;;  %3278 = vmatpush1.bf16.msra.mxu1 %v7833_v43  ;;  %v6361_v15 = vunpack.i.h.bf16 %v6359_v61  ;;  %v6360_v35 = vunpack.i.l.bf16 %v6359_v61 }
 0xc97   : > { %v6364_v57 = vpop.permute.xlu0 %6363  ;;  %2988 = vmatprep.subr.bf16.mxu0 %v7843_v62  ;;  %3279 = vmatprep.subr.bf16.mxu1 %v7843_v62 }
 0xc98   : > { %v6366_v2 = vunpack.i.h.bf16 %v6364_v57  ;;  %v6365_v6 = vunpack.i.l.bf16 %v6364_v57  ;;  %v2821_v58 = vsel %vm1048_vm13, %v6360_v35, %v6361_v15 }
 0xc99   : > { %v2815_v5 = vpop.permute.xlu1 %2814 }
 0xc9a   : > { %v2833_v20 = vsel %vm1061_vm12, %v6365_v6, %v6366_v2  ;;  %2989 = vmatpush1.bf16.msra.mxu0 %v7845_v60  ;;  %3280 = vmatpush1.bf16.msra.mxu1 %v7845_v60  ;;  %v2820_v50 = vsel %vm1048_vm13, %v2815_v5, %v6360_v35 }
 0xc9b   : > { %v2827_v1 = vpop.permute.xlu0 %2826  ;;  %v7853_v8 = vpack.c.bf16 %v2833_v20, %v2821_v58 }
 0xc9c   : > { %v2832_v26 = vsel %vm1061_vm12, %v2827_v1, %v6365_v6 }
 0xc9d   : > { %v7857_v0 = vpack.c.bf16 %v2832_v26, %v2820_v50  ;;  %2990 = vmatprep.subr.bf16.mxu0 %v7853_v8  ;;  %3281 = vmatprep.subr.bf16.mxu1 %v7853_v8  ;;  %v6369_v21 = vpop.permute.xlu1 %6368 }
 0xc9e   : > { %v6371_v27 = vunpack.i.h.bf16 %v6369_v21  ;;  %v6370_v19 = vunpack.i.l.bf16 %v6369_v21 }
 0xc9f   : > { %2991 = vmatpush1.bf16.msra.mxu0 %v7857_v0  ;;  %3282 = vmatpush1.bf16.msra.mxu1 %v7857_v0  ;;  %v6374_v49 = vpop.permute.xlu0 %6373 }
 0xca0   : > { %2992 = vmatprep.subr.bf16.mxu0 %v7863_v14  ;;  %3283 = vmatprep.subr.bf16.mxu1 %v7863_v14  ;;  %v6376_v47 = vunpack.i.h.bf16 %v6374_v49  ;;  %v6375_v4 = vunpack.i.l.bf16 %v6374_v49  ;;  %v2885_v32 = vsel %vm1118_vm6, %v6370_v19, %v6371_v27 }
 0xca1   : > { %v2879_v34 = vpop.permute.xlu1 %2878 }
 0xca2   : > { %v2895_v31 = vsel %vm1129_vm5, %v6375_v4, %v6376_v47  ;;  %v2884_v44 = vsel %vm1118_vm6, %v2879_v34, %v6370_v19 }
 0xca3   : > { %5827 = vmatpush1.bf16.msk.msra.mxu0 %vm7296_vm3, %v7871_v17  ;;  %5835 = vmatpush1.bf16.msk.msra.mxu1 %vm7296_vm3, %v7871_v17  ;;  %v2889_v25 = vpop.permute.xlu0 %2888  ;;  %v7896_v48 = vpack.c.bf16 %v2895_v31, %v2885_v32 }
 0xca4   : > { %2994 = vmatprep.subr.bf16.mxu0 %v7744_v54  ;;  %3285 = vmatprep.subr.bf16.mxu1 %v7744_v54  ;;  %v2894_v33 = vsel %vm1129_vm5, %v2889_v25, %v6375_v4 }
 0xca5   : > { %v7906_v18 = vpack.c.bf16 %v2894_v33, %v2884_v44 }
 0xca7   : > { %2995 = vmatpush1.bf16.msra.mxu0 %v7742_v53  ;;  %3286 = vmatpush1.bf16.msra.mxu1 %v7742_v53 }
 0xca8   : > { %2996 = vmatprep.subr.bf16.mxu0 %v7748_v16  ;;  %3287 = vmatprep.subr.bf16.mxu1 %v7748_v16 }
 0xcab   : > { %2997 = vmatpush1.bf16.msra.mxu0 %v7754_v3  ;;  %3288 = vmatpush1.bf16.msra.mxu1 %v7754_v3 }
 0xcac   : > { %2998 = vmatprep.subr.bf16.mxu0 %v7763_v28  ;;  %3289 = vmatprep.subr.bf16.mxu1 %v7763_v28 }
 0xcae   : > { %v2975_v63 = vpop.permute.xlu1 %2974 }
 0xcaf   : > { %2999 = vmatpush1.bf16.msra.mxu0 %v7761_v39  ;;  %3290 = vmatpush1.bf16.msra.mxu1 %v7761_v39 }
 0xcb0   : > { %3000 = vmatprep.subr.bf16.mxu0 %v7770_v7  ;;  %3291 = vmatprep.subr.bf16.mxu1 %v7770_v7 }
 0xcb3   : > { %5831 = vmatpush1.bf16.msk.msra.mxu0 %vm7195_vm0, %v7773_v11  ;;  %5839 = vmatpush1.bf16.msk.msra.mxu1 %vm7195_vm0, %v7773_v11 }
 0xcb4   : > { %3016 = vmatprep.subr.bf16.mxu0 %v7896_v48 }
 0xcb7   : > { %3017 = vmatpush2.bf16.msra.mxu0 %v7906_v18 }
 0xcb8   : > { %3593 = vmatprep.subr.bf16.mxu0 %v7831_v40 }
 0xcba   : > { %3019 = vmatmul.mubr.bf16.vlgmr.msra.gmra.mxu0 %v5722_v51 }
 0xcbb   : > { %3594 = vmatpush1.bf16.msra.mxu0 %v7833_v43 }
 0xcbc   : > { %3595 = vmatprep.subr.bf16.mxu0 %v7843_v62 }
 0xcbf   : > { %3596 = vmatpush1.bf16.msra.mxu0 %v7845_v60 }
 0xcc0   : > { %3597 = vmatprep.subr.bf16.mxu0 %v7853_v8 }
 0xcc3   : > { %3598 = vmatpush1.bf16.msra.mxu0 %v7857_v0 }
 0xcc4   : > { %3599 = vmatprep.subr.bf16.mxu0 %v7863_v14 }
 0xcc7   : > { %5847 = vmatpush1.bf16.msk.msra.mxu0 %vm7296_vm3, %v7871_v17 }
 0xcc8   : > { %3601 = vmatprep.subr.bf16.mxu0 %v7744_v54 }
 0xccb   : > { %3602 = vmatpush1.bf16.msra.mxu0 %v7742_v53 }
 0xccc   : > { %3603 = vmatprep.subr.bf16.mxu0 %v7748_v16 }
 0xccf   : > { %3604 = vmatpush1.bf16.msra.mxu0 %v7754_v3 }
 0xcd0   : > { %3605 = vmatprep.subr.bf16.mxu0 %v7763_v28 }
 0xcd3   : > { %3606 = vmatpush1.bf16.msra.mxu0 %v7761_v39 }
 0xcd4   : > { %3607 = vmatprep.subr.bf16.mxu0 %v7770_v7 }
 0xcd7   : > { %5851 = vmatpush1.bf16.msk.msra.mxu0 %vm7195_vm0, %v7773_v11 }
 0xd7a   : > { %v3020_v22 = vpop.f32.mrf.mxu0 }
 0xd7b   : > { %v3021_v38 = vadd.f32 %v3020_v22, %v2975_v63 }
 0xd7c   : > { %v3022_v45 = vpop.f32.mrf.mxu0 }
 0xd7d   : > { %v3027_v23 = vmul.f32 0.2, %v3021_v38  ;;  %v3023_v24 = vadd.f32 %v3022_v45, %v2975_v63  ;;  %v7969_v45 = vld [vmem:[%s8919_s0] sm:$0xff]  ;;  %s8922_s0 = sld [smem:[#allocation8_spill]] }
 0xd7e   : > { %v3024_v56 = vpop.f32.mrf.mxu0 }
 0xd7f   : > { %v3029_v52 = vmax.f32 %v3021_v38, %v3027_v23  ;;  %v3028_v29 = vmul.f32 0.2, %v3023_v24  ;;  %v5726_v23 = vcombine.high %v7969_v45, %v7969_v45 }
 0xd80   : > { %v3025_v55 = vpop.f32.mrf.mxu0 }
 0xd81   : > { %v3030_v30 = vmax.f32 %v3023_v24, %v3028_v29  ;;  %v3031_v59 = vmul.f32 %v7088_v10, %v3029_v52  ;;  %v3056_v61 = vmul.f32 %v7086_v9, %v3029_v52  ;;  %5728 = vmatprep.mubr.msk.bf16.mxu1 %vm8878_vm14, %v5726_v23  ;;  %vm8924_vm14 = vcmask 261120  }
 0xd83   : > { %v3032_v15 = vmul.f32 %v7094_v13, %v3030_v30  ;;  %v3057_v35 = vmul.f32 %v7092_v12, %v3030_v30  ;;  %v6387_v6 = vpack.i.bf16 %v3030_v30, %v3029_v52 }
 0xd85   : > { %v6377_v57 = vpack.i.bf16 %v3057_v35, %v3056_v61  ;;  %v6382_v2 = vpack.i.bf16 %v3032_v15, %v3031_v59 }
 0xd87   : > { %6378 = vrot.lane.b32.xlu0 %v6377_v57, %s8876_s28  ;;  %6383 = vrot.lane.b32.xlu1 %v6382_v2, %s8876_s28 }
 0xd8b   : > { %6388 = vrot.lane.b32.xlu0 %v6387_v6, %s8876_s28 }
 0xdf9   : > { %v6379_v58 = vpop.permute.xlu0 %6378  ;;  %v6384_v20 = vpop.permute.xlu1 %6383 }
 0xdfa   : > { %v7938_v26 = vunpack.i.l.bf16 %v6384_v20  ;;  %v6381_v27 = vunpack.i.h.bf16 %v6379_v58  ;;  %v6380_v19 = vunpack.i.l.bf16 %v6379_v58  ;;  %v6386_v25 = vunpack.i.h.bf16 %v6384_v20 }
 0xdfc   : > { %v3043_v31 = vsel %vm1009_vm4, 0.0, %v7938_v26  ;;  %v3068_v32 = vsel %vm1009_vm4, %v6381_v27, 0.0  ;;  %v3064_v34 = vsel %vm1009_vm4, %v6380_v19, %v6381_v27  ;;  %v3067_v33 = vsel %vm1009_vm4, 0.0, %v6380_v19 }
 0xdfd   : > { %v6389_v5 = vpop.permute.xlu0 %6388  ;;  %v6402_v44 = vpack.i.bf16 %v3064_v34, %v3067_v33  ;;  %v3044_v51 = vsel %vm1009_vm4, %v6386_v25, 0.0  ;;  %v7957_v63 = vsel %vm1009_vm4, %v7938_v26, %v6386_v25  ;;  %v6412_v38 = vpack.i.bf16 %v3068_v32, %v3064_v34 }
 0xdfe   : > { %v6391_v1 = vunpack.i.h.bf16 %v6389_v5  ;;  %v6390_v50 = vunpack.i.l.bf16 %v6389_v5  ;;  %v6407_v22 = vpack.i.bf16 %v3044_v51, %v7957_v63 }
 0xe00   : > { %v3055_v49 = vsel %vm1009_vm4, %v6391_v1, 0.0  ;;  %v3051_v21 = vsel %vm1009_vm4, %v6390_v50, %v6391_v1  ;;  %v3054_v47 = vsel %vm1009_vm4, 0.0, %v6390_v50 }
 0xe01   : > { %3135 = vrot.lane.b32.xlu0 %v3054_v47, %s8874_s2  ;;  %3105 = vrot.lane.b32.xlu1 %v3054_v47, %s8883_s1  ;;  %v6392_v4 = vpack.i.bf16 %v3055_v49, %v3051_v21 }
 0xe05   : > { %6393 = vrot.lane.b32.xlu0 %v6392_v4, %s8874_s2  ;;  %3125 = vrot.lane.b32.xlu1 %v3043_v31, %s8891_s10  ;;  %s8920_s2 = sld [smem:[#allocation6_spill]] }
 0xe09   : > { %3149 = vrot.lane.b32.xlu0 %v3068_v32, %s8885_s7  ;;  %6398 = vrot.lane.b32.xlu1 %v6392_v4, %s8883_s1 }
 0xe0b   : > { %v3256_v24 = vld [vmem:[%s8920_s2] sm:$0xff]  ;;  %s8921_s2 = sld [smem:[#allocation7_spill]] }
 0xe0d   : > { %3115 = vrot.lane.b32.xlu0 %v3067_v33, %s8889_s11  ;;  %6403 = vrot.lane.b32.xlu1 %v6402_v44, %s8885_s7 }
 0xe11   : > { %6413 = vrot.lane.b32.xlu0 %v6412_v38, %s8889_s11  ;;  %6408 = vrot.lane.b32.xlu1 %v6407_v22, %s8891_s10 }
 0xe15   : > { %6423 = vrot.lane.b32.xlu0 %v6407_v22, %s8887_s15  ;;  %3083 = vrot.lane.b32.xlu1 %v3067_v33, %s8881_s16 }
 0xe19   : > { %3095 = vrot.lane.b32.xlu0 %v3043_v31, %s8887_s15  ;;  %6418 = vrot.lane.b32.xlu1 %v6412_v38, %s8881_s16 }
 0xe1d   : > { %3071 = vrot.lane.b32.xlu0 %v3054_v47, %s8879_s18  ;;  %6428 = vrot.lane.b32.xlu1 %v6392_v4, %s8879_s18 }
 0xe21   : > { %3259 = vperm.xlu1 %6046, %v3256_v24  }
 0xe73   : > { %v3136_v56 = vpop.permute.xlu0 %3135  ;;  %v3106_v52 = vpop.permute.xlu1 %3105 }
 0xe77   : > { %v6394_v29 = vpop.permute.xlu0 %6393  ;;  %v3126_v55 = vpop.permute.xlu1 %3125 }
 0xe78   : > { %v6395_v2 = vunpack.i.l.bf16 %v6394_v29  ;;  %v6396_v6 = vunpack.i.h.bf16 %v6394_v29 }
 0xe7a   : > { %v3141_v25 = vsel %vm1118_vm6, %v3136_v56, %v6395_v2  ;;  %v3142_v44 = vsel %vm1118_vm6, %v6395_v2, %v6396_v6 }
 0xe7b   : > { %v3150_v30 = vpop.permute.xlu0 %3149  ;;  %v6399_v59 = vpop.permute.xlu1 %6398 }
 0xe7c   : > { %v6401_v5 = vunpack.i.h.bf16 %v6399_v59  ;;  %v6400_v1 = vunpack.i.l.bf16 %v6399_v59 }
 0xe7e   : > { %v3112_v56 = vsel %vm1085_vm10, %v6400_v1, %v6401_v5 }
 0xe7f   : > { %v3116_v61 = vpop.permute.xlu0 %3115  ;;  %v6404_v15 = vpop.permute.xlu1 %6403 }
 0xe80   : > { %v6406_v35 = vunpack.i.h.bf16 %v6404_v15  ;;  %v6405_v57 = vunpack.i.l.bf16 %v6404_v15  ;;  %v3111_v15 = vsel %vm1085_vm10, %v3106_v52, %v6400_v1 }
 0xe82   : > { %v7978_v58 = vsel %vm1129_vm5, %v6406_v35, %v3150_v30  ;;  %v7981_v20 = vsel %vm1129_vm5, %v6405_v57, %v6406_v35 }
 0xe83   : > { %v6414_v50 = vpop.permute.xlu0 %6413  ;;  %v6409_v49 = vpop.permute.xlu1 %6408  ;;  %v3254_v21 = vpack.c.bf16 %v7978_v58, %v7978_v58  ;;  %v3253_v47 = vpack.c.bf16 %v7981_v20, %v7981_v20 }
 0xe84   : > { %v6416_v4 = vunpack.i.h.bf16 %v6414_v50  ;;  %v6415_v27 = vunpack.i.l.bf16 %v6414_v50  ;;  %v6411_v19 = vunpack.i.h.bf16 %v6409_v49  ;;  %v6410_v31 = vunpack.i.l.bf16 %v6409_v49 }
 0xe85   : > { %5727 = vmatprep.subr.msk.bf16.mxu1 %vm1191_vm9, %v3254_v21  ;;  %v3272_v32 = vsel %vm1191_vm9, %v3253_v47, 0 }
 0xe86   : > { %v3131_v34 = vsel %vm1107_vm8, %v3126_v55, %v6410_v31  ;;  %3298 = vmatpush2.bf16.msra.mxu1 %v3272_v32  ;;  %v3132_v33 = vsel %vm1107_vm8, %v6410_v31, %v6411_v19  ;;  %v3122_v51 = vsel %vm1096_vm7, %v6415_v27, %v6416_v4  ;;  %v3121_v29 = vsel %vm1096_vm7, %v3116_v61, %v6415_v27 }
 0xe87   : > { %v6424_v22 = vpop.permute.xlu0 %6423  ;;  %v3084_v38 = vpop.permute.xlu1 %3083  ;;  %v7994_v23 = vpack.c.bf16 %v3142_v44, %v3132_v33  ;;  %v7996_v24 = vpack.c.bf16 %v3141_v25, %v3131_v34  ;;  %v8001_v55 = vpack.c.bf16 %v3122_v51, %v3112_v56  ;;  %v8006_v50 = vpack.c.bf16 %v3121_v29, %v3111_v15 }
 0xe88   : > { %v6426_v30 = vunpack.i.h.bf16 %v6424_v22  ;;  %v6425_v59 = vunpack.i.l.bf16 %v6424_v22  ;;  %v5725_v33 = vcombine.low %v7969_v45, %v7969_v45 }
 0xe89   : > { %3299 = vmatprep.subr.bf16.mxu1 %v7994_v23 }
 0xe8a   : > { %3300 = vmatpush2.bf16.msra.mxu1 %v7996_v24  ;;  %v3102_v21 = vsel %vm1074_vm11, %v6425_v59, %v6426_v30 }
 0xe8b   : > { %v3096_v35 = vpop.permute.xlu0 %3095  ;;  %v6419_v57 = vpop.permute.xlu1 %6418  ;;  %3301 = vmatprep.subr.bf16.mxu1 %v8001_v55 }
 0xe8c   : > { %v6421_v2 = vunpack.i.h.bf16 %v6419_v57  ;;  %v6420_v6 = vunpack.i.l.bf16 %v6419_v57  ;;  %v3101_v61 = vsel %vm1074_vm11, %v3096_v35, %v6425_v59 }
 0xe8e   : > { %v3089_v5 = vsel %vm1061_vm12, %v3084_v38, %v6420_v6  ;;  %3302 = vmatpush2.bf16.msra.mxu1 %v8006_v50  ;;  %v3090_v49 = vsel %vm1061_vm12, %v6420_v6, %v6421_v2 }
 0xe8f   : > { %v6429_v47 = vpop.permute.xlu1 %6428  ;;  %v8013_v52 = vpack.c.bf16 %v3102_v21, %v3090_v49  ;;  %v8015_v1 = vpack.c.bf16 %v3101_v61, %v3089_v5  ;;  %v3072_v19 = vpop.permute.xlu0 %3071 }
 0xe90   : > { %v6431_v4 = vunpack.i.h.bf16 %v6429_v47  ;;  %v6430_v27 = vunpack.i.l.bf16 %v6429_v47 }
 0xe91   : > { %3303 = vmatprep.subr.bf16.mxu1 %v8013_v52 }
 0xe92   : > { %v3077_v31 = vsel %vm1048_vm13, %v3072_v19, %v6430_v27  ;;  %3304 = vmatpush2.bf16.msra.mxu1 %v8015_v1  ;;  %v3078_v25 = vsel %vm1048_vm13, %v6430_v27, %v6431_v4 }
 0xe93   : > { %v8022_v32 = vpack.c.bf16 %v3077_v31, %v7938_v26  ;;  %v8025_v34 = vpack.c.bf16 %v3078_v25, %v7957_v63 }
 0xe95   : > { %3305 = vmatprep.subr.bf16.mxu1 %v8025_v34 }
 0xe96   : > { %5843 = vmatpush2.bf16.msk.msra.mxu1 %vm7195_vm0, %v8022_v32 }
 0xe97   : > { %3307 = vmatprep.subr.bf16.mxu1 %v7896_v48 }
 0xe9a   : > { %3308 = vmatpush2.bf16.msra.mxu1 %v7906_v18 }
 0xe9c   : > { %v3260_v26 = vpop.permute.xlu1 %3259 }
 0xe9d   : > { %3310 = vmatmul.mubr.bf16.vlgmr.msra.gmra.mxu1 %v5725_v33 }
 0xe9e   : > { %3666 = vmatprep.mubr.bf16.mxu1 %v6900_v41 }
 0xf5d   : > { %v3311_v44 = vpop.f32.mrf.mxu1 }
 0xf5e   : > { %v3312_v63 = vadd.f32 %v3311_v44, %v3260_v26 }
 0xf5f   : > { %v3313_v51 = vpop.f32.mrf.mxu1 }
 0xf60   : > { %v3318_v22 = vmul.f32 0.2, %v3312_v63  ;;  %v3314_v38 = vadd.f32 %v3313_v51, %v3260_v26 }
 0xf61   : > { %v3315_v56 = vpop.f32.mrf.mxu1 }
 0xf62   : > { %v3320_v29 = vmax.f32 %v3312_v63, %v3318_v22  ;;  %v3319_v30 = vmul.f32 0.2, %v3314_v38 }
 0xf63   : > { %v3316_v59 = vpop.f32.mrf.mxu1 }
 0xf64   : > { %v3321_v15 = vmax.f32 %v3314_v38, %v3319_v30  ;;  %v3322_v35 = vmul.f32 %v7088_v10, %v3320_v29  ;;  %v3347_v61 = vmul.f32 %v7086_v9, %v3320_v29 }
 0xf66   : > { %v3323_v45 = vmul.f32 %v7094_v13, %v3321_v15  ;;  %v6432_v57 = vpack.i.bf16 %v3321_v15, %v3320_v29  ;;  %v3348_v2 = vmul.f32 %v7092_v12, %v3321_v15 }
 0xf68   : > { %6433 = vrot.lane.b32.xlu1 %v6432_v57, %s8876_s28  ;;  %v6437_v6 = vpack.i.bf16 %v3323_v45, %v3322_v35  ;;  %v6442_v5 = vpack.i.bf16 %v3348_v2, %v3347_v61  ;;  %v8075_v45 = vld [vmem:[%s8921_s2] sm:$0xff] }
 0xf69   : > { %v5730_v57 = vcombine.high %v8075_v45, %v8075_v45  ;;  %v3574_v2 = vld [vmem:[%s8922_s0] sm:$0xff]  ;;  %s8925_s0 = sld [smem:[#allocation9_spill]] }
 0xf6a   : > { %6438 = vrot.lane.b32.xlu0 %v6437_v6, %s8876_s28 }
 0xf6b   : > { %3625 = vmatprep.mubr.bf16.mxu0 %v5730_v57 }
 0xf6e   : > { %6443 = vrot.lane.b32.xlu0 %v6442_v5, %s8876_s28  ;;  %s8923_s28 = smov 95  }
 0xfda   : > { %v6434_v49 = vpop.permute.xlu1 %6433 }
 0xfdb   : > { %v6436_v21 = vunpack.i.h.bf16 %v6434_v49  ;;  %v6435_v47 = vunpack.i.l.bf16 %v6434_v49 }
 0xfdc   : > { %v6439_v4 = vpop.permute.xlu0 %6438 }
 0xfdd   : > { %v6441_v27 = vunpack.i.h.bf16 %v6439_v4  ;;  %v8043_v19 = vunpack.i.l.bf16 %v6439_v4  ;;  %v3346_v31 = vsel %vm1009_vm4, %v6436_v21, 0.0  ;;  %v3342_v25 = vsel %vm1009_vm4, %v6435_v47, %v6436_v21 }
 0xfde   : > { %v3345_v33 = vsel %vm1009_vm4, 0.0, %v6435_v47  ;;  %v6447_v56 = vpack.i.bf16 %v3346_v31, %v3342_v25 }
 0xfdf   : > { %v3335_v26 = vsel %vm1009_vm4, %v6441_v27, 0.0  ;;  %v8051_v44 = vsel %vm1009_vm4, %v8043_v19, %v6441_v27  ;;  %3396 = vrot.lane.b32.xlu0 %v3345_v33, %s8883_s1  ;;  %v3334_v63 = vsel %vm1009_vm4, 0.0, %v8043_v19 }
 0xfe0   : > { %v6444_v51 = vpop.permute.xlu0 %6443  ;;  %3386 = vrot.lane.b32.xlu1 %v3334_v63, %s8887_s15  ;;  %v6452_v29 = vpack.i.bf16 %v3335_v26, %v8051_v44 }
 0xfe1   : > { %v6446_v22 = vunpack.i.h.bf16 %v6444_v51  ;;  %v6445_v38 = vunpack.i.l.bf16 %v6444_v51 }
 0xfe3   : > { %v3359_v30 = vsel %vm1009_vm4, %v6446_v22, 0.0  ;;  %v3355_v59 = vsel %vm1009_vm4, %v6445_v38, %v6446_v22  ;;  %6448 = vrot.lane.b32.xlu0 %v6447_v56, %s8883_s1  ;;  %v3358_v35 = vsel %vm1009_vm4, 0.0, %v6445_v38 }
 0xfe4   : > { %6453 = vrot.lane.b32.xlu1 %v6452_v29, %s8887_s15  ;;  %v6462_v15 = vpack.i.bf16 %v3359_v30, %v3355_v59 }
 0xfe7   : > { %6463 = vrot.lane.b32.xlu0 %v6462_v15, %s8881_s16 }
 0xfe8   : > { %6458 = vrot.lane.b32.xlu1 %v6447_v56, %s8879_s18 }
 0xfeb   : > { %3374 = vrot.lane.b32.xlu0 %v3358_v35, %s8881_s16  ;;  %s8927_s16 = sld [smem:[#allocation10_spill]] }
 0xfec   : > { %3362 = vrot.lane.b32.xlu1 %v3345_v33, %s8879_s18  ;;  %s8926_s18 = smov 17  }
 0xfef   : > { %3436 = vrot.lane.b32.xlu0 %v3358_v35, %s8885_s7 }
 0xff0   : > { %6468 = vrot.lane.b32.xlu1 %v6447_v56, %s8923_s28 }
 0xff3   : > { %6473 = vrot.lane.b32.xlu0 %v6462_v15, %s8885_s7 }
 0xff4   : > { %3426 = vrot.lane.b32.xlu1 %v3345_v33, %s8923_s28 }
 0xff7   : > { %6483 = vrot.lane.b32.xlu0 %v6452_v29, %s8891_s10 }
 0xff8   : > { %6478 = vrot.lane.b32.xlu1 %v6462_v15, %s8889_s11 }
 0xffb   : > { %3416 = vrot.lane.b32.xlu0 %v3334_v63, %s8891_s10 }
 0xffc   : > { %3406 = vrot.lane.b32.xlu1 %v3358_v35, %s8889_s11 }
0x1000   : > { %3577 = vperm.xlu1 %6046, %v3574_v2  }
0x1051   : > { %v3397_v6 = vpop.permute.xlu0 %3396 }
0x1052   : > { %v3387_v61 = vpop.permute.xlu1 %3386 }
0x1055   : > { %v6449_v5 = vpop.permute.xlu0 %6448 }
0x1056   : > { %v6451_v49 = vunpack.i.h.bf16 %v6449_v5  ;;  %v6450_v21 = vunpack.i.l.bf16 %v6449_v5  ;;  %v6454_v47 = vpop.permute.xlu1 %6453 }
0x1057   : > { %v6456_v4 = vunpack.i.h.bf16 %v6454_v47  ;;  %v6455_v27 = vunpack.i.l.bf16 %v6454_v47  ;;  %v8102_v47 = vpack.c.bf16 %v8051_v44, %v7978_v58 }
0x1058   : > { %v3402_v31 = vsel %vm1085_vm10, %v3397_v6, %v6450_v21  ;;  %v3403_v63 = vsel %vm1085_vm10, %v6450_v21, %v6451_v49 }
0x1059   : > { %v3392_v25 = vsel %vm1074_vm11, %v3387_v61, %v6455_v27  ;;  %v6464_v33 = vpop.permute.xlu0 %6463  ;;  %v3393_v26 = vsel %vm1074_vm11, %v6455_v27, %v6456_v4  ;;  %v8108_v27 = vpack.c.bf16 %v8043_v19, %v7981_v20 }
0x105a   : > { %v6466_v51 = vunpack.i.h.bf16 %v6464_v33  ;;  %v6465_v22 = vunpack.i.l.bf16 %v6464_v33  ;;  %v6459_v38 = vpop.permute.xlu1 %6458  ;;  %v8085_v56 = vpack.c.bf16 %v3403_v63, %v3393_v26  ;;  %v8087_v29 = vpack.c.bf16 %v3402_v31, %v3392_v25 }
0x105b   : > { %v6461_v30 = vunpack.i.h.bf16 %v6459_v38  ;;  %v6460_v59 = vunpack.i.l.bf16 %v6459_v38 }
0x105c   : > { %3609 = vmatprep.subr.bf16.mxu0 %v8085_v56  ;;  %v3381_v57 = vsel %vm1061_vm12, %v6465_v22, %v6466_v51 }
0x105d   : > { %v3375_v15 = vpop.permute.xlu0 %3374  ;;  %3610 = vmatpush2.bf16.msra.mxu0 %v8087_v29  ;;  %v3369_v35 = vsel %vm1048_vm13, %v6460_v59, %v6461_v30 }
0x105e   : > { %v3363_v2 = vpop.permute.xlu1 %3362  ;;  %v8093_v6 = vpack.c.bf16 %v3381_v57, %v3369_v35  ;;  %v3380_v61 = vsel %vm1061_vm12, %v3375_v15, %v6465_v22 }
0x105f   : > { %v3368_v5 = vsel %vm1048_vm13, %v3363_v2, %v6460_v59 }
0x1060   : > { %v8097_v49 = vpack.c.bf16 %v3380_v61, %v3368_v5  ;;  %3611 = vmatprep.subr.bf16.mxu0 %v8093_v6 }
0x1061   : > { %v3437_v21 = vpop.permute.xlu0 %3436 }
0x1062   : > { %v6469_v4 = vpop.permute.xlu1 %6468  ;;  %3612 = vmatpush2.bf16.msra.mxu0 %v8097_v49 }
0x1063   : > { %3613 = vmatprep.subr.bf16.mxu0 %v8102_v47  ;;  %v6471_v31 = vunpack.i.h.bf16 %v6469_v4  ;;  %v6470_v25 = vunpack.i.l.bf16 %v6469_v4 }
0x1065   : > { %v6474_v33 = vpop.permute.xlu0 %6473  ;;  %v3433_v22 = vsel %vm1118_vm6, %v6470_v25, %v6471_v31 }
0x1066   : > { %v6476_v26 = vunpack.i.h.bf16 %v6474_v33  ;;  %v6475_v63 = vunpack.i.l.bf16 %v6474_v33  ;;  %v3427_v51 = vpop.permute.xlu1 %3426  ;;  %5855 = vmatpush2.bf16.msk.msra.mxu0 %vm7296_vm3, %v8108_v27 }
0x1067   : > { %v3432_v58 = vsel %vm1118_vm6, %v3427_v51, %v6470_v25  ;;  %3615 = vmatprep.subr.bf16.mxu0 %v7994_v23  ;;  %v5729_v51 = vcombine.low %v8075_v45, %v8075_v45 }
0x1068   : > { %v3442_v44 = vsel %vm1129_vm5, %v3437_v21, %v6475_v63  ;;  %v3443_v20 = vsel %vm1129_vm5, %v6475_v63, %v6476_v26  ;;  %v6832_v63 = vld [vmem:[%s8921_s2 + $0x8] ss:$0 sps:$4 sm:$0xff]   ;;  %s8935_s2 = smov 112  }
0x1069   : > { %v8118_v19 = vpack.c.bf16 %v3442_v44, %v3432_v58  ;;  %v6484_v38 = vpop.permute.xlu0 %6483  ;;  %v8120_v30 = vpack.c.bf16 %v3443_v20, %v3433_v22 }
0x106a   : > { %v6486_v59 = vunpack.i.h.bf16 %v6484_v38  ;;  %v6485_v15 = vunpack.i.l.bf16 %v6484_v38  ;;  %v6479_v35 = vpop.permute.xlu1 %6478  ;;  %3616 = vmatpush2.bf16.msra.mxu0 %v7996_v24 }
0x106b   : > { %v6481_v57 = vunpack.i.h.bf16 %v6479_v35  ;;  %v6480_v2 = vunpack.i.l.bf16 %v6479_v35  ;;  %3646 = vmatprep.subr.bf16.mxu1 %v8120_v30  ;;  %3617 = vmatprep.subr.bf16.mxu0 %v8001_v55 }
0x106c   : > { %3647 = vmatpush1.bf16.msra.mxu1 %v8118_v19  ;;  %v3423_v21 = vsel %vm1107_vm8, %v6485_v15, %v6486_v59 }
0x106d   : > { %v3417_v61 = vpop.permute.xlu0 %3416  ;;  %v3413_v5 = vsel %vm1096_vm7, %v6480_v2, %v6481_v57 }
0x106e   : > { %v3407_v4 = vpop.permute.xlu1 %3406  ;;  %3618 = vmatpush2.bf16.msra.mxu0 %v8006_v50  ;;  %v8129_v31 = vpack.c.bf16 %v3423_v21, %v3413_v5  ;;  %v3422_v25 = vsel %vm1107_vm8, %v3417_v61, %v6485_v15 }
0x106f   : > { %v3412_v33 = vsel %vm1096_vm7, %v3407_v4, %v6480_v2  ;;  %3619 = vmatprep.subr.bf16.mxu0 %v8013_v52 }
0x1070   : > { %v8134_v26 = vpack.c.bf16 %v3422_v25, %v3412_v33  ;;  %3648 = vmatprep.subr.bf16.mxu1 %v8129_v31 }
0x1072   : > { %3620 = vmatpush2.bf16.msra.mxu0 %v8015_v1  ;;  %3649 = vmatpush1.bf16.msra.mxu1 %v8134_v26 }
0x1073   : > { %3621 = vmatprep.subr.bf16.mxu0 %v8025_v34  ;;  %3984 = vmatprep.subr.bf16.mxu1 %v7831_v40 }
0x1075   : > { %5732 = vmatmul.mubr.msk.bf16.vlgmr.msra.gmra.mxu1 %vm8924_vm14, %v6832_v63 }
0x1076   : > { %5859 = vmatpush2.bf16.msk.msra.mxu0 %vm7195_vm0, %v8022_v32  ;;  %3985 = vmatpush1.bf16.msra.mxu1 %v7833_v43 }
0x1077   : > { %3623 = vmatprep.subr.bf16.mxu0 %v7896_v48  ;;  %3986 = vmatprep.subr.bf16.mxu1 %v7843_v62 }
0x107a   : > { %3624 = vmatpush2.bf16.msra.mxu0 %v7906_v18  ;;  %3987 = vmatpush1.bf16.msra.mxu1 %v7845_v60 }
0x107b   : > { %3988 = vmatprep.subr.bf16.mxu1 %v7853_v8 }
0x107d   : > { %3626 = vmatmul.mubr.bf16.vlgmr.msra.gmra.mxu0 %v5729_v51 }
0x107e   : > { %3989 = vmatpush1.bf16.msra.mxu1 %v7857_v0  ;;  %4057 = vmatprep.mubr.bf16.mxu0 %v6900_v41 }
0x107f   : > { %3990 = vmatprep.subr.bf16.mxu1 %v7863_v14 }
0x1082   : > { %5863 = vmatpush1.bf16.msk.msra.mxu1 %vm7296_vm3, %v7871_v17 }
0x1083   : > { %3992 = vmatprep.subr.bf16.mxu1 %v7744_v54 }
0x1086   : > { %3993 = vmatpush1.bf16.msra.mxu1 %v7742_v53  ;;  %v3957_v53 = vld [vmem:[%s8925_s0] sm:$0xff] }
0x1087   : > { %3994 = vmatprep.subr.bf16.mxu1 %v7748_v16  ;;  %v5733_v54 = vcombine.low %v3957_v53, %v3957_v53  ;;  %v5734_v16 = vcombine.high %v3957_v53, %v3957_v53 }
0x1089   : > { %4016 = vmatprep.mubr.bf16.mxu1 %v5734_v16 }
0x108a   : > { %3995 = vmatpush1.bf16.msra.mxu1 %v7754_v3 }
0x108b   : > { %3996 = vmatprep.subr.bf16.mxu1 %v7763_v28 }
0x108e   : > { %3997 = vmatpush1.bf16.msra.mxu1 %v7761_v39 }
0x108f   : > { %3998 = vmatprep.subr.bf16.mxu1 %v7770_v7 }
0x1092   : > { %5867 = vmatpush1.bf16.msk.msra.mxu1 %vm7195_vm0, %v7773_v11  ;;  %v3578_v11 = vpop.permute.xlu1 %3577 }
0x1093   : > { %4000 = vmatprep.subr.bf16.mxu1 %v8085_v56 }
0x1096   : > { %4001 = vmatpush2.bf16.msra.mxu1 %v8087_v29 }
0x1097   : > { %4002 = vmatprep.subr.bf16.mxu1 %v8093_v6 }
0x109a   : > { %4003 = vmatpush2.bf16.msra.mxu1 %v8097_v49 }
0x109b   : > { %4004 = vmatprep.subr.bf16.mxu1 %v8102_v47 }
0x109e   : > { %5871 = vmatpush2.bf16.msk.msra.mxu1 %vm7296_vm3, %v8108_v27 }
0x109f   : > { %4006 = vmatprep.subr.bf16.mxu1 %v7994_v23 }
0x10a2   : > { %4007 = vmatpush2.bf16.msra.mxu1 %v7996_v24 }
0x10a3   : > { %4008 = vmatprep.subr.bf16.mxu1 %v8001_v55 }
0x10a6   : > { %4009 = vmatpush2.bf16.msra.mxu1 %v8006_v50 }
0x10a7   : > { %4010 = vmatprep.subr.bf16.mxu1 %v8013_v52 }
0x10aa   : > { %4011 = vmatpush2.bf16.msra.mxu1 %v8015_v1 }
0x10ab   : > { %4012 = vmatprep.subr.bf16.mxu1 %v8025_v34 }
0x10ae   : > { %5875 = vmatpush2.bf16.msk.msra.mxu1 %vm7195_vm0, %v8022_v32 }
0x10af   : > { %4014 = vmatprep.subr.bf16.mxu1 %v7896_v48 }
0x10b2   : > { %4015 = vmatpush2.bf16.msra.mxu1 %v7906_v18 }
0x10b5   : > { %4017 = vmatmul.mubr.bf16.vlgmr.msra.gmra.mxu1 %v5733_v54  ;;  %v3959_v54 = vld [vmem:[%s8927_s16] sm:$0xff]  ;;  %s8930_s16 = smov 111  }
0x1135   : > { %v3668_v3 = vpop.f32.mrf.mxu1 }
0x1137   : > { %v3670_v39 = vpop.f32.mrf.mxu1 }
0x1139   : > { %v3672_v28 = vpop.f32.mrf.mxu1 }
0x113b   : > { %v3673_v7 = vpop.f32.mrf.mxu1 }
0x113d   : > { %v3627_v40 = vpop.f32.mrf.mxu0 }
0x113e   : > { %v3628_v43 = vadd.f32 %v3627_v40, %v3578_v11 }
0x113f   : > { %v3629_v62 = vpop.f32.mrf.mxu0 }
0x1140   : > { %v3669_v60 = vadd.f32 %v3668_v3, %v3628_v43  ;;  %v3630_v8 = vadd.f32 %v3629_v62, %v3578_v11 }
0x1141   : > { %v3631_v0 = vpop.f32.mrf.mxu0 }
0x1142   : > { %v3675_v14 = vmul.f32 0.2, %v3669_v60  ;;  %v3671_v17 = vadd.f32 %v3670_v39, %v3630_v8 }
0x1143   : > { %v3632_v48 = vpop.f32.mrf.mxu0 }
0x1144   : > { %v3677_v18 = vmax.f32 %v3669_v60, %v3675_v14  ;;  %v3676_v23 = vmul.f32 0.2, %v3671_v17 }
0x1146   : > { %v3678_v24 = vmax.f32 %v3671_v17, %v3676_v23  ;;  %v3679_v55 = vmul.f32 %v7088_v10, %v3677_v18  ;;  %v3704_v50 = vmul.f32 %v7086_v9, %v3677_v18 }
0x1148   : > { %v3680_v52 = vmul.f32 %v7094_v13, %v3678_v24  ;;  %v3705_v1 = vmul.f32 %v7092_v12, %v3678_v24  ;;  %v6497_v45 = vpack.i.bf16 %v3678_v24, %v3677_v18 }
0x114a   : > { %v6487_v32 = vpack.i.bf16 %v3705_v1, %v3704_v50  ;;  %v6492_v34 = vpack.i.bf16 %v3680_v52, %v3679_v55 }
0x114c   : > { %6488 = vrot.lane.b32.xlu0 %v6487_v32, %s8926_s18  ;;  %6493 = vrot.lane.b32.xlu1 %v6492_v34, %s8926_s18 }
0x1150   : > { %6498 = vrot.lane.b32.xlu0 %v6497_v45, %s8926_s18 }
0x1175   : > { %v8226_v63 = vpop.f32.mrf.mxu1 }
0x1177   : > { %v8230_v51 = vpop.f32.mrf.mxu1 }
0x1179   : > { %v4022_v53 = vpop.f32.mrf.mxu1 }
0x117b   : > { %v4023_v16 = vpop.f32.mrf.mxu1 }
0x11be   : > { %v6489_v56 = vpop.permute.xlu0 %6488  ;;  %v6494_v29 = vpop.permute.xlu1 %6493 }
0x11bf   : > { %v8198_v27 = vunpack.i.l.bf16 %v6494_v29  ;;  %v6491_v38 = vunpack.i.h.bf16 %v6489_v56  ;;  %v6490_v59 = vunpack.i.l.bf16 %v6489_v56  ;;  %v6496_v35 = vunpack.i.h.bf16 %v6494_v29 }
0x11c1   : > { %v3691_v15 = vsel %vm1009_vm4, 0.0, %v8198_v27  ;;  %v3716_v57 = vsel %vm1009_vm4, %v6491_v38, 0.0  ;;  %v3712_v2 = vsel %vm1009_vm4, %v6490_v59, %v6491_v38  ;;  %v3715_v61 = vsel %vm1009_vm4, 0.0, %v6490_v59 }
0x11c2   : > { %v6499_v6 = vpop.permute.xlu0 %6498  ;;  %v6512_v5 = vpack.i.bf16 %v3712_v2, %v3715_v61  ;;  %v3692_v21 = vsel %vm1009_vm4, %v6496_v35, 0.0  ;;  %v8217_v4 = vsel %vm1009_vm4, %v8198_v27, %v6496_v35  ;;  %v6522_v33 = vpack.i.bf16 %v3716_v57, %v3712_v2 }
0x11c3   : > { %v6501_v49 = vunpack.i.h.bf16 %v6499_v6  ;;  %v6500_v47 = vunpack.i.l.bf16 %v6499_v6  ;;  %v6517_v25 = vpack.i.bf16 %v3692_v21, %v8217_v4 }
0x11c5   : > { %v3703_v58 = vsel %vm1009_vm4, %v6501_v49, 0.0  ;;  %v3699_v44 = vsel %vm1009_vm4, %v6500_v47, %v6501_v49  ;;  %v3702_v22 = vsel %vm1009_vm4, 0.0, %v6500_v47 }
0x11c6   : > { %3783 = vrot.lane.b32.xlu0 %v3702_v22, %s8923_s28  ;;  %3753 = vrot.lane.b32.xlu1 %v3702_v22, %s8883_s1  ;;  %v6502_v20 = vpack.i.bf16 %v3703_v58, %v3699_v44 }
0x11ca   : > { %6503 = vrot.lane.b32.xlu0 %v6502_v20, %s8923_s28  ;;  %3773 = vrot.lane.b32.xlu1 %v3691_v15, %s8891_s10 }
0x11ce   : > { %3797 = vrot.lane.b32.xlu0 %v3716_v57, %s8885_s7  ;;  %6508 = vrot.lane.b32.xlu1 %v6502_v20, %s8883_s1  ;;  %s8928_s1 = smov 126  }
0x11d2   : > { %3763 = vrot.lane.b32.xlu0 %v3715_v61, %s8889_s11  ;;  %6513 = vrot.lane.b32.xlu1 %v6512_v5, %s8885_s7  ;;  %s8929_s7 = smov 127  }
0x11d6   : > { %6523 = vrot.lane.b32.xlu0 %v6522_v33, %s8889_s11  ;;  %6518 = vrot.lane.b32.xlu1 %v6517_v25, %s8891_s10  ;;  %s8932_s11 = sld [smem:[#allocation12_spill]] }
0x11da   : > { %6533 = vrot.lane.b32.xlu0 %v6517_v25, %s8887_s15  ;;  %3731 = vrot.lane.b32.xlu1 %v3715_v61, %s8928_s1 }
0x11de   : > { %3743 = vrot.lane.b32.xlu0 %v3691_v15, %s8887_s15  ;;  %6528 = vrot.lane.b32.xlu1 %v6522_v33, %s8928_s1  ;;  %s8931_s15 = smov 94  }
0x11e2   : > { %3719 = vrot.lane.b32.xlu0 %v3702_v22, %s8929_s7  ;;  %6538 = vrot.lane.b32.xlu1 %v6502_v20, %s8929_s7 }
0x11e6   : > { %3962 = vperm.xlu1 %6046, %v3959_v54  }
0x1238   : > { %v3784_v3 = vpop.permute.xlu0 %3783  ;;  %v3754_v39 = vpop.permute.xlu1 %3753 }
0x123c   : > { %v6504_v28 = vpop.permute.xlu0 %6503  ;;  %v3774_v7 = vpop.permute.xlu1 %3773 }
0x123d   : > { %v6505_v0 = vunpack.i.l.bf16 %v6504_v28  ;;  %v6506_v14 = vunpack.i.h.bf16 %v6504_v28 }
0x123f   : > { %v3789_v56 = vsel %vm1118_vm6, %v3784_v3, %v6505_v0  ;;  %v3790_v47 = vsel %vm1118_vm6, %v6505_v0, %v6506_v14 }
0x1240   : > { %v3798_v11 = vpop.permute.xlu0 %3797  ;;  %v6509_v40 = vpop.permute.xlu1 %6508 }
0x1241   : > { %v6511_v18 = vunpack.i.h.bf16 %v6509_v40  ;;  %v6510_v23 = vunpack.i.l.bf16 %v6509_v40 }
0x1243   : > { %v3760_v59 = vsel %vm1085_vm10, %v6510_v23, %v6511_v18  ;;  %v3759_v61 = vsel %vm1085_vm10, %v3754_v39, %v6510_v23 }
0x1244   : > { %v3764_v43 = vpop.permute.xlu0 %3763  ;;  %v6514_v62 = vpop.permute.xlu1 %6513 }
0x1245   : > { %v6516_v60 = vunpack.i.h.bf16 %v6514_v62  ;;  %v6515_v8 = vunpack.i.l.bf16 %v6514_v62 }
0x1247   : > { %v3800_v17 = vsel %vm1129_vm5, %v6516_v60, %v3798_v11  ;;  %v3799_v48 = vsel %vm1129_vm5, %v6515_v8, %v6516_v60 }
0x1248   : > { %v6524_v24 = vpop.permute.xlu0 %6523  ;;  %v6519_v55 = vpop.permute.xlu1 %6518  ;;  %v3956_v50 = vpack.c.bf16 %v3800_v17, %v3800_v17  ;;  %v3955_v52 = vpack.c.bf16 %v3799_v48, %v3799_v48  ;;  %v6837_v17 = vld [vmem:[%s8925_s0 + $0x8] ss:$0 sps:$4 sm:$0xff]   ;;  %s8934_s0 = smov 96  }
0x1249   : > { %v6526_v1 = vunpack.i.h.bf16 %v6524_v24  ;;  %v6525_v32 = vunpack.i.l.bf16 %v6524_v24  ;;  %v6521_v34 = vunpack.i.h.bf16 %v6519_v55  ;;  %v6520_v45 = vunpack.i.l.bf16 %v6519_v55 }
0x124a   : > { %5736 = vmatprep.subr.msk.bf16.mxu0 %vm1191_vm9, %v3956_v50  ;;  %v3979_v29 = vsel %vm1191_vm9, %v3955_v52, 0 }
0x124b   : > { %v3779_v6 = vsel %vm1107_vm8, %v3774_v7, %v6520_v45  ;;  %4028 = vmatpush1.bf16.msra.mxu0 %v3979_v29  ;;  %v3780_v49 = vsel %vm1107_vm8, %v6520_v45, %v6521_v34  ;;  %v3770_v58 = vsel %vm1096_vm7, %v6525_v32, %v6526_v1  ;;  %v3769_v15 = vsel %vm1096_vm7, %v3764_v43, %v6525_v32 }
0x124c   : > { %v6534_v44 = vpop.permute.xlu0 %6533  ;;  %v3732_v22 = vpop.permute.xlu1 %3731  ;;  %v3954_v20 = vpack.c.bf16 %v3790_v47, %v3780_v49  ;;  %v3953_v38 = vpack.c.bf16 %v3789_v56, %v3779_v6  ;;  %v3952_v35 = vpack.c.bf16 %v3770_v58, %v3760_v59  ;;  %v3951_v53 = vpack.c.bf16 %v3769_v15, %v3759_v61 }
0x124d   : > { %v6536_v57 = vunpack.i.h.bf16 %v6534_v44  ;;  %v6535_v2 = vunpack.i.l.bf16 %v6534_v44 }
0x124e   : > { %4029 = vmatprep.subr.bf16.mxu0 %v3954_v20 }
0x124f   : > { %4030 = vmatpush1.bf16.msra.mxu0 %v3953_v38  ;;  %v3750_v28 = vsel %vm1074_vm11, %v6535_v2, %v6536_v57 }
0x1250   : > { %v3744_v5 = vpop.permute.xlu0 %3743  ;;  %v6529_v21 = vpop.permute.xlu1 %6528  ;;  %4031 = vmatprep.subr.bf16.mxu0 %v3952_v35 }
0x1251   : > { %v6531_v25 = vunpack.i.h.bf16 %v6529_v21  ;;  %v6530_v33 = vunpack.i.l.bf16 %v6529_v21  ;;  %v3749_v54 = vsel %vm1074_vm11, %v3744_v5, %v6535_v2 }
0x1253   : > { %v3737_v16 = vsel %vm1061_vm12, %v3732_v22, %v6530_v33  ;;  %4032 = vmatpush1.bf16.msra.mxu0 %v3951_v53  ;;  %v3738_v3 = vsel %vm1061_vm12, %v6530_v33, %v6531_v25 }
0x1254   : > { %v6539_v7 = vpop.permute.xlu1 %6538  ;;  %v3950_v11 = vpack.c.bf16 %v3750_v28, %v3738_v3  ;;  %v3949_v40 = vpack.c.bf16 %v3749_v54, %v3737_v16  ;;  %v3720_v62 = vpop.permute.xlu0 %3719  ;;  %v4241_v54 = vld [vmem:[%s8932_s11] sm:$0xff]  ;;  %s8936_s11 = sld [smem:[#allocation11_spill]] }
0x1255   : > { %v6541_v39 = vunpack.i.h.bf16 %v6539_v7  ;;  %v6540_v43 = vunpack.i.l.bf16 %v6539_v7 }
0x1256   : > { %4033 = vmatprep.subr.bf16.mxu0 %v3950_v11 }
0x1257   : > { %v3725_v60 = vsel %vm1048_vm13, %v3720_v62, %v6540_v43  ;;  %4034 = vmatpush1.bf16.msra.mxu0 %v3949_v40  ;;  %v3726_v8 = vsel %vm1048_vm13, %v6540_v43, %v6541_v39 }
0x1258   : > { %v5878_v0 = vpack.c.bf16 %v3725_v60, %v8198_v27  ;;  %v3948_v14 = vpack.c.bf16 %v3726_v8, %v8217_v4 }
0x125a   : > { %4035 = vmatprep.subr.bf16.mxu0 %v3948_v14 }
0x125b   : > { %5879 = vmatpush1.bf16.msk.msra.mxu0 %vm7195_vm0, %v5878_v0 }
0x125c   : > { %4037 = vmatprep.subr.bf16.mxu0 %v8120_v30 }
0x125f   : > { %4038 = vmatpush1.bf16.msra.mxu0 %v8118_v19 }
0x1260   : > { %4039 = vmatprep.subr.bf16.mxu0 %v8129_v31 }
0x1261   : > { %v3963_v27 = vpop.permute.xlu1 %3962 }
0x1262   : > { %v4019_v4 = vadd.f32 %v8226_v63, %v3963_v27  ;;  %v4021_v23 = vadd.f32 %v8230_v51, %v3963_v27 }
0x1263   : > { %4040 = vmatpush1.bf16.msra.mxu0 %v8134_v26 }
0x1266   : > { %5737 = vmatmul.mubr.msk.bf16.vlgmr.msra.gmra.mxu0 %vm2447_vm15, %v6837_v17 }
0x1267   : > { %4288 = vmatprep.mubr.bf16.mxu0 %v6900_v41 }
0x1326   : > { %v4059_v48 = vpop.f32.mrf.mxu0 }
0x1327   : > { %v4060_v18 = vadd.f32 %v4059_v48, %v4019_v4 }
0x1328   : > { %v4061_v24 = vpop.f32.mrf.mxu0 }
0x1329   : > { %v4066_v30 = vmul.f32 0.2, %v4060_v18  ;;  %v4062_v55 = vadd.f32 %v4061_v24, %v4021_v23 }
0x132a   : > { %v4063_v19 = vpop.f32.mrf.mxu0 }
0x132b   : > { %v8267_v31 = vadd.f32 %v4066_v30, %v7674_v37  ;;  %v4067_v50 = vmul.f32 0.2, %v4062_v55 }
0x132c   : > { %v4064_v26 = vpop.f32.mrf.mxu0 }
0x132d   : > { %v8270_v52 = vadd.f32 %v4067_v50, %v7677_v42  ;;  %v4095_v1 = vmul.f32 %v7086_v9, %v8267_v31  ;;  %v4070_v51 = vmul.f32 %v7088_v10, %v8267_v31 }
0x132f   : > { %v4096_v63 = vmul.f32 %v7092_v12, %v8270_v52  ;;  %v4071_v32 = vmul.f32 %v7094_v13, %v8270_v52  ;;  %v6552_v42 = vpack.i.bf16 %v8270_v52, %v8267_v31 }
0x1331   : > { %v6542_v34 = vpack.i.bf16 %v4096_v63, %v4095_v1  ;;  %v6547_v37 = vpack.i.bf16 %v4071_v32, %v4070_v51 }
0x1333   : > { %6543 = vrot.lane.b32.xlu0 %v6542_v34, %s8926_s18  ;;  %6548 = vrot.lane.b32.xlu1 %v6547_v37, %s8926_s18 }
0x1337   : > { %6553 = vrot.lane.b32.xlu0 %v6552_v42, %s8926_s18 }
0x13a5   : > { %v6544_v45 = vpop.permute.xlu0 %6543  ;;  %v6549_v56 = vpop.permute.xlu1 %6548 }
0x13a6   : > { %v8285_v47 = vunpack.i.l.bf16 %v6549_v56  ;;  %v6546_v38 = vunpack.i.h.bf16 %v6544_v45  ;;  %v6545_v59 = vunpack.i.l.bf16 %v6544_v45  ;;  %v6551_v35 = vunpack.i.h.bf16 %v6549_v56 }
0x13a8   : > { %v4082_v15 = vsel %vm1009_vm4, 0.0, %v8285_v47  ;;  %v4107_v57 = vsel %vm1009_vm4, %v6546_v38, 0.0  ;;  %v4103_v2 = vsel %vm1009_vm4, %v6545_v59, %v6546_v38  ;;  %v4106_v61 = vsel %vm1009_vm4, 0.0, %v6545_v59 }
0x13a9   : > { %v6554_v29 = vpop.permute.xlu0 %6553  ;;  %v6567_v5 = vpack.i.bf16 %v4103_v2, %v4106_v61  ;;  %v4083_v21 = vsel %vm1009_vm4, %v6551_v35, 0.0  ;;  %v8304_v25 = vsel %vm1009_vm4, %v8285_v47, %v6551_v35  ;;  %v6577_v53 = vpack.i.bf16 %v4107_v57, %v4103_v2 }
0x13aa   : > { %v6556_v6 = vunpack.i.h.bf16 %v6554_v29  ;;  %v6555_v49 = vunpack.i.l.bf16 %v6554_v29  ;;  %v6572_v33 = vpack.i.bf16 %v4083_v21, %v8304_v25 }
0x13ac   : > { %v4094_v58 = vsel %vm1009_vm4, %v6556_v6, 0.0  ;;  %v4090_v44 = vsel %vm1009_vm4, %v6555_v49, %v6556_v6  ;;  %v4093_v22 = vsel %vm1009_vm4, 0.0, %v6555_v49 }
0x13ad   : > { %4174 = vrot.lane.b32.xlu0 %v4093_v22, %s8923_s28  ;;  %4144 = vrot.lane.b32.xlu1 %v4093_v22, %s8930_s16  ;;  %v6557_v20 = vpack.i.bf16 %v4094_v58, %v4090_v44 }
0x13b1   : > { %6558 = vrot.lane.b32.xlu0 %v6557_v20, %s8923_s28  ;;  %4164 = vrot.lane.b32.xlu1 %v4082_v15, %s8891_s10  ;;  %s8933_s10 = smov 110  }
0x13b5   : > { %4188 = vrot.lane.b32.xlu0 %v4107_v57, %s8931_s15  ;;  %6563 = vrot.lane.b32.xlu1 %v6557_v20, %s8930_s16 }
0x13b9   : > { %4154 = vrot.lane.b32.xlu0 %v4106_v61, %s8933_s10  ;;  %6568 = vrot.lane.b32.xlu1 %v6567_v5, %s8931_s15 }
0x13bd   : > { %6578 = vrot.lane.b32.xlu0 %v6577_v53, %s8933_s10  ;;  %6573 = vrot.lane.b32.xlu1 %v6572_v33, %s8934_s0 }
0x13c1   : > { %6588 = vrot.lane.b32.xlu0 %v6572_v33, %s8935_s2  ;;  %4122 = vrot.lane.b32.xlu1 %v4106_v61, %s8928_s1 }
0x13c5   : > { %4134 = vrot.lane.b32.xlu0 %v4082_v15, %s8935_s2  ;;  %6583 = vrot.lane.b32.xlu1 %v6577_v53, %s8928_s1 }
0x13c9   : > { %4110 = vrot.lane.b32.xlu0 %v4093_v22, %s8929_s7  ;;  %6593 = vrot.lane.b32.xlu1 %v6557_v20, %s8929_s7 }
0x13cd   : > { %4244 = vperm.xlu1 %6046, %v4241_v54  }
0x141f   : > { %v4175_v16 = vpop.permute.xlu0 %4174  ;;  %v4145_v3 = vpop.permute.xlu1 %4144 }
0x1423   : > { %v6559_v28 = vpop.permute.xlu0 %6558  ;;  %v4165_v7 = vpop.permute.xlu1 %4164 }
0x1424   : > { %v6560_v8 = vunpack.i.l.bf16 %v6559_v28  ;;  %v6561_v0 = vunpack.i.h.bf16 %v6559_v28 }
0x1426   : > { %v4180_v26 = vsel %vm1118_vm6, %v4175_v16, %v6560_v8  ;;  %v4181_v63 = vsel %vm1118_vm6, %v6560_v8, %v6561_v0 }
0x1427   : > { %v4189_v11 = vpop.permute.xlu0 %4188  ;;  %v6564_v40 = vpop.permute.xlu1 %6563 }
0x1428   : > { %v6566_v27 = vunpack.i.h.bf16 %v6564_v40  ;;  %v6565_v4 = vunpack.i.l.bf16 %v6564_v40 }
0x142a   : > { %v4151_v29 = vsel %vm1085_vm10, %v6565_v4, %v6566_v27  ;;  %v4150_v22 = vsel %vm1085_vm10, %v4145_v3, %v6565_v4 }
0x142b   : > { %v4155_v39 = vpop.permute.xlu0 %4154  ;;  %v6569_v43 = vpop.permute.xlu1 %6568 }
0x142c   : > { %v6571_v62 = vunpack.i.h.bf16 %v6569_v43  ;;  %v6570_v60 = vunpack.i.l.bf16 %v6569_v43 }
0x142e   : > { %v8319_v14 = vsel %vm1129_vm5, %v6571_v62, %v4189_v11  ;;  %v8322_v17 = vsel %vm1129_vm5, %v6570_v60, %v6571_v62 }
0x142f   : > { %v4239_v48 = vpack.c.bf16 %v8319_v14, %v8319_v14  ;;  %v6579_v18 = vpop.permute.xlu0 %6578  ;;  %v6574_v23 = vpop.permute.xlu1 %6573  ;;  %v4238_v24 = vpack.c.bf16 %v8322_v17, %v8322_v17 }
0x1430   : > { %v6581_v30 = vunpack.i.h.bf16 %v6579_v18  ;;  %v6580_v55 = vunpack.i.l.bf16 %v6579_v18  ;;  %v6576_v19 = vunpack.i.h.bf16 %v6574_v23  ;;  %v6575_v50 = vunpack.i.l.bf16 %v6574_v23 }
0x1431   : > { %5738 = vmatprep.subr.msk.bf16.mxu0 %vm1191_vm9, %v4239_v48  ;;  %v4251_v1 = vsel %vm1191_vm9, %v4238_v24, 0 }
0x1432   : > { %v4161_v51 = vsel %vm1096_vm7, %v6580_v55, %v6581_v30  ;;  %v4170_v32 = vsel %vm1107_vm8, %v4165_v7, %v6575_v50  ;;  %v4171_v34 = vsel %vm1107_vm8, %v6575_v50, %v6576_v19  ;;  %4263 = vmatpush1.bf16.msra.mxu0 %v4251_v1  ;;  %v4160_v6 = vsel %vm1096_vm7, %v4155_v39, %v6580_v55  ;;  %v4240_v39 = vld [vmem:[%s8936_s11] sm:$0xf]  ;;  %s8937_s11 = sld [smem:[#allocation14_spill]] }
0x1433   : > { %v8335_v37 = vpack.c.bf16 %v4180_v26, %v4170_v32  ;;  %v8337_v42 = vpack.c.bf16 %v4181_v63, %v4171_v34  ;;  %v6589_v45 = vpop.permute.xlu0 %6588  ;;  %v4123_v56 = vpop.permute.xlu1 %4122  ;;  %v8341_v49 = vpack.c.bf16 %v4161_v51, %v4151_v29  ;;  %v8347_v59 = vpack.c.bf16 %v4160_v6, %v4150_v22 }
0x1434   : > { %v6591_v58 = vunpack.i.h.bf16 %v6589_v45  ;;  %v6590_v44 = vunpack.i.l.bf16 %v6589_v45 }
0x1435   : > { %4264 = vmatprep.subr.bf16.mxu0 %v8337_v42 }
0x1436   : > { %4265 = vmatpush1.bf16.msra.mxu0 %v8335_v37  ;;  %v4141_v57 = vsel %vm1074_vm11, %v6590_v44, %v6591_v58 }
0x1437   : > { %v4135_v20 = vpop.permute.xlu0 %4134  ;;  %v6584_v38 = vpop.permute.xlu1 %6583  ;;  %4266 = vmatprep.subr.bf16.mxu0 %v8341_v49 }
0x1438   : > { %v6586_v15 = vunpack.i.h.bf16 %v6584_v38  ;;  %v6585_v35 = vunpack.i.l.bf16 %v6584_v38  ;;  %v4140_v2 = vsel %vm1074_vm11, %v4135_v20, %v6590_v44 }
0x143a   : > { %v4128_v61 = vsel %vm1061_vm12, %v4123_v56, %v6585_v35  ;;  %v4129_v5 = vsel %vm1061_vm12, %v6585_v35, %v6586_v15  ;;  %4267 = vmatpush1.bf16.msra.mxu0 %v8347_v59 }
0x143b   : > { %v8354_v21 = vpack.c.bf16 %v4140_v2, %v4128_v61  ;;  %v8356_v33 = vpack.c.bf16 %v4141_v57, %v4129_v5  ;;  %v6594_v53 = vpop.permute.xlu1 %6593  ;;  %v4111_v3 = vpop.permute.xlu0 %4110 }
0x143c   : > { %v6596_v54 = vunpack.i.h.bf16 %v6594_v53  ;;  %v6595_v16 = vunpack.i.l.bf16 %v6594_v53 }
0x143d   : > { %4268 = vmatprep.subr.bf16.mxu0 %v8356_v33 }
0x143e   : > { %v4116_v28 = vsel %vm1048_vm13, %v4111_v3, %v6595_v16  ;;  %v4117_v7 = vsel %vm1048_vm13, %v6595_v16, %v6596_v54  ;;  %4269 = vmatpush1.bf16.msra.mxu0 %v8354_v21  ;;  %v4498_v54 = vld [vmem:[%s8937_s11] sm:$0xff]  ;;  %s8940_s11 = sld [smem:[#allocation16_spill]] }
0x143f   : > { %v8363_v11 = vpack.c.bf16 %v4117_v7, %v8304_v25  ;;  %v8366_v40 = vpack.c.bf16 %v4116_v28, %v8285_v47  ;;  %v8415_v16 = vld [vmem:[%s8938_s3] sm:$0xff]  ;;  %s8939_s3 = sld [smem:[#allocation15_spill]] }
0x1440   : > { %v5741_v3 = vcombine.high %v8415_v16, %v8415_v16 }
0x1441   : > { %4270 = vmatprep.subr.bf16.mxu0 %v8363_v11 }
0x1442   : > { %5883 = vmatpush1.bf16.msk.msra.mxu0 %vm7195_vm0, %v8366_v40  ;;  %5742 = vmatprep.mubr.msk.bf16.mxu1 %vm1452_vm2, %v5741_v3  ;;  %vm8943_vm2 = vmmov %vm8924_vm14 }
0x1445   : > { %5739 = vmatmul.mubr.msk.bf16.vlgmr.msra.gmra.mxu0 %vm1187_vm1, %v4240_v39  ;;  %vm8941_vm1 = vcmask 719872  }
0x1448   : > { %v4245_v43 = vpop.permute.xlu1 %4244 }
0x1505   : > { %v4290_v62 = vpop.f32.mrf.mxu0 }
0x1506   : > { %v4291_v60 = vadd.f32 %v4290_v62, %v4245_v43 }
0x1507   : > { %v4292_v8 = vpop.f32.mrf.mxu0 }
0x1508   : > { %v4297_v0 = vmul.f32 0.2, %v4291_v60  ;;  %v4293_v27 = vadd.f32 %v4292_v8, %v4245_v43 }
0x1509   : > { %v4294_v25 = vpop.f32.mrf.mxu0 }
0x150a   : > { %v4299_v4 = vmax.f32 %v4291_v60, %v4297_v0  ;;  %v4298_v48 = vmul.f32 0.2, %v4293_v27 }
0x150b   : > { %v4295_v47 = vpop.f32.mrf.mxu0 }
0x150c   : > { %v4300_v18 = vmax.f32 %v4293_v27, %v4298_v48  ;;  %v4301_v23 = vmul.f32 %v7088_v10, %v4299_v4  ;;  %v4326_v24 = vmul.f32 %v7086_v9, %v4299_v4 }
0x150e   : > { %v4302_v30 = vmul.f32 %v7094_v13, %v4300_v18  ;;  %v4327_v55 = vmul.f32 %v7092_v12, %v4300_v18  ;;  %v6607_v26 = vpack.i.bf16 %v4300_v18, %v4299_v4 }
0x1510   : > { %v6602_v19 = vpack.i.bf16 %v4327_v55, %v4326_v24  ;;  %v6597_v50 = vpack.i.bf16 %v4302_v30, %v4301_v23 }
0x1512   : > { %6603 = vrot.lane.b32.xlu1 %v6602_v19, %s8926_s18  ;;  %6598 = vrot.lane.b32.xlu0 %v6597_v50, %s8926_s18 }
0x1516   : > { %6608 = vrot.lane.b32.xlu0 %v6607_v26, %s8926_s18 }
0x1584   : > { %v6604_v1 = vpop.permute.xlu1 %6603  ;;  %v6599_v63 = vpop.permute.xlu0 %6598 }
0x1585   : > { %v6605_v51 = vunpack.i.l.bf16 %v6604_v1  ;;  %v8381_v32 = vunpack.i.l.bf16 %v6599_v63  ;;  %v6606_v45 = vunpack.i.h.bf16 %v6604_v1  ;;  %v6601_v6 = vunpack.i.h.bf16 %v6599_v63 }
0x1587   : > { %v4337_v56 = vsel %vm1009_vm4, 0.0, %v6605_v51  ;;  %v4313_v44 = vsel %vm1009_vm4, 0.0, %v8381_v32  ;;  %v4338_v38 = vsel %vm1009_vm4, %v6606_v45, 0.0  ;;  %v4334_v15 = vsel %vm1009_vm4, %v6605_v51, %v6606_v45 }
0x1588   : > { %v6609_v34 = vpop.permute.xlu0 %6608  ;;  %4385 = vrot.lane.b32.xlu1 %v4337_v56, %s8933_s10  ;;  %4395 = vrot.lane.b32.xlu0 %v4313_v44, %s8934_s0  ;;  %v4314_v57 = vsel %vm1009_vm4, %v6601_v6, 0.0  ;;  %v8395_v2 = vsel %vm1009_vm4, %v8381_v32, %v6601_v6  ;;  %v6617_v61 = vpack.i.bf16 %v4338_v38, %v4334_v15 }
0x1589   : > { %v6611_v29 = vunpack.i.h.bf16 %v6609_v34  ;;  %v6610_v58 = vunpack.i.l.bf16 %v6609_v34  ;;  %v6622_v5 = vpack.i.bf16 %v4314_v57, %v8395_v2 }
0x158b   : > { %v4325_v22 = vsel %vm1009_vm4, %v6611_v29, 0.0  ;;  %v4321_v20 = vsel %vm1009_vm4, %v6610_v58, %v6611_v29  ;;  %v4324_v53 = vsel %vm1009_vm4, 0.0, %v6610_v58 }
0x158c   : > { %v6612_v35 = vpack.i.bf16 %v4325_v22, %v4321_v20  ;;  %4365 = vrot.lane.b32.xlu1 %v4313_v44, %s8935_s2 }
0x158e   : > { %6613 = vrot.lane.b32.xlu0 %v6612_v35, %s8930_s16 }
0x1590   : > { %6618 = vrot.lane.b32.xlu1 %v6617_v61, %s8933_s10 }
0x1592   : > { %6623 = vrot.lane.b32.xlu0 %v6622_v5, %s8934_s0 }
0x1594   : > { %6628 = vrot.lane.b32.xlu1 %v6622_v5, %s8935_s2 }
0x1596   : > { %4375 = vrot.lane.b32.xlu0 %v4324_v53, %s8930_s16 }
0x1598   : > { %6633 = vrot.lane.b32.xlu1 %v6612_v35, %s8929_s7 }
0x159a   : > { %6638 = vrot.lane.b32.xlu0 %v6617_v61, %s8928_s1 }
0x159c   : > { %4341 = vrot.lane.b32.xlu1 %v4324_v53, %s8929_s7 }
0x159e   : > { %4353 = vrot.lane.b32.xlu0 %v4337_v56, %s8928_s1 }
0x15a0   : > { %6643 = vrot.lane.b32.xlu1 %v6612_v35, %s8923_s28 }
0x15a2   : > { %6648 = vrot.lane.b32.xlu0 %v6617_v61, %s8931_s15 }
0x15a4   : > { %4405 = vrot.lane.b32.xlu1 %v4324_v53, %s8923_s28 }
0x15a6   : > { %4415 = vrot.lane.b32.xlu0 %v4337_v56, %s8931_s15 }
0x15a8   : > { %4501 = vperm.xlu1 %6046, %v4498_v54  }
0x15fa   : > { %v4386_v28 = vpop.permute.xlu1 %4385  ;;  %v4396_v7 = vpop.permute.xlu0 %4395 }
0x15fe   : > { %v4366_v39 = vpop.permute.xlu1 %4365 }
0x1600   : > { %v6614_v43 = vpop.permute.xlu0 %6613 }
0x1601   : > { %v6616_v27 = vunpack.i.h.bf16 %v6614_v43  ;;  %v6615_v25 = vunpack.i.l.bf16 %v6614_v43 }
0x1602   : > { %v6619_v62 = vpop.permute.xlu1 %6618 }
0x1603   : > { %v6621_v60 = vunpack.i.h.bf16 %v6619_v62  ;;  %v6620_v8 = vunpack.i.l.bf16 %v6619_v62  ;;  %v4382_v63 = vsel %vm1085_vm10, %v6615_v25, %v6616_v27 }
0x1604   : > { %v6624_v0 = vpop.permute.xlu0 %6623 }
0x1605   : > { %v6626_v4 = vunpack.i.h.bf16 %v6624_v0  ;;  %v6625_v48 = vunpack.i.l.bf16 %v6624_v0  ;;  %v4391_v47 = vsel %vm1096_vm7, %v4386_v28, %v6620_v8  ;;  %v4392_v18 = vsel %vm1096_vm7, %v6620_v8, %v6621_v60 }
0x1606   : > { %v6629_v30 = vpop.permute.xlu1 %6628  ;;  %v8456_v28 = vpack.c.bf16 %v8395_v2, %v8319_v14 }
0x1607   : > { %v4401_v23 = vsel %vm1107_vm8, %v4396_v7, %v6625_v48  ;;  %v4402_v24 = vsel %vm1107_vm8, %v6625_v48, %v6626_v4  ;;  %v6631_v50 = vunpack.i.h.bf16 %v6629_v30  ;;  %v6630_v26 = vunpack.i.l.bf16 %v6629_v30 }
0x1608   : > { %v8424_v55 = vpack.c.bf16 %v4401_v23, %v4391_v47  ;;  %v8426_v19 = vpack.c.bf16 %v4402_v24, %v4392_v18  ;;  %v4376_v1 = vpop.permute.xlu0 %4375  ;;  %v8464_v7 = vpack.c.bf16 %v8381_v32, %v8322_v17  ;;  %v5740_v47 = vcombine.low %v8415_v16, %v8415_v16 }
0x1609   : > { %v4372_v51 = vsel %vm1074_vm11, %v6630_v26, %v6631_v50  ;;  %v4371_v34 = vsel %vm1074_vm11, %v4366_v39, %v6630_v26  ;;  %v4381_v45 = vsel %vm1085_vm10, %v4376_v1, %v6615_v25 }
0x160a   : > { %4513 = vmatprep.subr.bf16.mxu1 %v8426_v19  ;;  %4804 = vmatprep.subr.bf16.mxu0 %v8426_v19  ;;  %v8434_v56 = vpack.c.bf16 %v4382_v63, %v4372_v51  ;;  %v6634_v29 = vpop.permute.xlu1 %6633  ;;  %v8438_v22 = vpack.c.bf16 %v4381_v45, %v4371_v34 }
0x160b   : > { %4514 = vmatpush1.bf16.msra.mxu1 %v8424_v55  ;;  %4805 = vmatpush1.bf16.msra.mxu0 %v8424_v55  ;;  %v6636_v6 = vunpack.i.h.bf16 %v6634_v29  ;;  %v6635_v58 = vunpack.i.l.bf16 %v6634_v29 }
0x160c   : > { %v6639_v44 = vpop.permute.xlu0 %6638  ;;  %4515 = vmatprep.subr.bf16.mxu1 %v8434_v56  ;;  %4806 = vmatprep.subr.bf16.mxu0 %v8434_v56 }
0x160d   : > { %v6641_v20 = vunpack.i.h.bf16 %v6639_v44  ;;  %v6640_v38 = vunpack.i.l.bf16 %v6639_v44  ;;  %v4348_v15 = vsel %vm1048_vm13, %v6635_v58, %v6636_v6 }
0x160e   : > { %v4342_v57 = vpop.permute.xlu1 %4341 }
0x160f   : > { %v4360_v35 = vsel %vm1061_vm12, %v6640_v38, %v6641_v20  ;;  %4516 = vmatpush1.bf16.msra.mxu1 %v8438_v22  ;;  %4807 = vmatpush1.bf16.msra.mxu0 %v8438_v22  ;;  %v4347_v53 = vsel %vm1048_vm13, %v4342_v57, %v6635_v58 }
0x1610   : > { %v8446_v61 = vpack.c.bf16 %v4360_v35, %v4348_v15  ;;  %v4354_v5 = vpop.permute.xlu0 %4353 }
0x1611   : > { %v4359_v54 = vsel %vm1061_vm12, %v4354_v5, %v6640_v38 }
0x1612   : > { %v8450_v3 = vpack.c.bf16 %v4359_v54, %v4347_v53  ;;  %4517 = vmatprep.subr.bf16.mxu1 %v8446_v61  ;;  %4808 = vmatprep.subr.bf16.mxu0 %v8446_v61  ;;  %v6644_v17 = vpop.permute.xlu1 %6643 }
0x1613   : > { %v6646_v39 = vunpack.i.h.bf16 %v6644_v17  ;;  %v6645_v43 = vunpack.i.l.bf16 %v6644_v17 }
0x1614   : > { %4518 = vmatpush1.bf16.msra.mxu1 %v8450_v3  ;;  %4809 = vmatpush1.bf16.msra.mxu0 %v8450_v3  ;;  %v6649_v14 = vpop.permute.xlu0 %6648 }
0x1615   : > { %4519 = vmatprep.subr.bf16.mxu1 %v8456_v28  ;;  %4810 = vmatprep.subr.bf16.mxu0 %v8456_v28  ;;  %v6651_v32 = vunpack.i.h.bf16 %v6649_v14  ;;  %v6650_v2 = vunpack.i.l.bf16 %v6649_v14  ;;  %v4412_v8 = vsel %vm1118_vm6, %v6645_v43, %v6646_v39 }
0x1616   : > { %v4406_v0 = vpop.permute.xlu1 %4405 }
0x1617   : > { %v4422_v62 = vsel %vm1129_vm5, %v6650_v2, %v6651_v32  ;;  %v4411_v4 = vsel %vm1118_vm6, %v4406_v0, %v6645_v43 }
0x1618   : > { %5887 = vmatpush1.bf16.msk.msra.mxu1 %vm7296_vm3, %v8464_v7  ;;  %5895 = vmatpush1.bf16.msk.msra.mxu0 %vm7296_vm3, %v8464_v7  ;;  %v4416_v60 = vpop.permute.xlu0 %4415  ;;  %v8488_v27 = vpack.c.bf16 %v4422_v62, %v4412_v8 }
0x1619   : > { %4521 = vmatprep.subr.bf16.mxu1 %v8337_v42  ;;  %4812 = vmatprep.subr.bf16.mxu0 %v8337_v42  ;;  %v4421_v25 = vsel %vm1129_vm5, %v4416_v60, %v6650_v2 }
0x161a   : > { %v8499_v48 = vpack.c.bf16 %v4421_v25, %v4411_v4 }
0x161c   : > { %4522 = vmatpush1.bf16.msra.mxu1 %v8335_v37  ;;  %4813 = vmatpush1.bf16.msra.mxu0 %v8335_v37 }
0x161d   : > { %4523 = vmatprep.subr.bf16.mxu1 %v8341_v49  ;;  %4814 = vmatprep.subr.bf16.mxu0 %v8341_v49 }
0x1620   : > { %4524 = vmatpush1.bf16.msra.mxu1 %v8347_v59  ;;  %4815 = vmatpush1.bf16.msra.mxu0 %v8347_v59 }
0x1621   : > { %4525 = vmatprep.subr.bf16.mxu1 %v8356_v33  ;;  %4816 = vmatprep.subr.bf16.mxu0 %v8356_v33 }
0x1623   : > { %v4502_v16 = vpop.permute.xlu1 %4501 }
0x1624   : > { %4526 = vmatpush1.bf16.msra.mxu1 %v8354_v21  ;;  %4817 = vmatpush1.bf16.msra.mxu0 %v8354_v21 }
0x1625   : > { %4527 = vmatprep.subr.bf16.mxu1 %v8363_v11  ;;  %4818 = vmatprep.subr.bf16.mxu0 %v8363_v11 }
0x1628   : > { %5891 = vmatpush1.bf16.msk.msra.mxu1 %vm7195_vm0, %v8366_v40  ;;  %5899 = vmatpush1.bf16.msk.msra.mxu0 %vm7195_vm0, %v8366_v40 }
0x1629   : > { %4543 = vmatprep.subr.bf16.mxu1 %v8488_v27 }
0x162c   : > { %4544 = vmatpush2.bf16.msra.mxu1 %v8499_v48 }
0x162d   : > { %5120 = vmatprep.subr.bf16.mxu1 %v8426_v19 }
0x162f   : > { %4546 = vmatmul.mubr.bf16.vlgmr.msra.gmra.mxu1 %v5740_v47 }
0x1630   : > { %5121 = vmatpush1.bf16.msra.mxu1 %v8424_v55 }
0x1631   : > { %5122 = vmatprep.subr.bf16.mxu1 %v8434_v56 }
0x1634   : > { %5123 = vmatpush1.bf16.msra.mxu1 %v8438_v22 }
0x1635   : > { %5124 = vmatprep.subr.bf16.mxu1 %v8446_v61 }
0x1638   : > { %5125 = vmatpush1.bf16.msra.mxu1 %v8450_v3 }
0x1639   : > { %5126 = vmatprep.subr.bf16.mxu1 %v8456_v28 }
0x163c   : > { %5907 = vmatpush1.bf16.msk.msra.mxu1 %vm7296_vm3, %v8464_v7 }
0x163d   : > { %5128 = vmatprep.subr.bf16.mxu1 %v8337_v42 }
0x1640   : > { %5129 = vmatpush1.bf16.msra.mxu1 %v8335_v37 }
0x1641   : > { %5130 = vmatprep.subr.bf16.mxu1 %v8341_v49 }
0x1644   : > { %5131 = vmatpush1.bf16.msra.mxu1 %v8347_v59 }
0x1645   : > { %5132 = vmatprep.subr.bf16.mxu1 %v8356_v33 }
0x1648   : > { %5133 = vmatpush1.bf16.msra.mxu1 %v8354_v21 }
0x1649   : > { %5134 = vmatprep.subr.bf16.mxu1 %v8363_v11 }
0x164c   : > { %5911 = vmatpush1.bf16.msk.msra.mxu1 %vm7195_vm0, %v8366_v40 }
0x16ef   : > { %v4547_v18 = vpop.f32.mrf.mxu1 }
0x16f0   : > { %v4548_v23 = vadd.f32 %v4547_v18, %v4502_v16 }
0x16f1   : > { %v4549_v24 = vpop.f32.mrf.mxu1 }
0x16f2   : > { %v4554_v30 = vmul.f32 0.2, %v4548_v23  ;;  %v4550_v50 = vadd.f32 %v4549_v24, %v4502_v16  ;;  %v8562_v24 = vld [vmem:[%s8939_s3] sm:$0xff]  ;;  %s8942_s3 = sld [smem:[#allocation17_spill]] }
0x16f3   : > { %v4551_v26 = vpop.f32.mrf.mxu1 }
0x16f4   : > { %v4556_v1 = vmax.f32 %v4548_v23, %v4554_v30  ;;  %v4555_v63 = vmul.f32 0.2, %v4550_v50  ;;  %v5744_v30 = vcombine.high %v8562_v24, %v8562_v24 }
0x16f5   : > { %v4552_v51 = vpop.f32.mrf.mxu1 }
0x16f6   : > { %v4557_v34 = vmax.f32 %v4550_v50, %v4555_v63  ;;  %v4558_v45 = vmul.f32 %v7088_v10, %v4556_v1  ;;  %v4583_v29 = vmul.f32 %v7086_v9, %v4556_v1  ;;  %v4783_v50 = vld [vmem:[%s8940_s11] sm:$0xff]  ;;  %5746 = vmatprep.mubr.msk.bf16.mxu0 %vm8941_vm1, %v5744_v30 }
0x16f8   : > { %v4559_v6 = vmul.f32 %v7094_v13, %v4557_v34  ;;  %v4584_v58 = vmul.f32 %v7092_v12, %v4557_v34  ;;  %v6662_v38 = vpack.i.bf16 %v4557_v34, %v4556_v1 }
0x16fa   : > { %v6652_v44 = vpack.i.bf16 %v4584_v58, %v4583_v29  ;;  %v6657_v20 = vpack.i.bf16 %v4559_v6, %v4558_v45 }
0x16fc   : > { %6653 = vrot.lane.b32.xlu0 %v6652_v44, %s8926_s18  ;;  %6658 = vrot.lane.b32.xlu1 %v6657_v20, %s8926_s18 }
0x1700   : > { %6663 = vrot.lane.b32.xlu0 %v6662_v38, %s8926_s18 }
0x176e   : > { %v6654_v15 = vpop.permute.xlu0 %6653  ;;  %v6659_v35 = vpop.permute.xlu1 %6658 }
0x176f   : > { %v8531_v54 = vunpack.i.l.bf16 %v6659_v35  ;;  %v6656_v39 = vunpack.i.h.bf16 %v6654_v15  ;;  %v6655_v43 = vunpack.i.l.bf16 %v6654_v15  ;;  %v6661_v8 = vunpack.i.h.bf16 %v6659_v35 }
0x1771   : > { %v4570_v62 = vsel %vm1009_vm4, 0.0, %v8531_v54  ;;  %v4591_v60 = vsel %vm1009_vm4, %v6655_v43, %v6656_v39  ;;  %v4595_v0 = vsel %vm1009_vm4, %v6656_v39, 0.0  ;;  %v4594_v25 = vsel %vm1009_vm4, 0.0, %v6655_v43 }
0x1772   : > { %v6664_v57 = vpop.permute.xlu0 %6663  ;;  %v6677_v4 = vpack.i.bf16 %v4591_v60, %v4594_v25  ;;  %v4571_v47 = vsel %vm1009_vm4, %v6661_v8, 0.0  ;;  %v8550_v16 = vsel %vm1009_vm4, %v8531_v54, %v6661_v8  ;;  %v6687_v23 = vpack.i.bf16 %v4595_v0, %v4591_v60 }
0x1773   : > { %v6666_v5 = vunpack.i.h.bf16 %v6664_v57  ;;  %v6665_v53 = vunpack.i.l.bf16 %v6664_v57  ;;  %v6682_v18 = vpack.i.bf16 %v4571_v47, %v8550_v16 }
0x1775   : > { %v4582_v14 = vsel %vm1009_vm4, %v6666_v5, 0.0  ;;  %v4578_v17 = vsel %vm1009_vm4, %v6665_v53, %v6666_v5  ;;  %v4581_v32 = vsel %vm1009_vm4, 0.0, %v6665_v53 }
0x1776   : > { %4662 = vrot.lane.b32.xlu0 %v4581_v32, %s8923_s28  ;;  %4632 = vrot.lane.b32.xlu1 %v4581_v32, %s8930_s16  ;;  %v6667_v2 = vpack.i.bf16 %v4582_v14, %v4578_v17 }
0x177a   : > { %6668 = vrot.lane.b32.xlu0 %v6667_v2, %s8923_s28  ;;  %4652 = vrot.lane.b32.xlu1 %v4570_v62, %s8934_s0 }
0x177e   : > { %4676 = vrot.lane.b32.xlu0 %v4595_v0, %s8931_s15  ;;  %6673 = vrot.lane.b32.xlu1 %v6667_v2, %s8930_s16 }
0x1782   : > { %4642 = vrot.lane.b32.xlu0 %v4594_v25, %s8933_s10  ;;  %6678 = vrot.lane.b32.xlu1 %v6677_v4, %s8931_s15 }
0x1786   : > { %6688 = vrot.lane.b32.xlu0 %v6687_v23, %s8933_s10  ;;  %6683 = vrot.lane.b32.xlu1 %v6682_v18, %s8934_s0 }
0x178a   : > { %6698 = vrot.lane.b32.xlu0 %v6682_v18, %s8935_s2  ;;  %4610 = vrot.lane.b32.xlu1 %v4594_v25, %s8928_s1 }
0x178e   : > { %4622 = vrot.lane.b32.xlu0 %v4570_v62, %s8935_s2  ;;  %6693 = vrot.lane.b32.xlu1 %v6687_v23, %s8928_s1 }
0x1792   : > { %4598 = vrot.lane.b32.xlu0 %v4581_v32, %s8929_s7  ;;  %6703 = vrot.lane.b32.xlu1 %v6667_v2, %s8929_s7 }
0x1796   : > { %4786 = vperm.xlu1 %6046, %v4783_v50  }
0x17e8   : > { %v4663_v26 = vpop.permute.xlu0 %4662  ;;  %v4633_v1 = vpop.permute.xlu1 %4632 }
0x17ec   : > { %v6669_v63 = vpop.permute.xlu0 %6668  ;;  %v4653_v51 = vpop.permute.xlu1 %4652 }
0x17ed   : > { %v6670_v20 = vunpack.i.l.bf16 %v6669_v63  ;;  %v6671_v38 = vunpack.i.h.bf16 %v6669_v63 }
0x17ef   : > { %v4668_v60 = vsel %vm1118_vm6, %v4663_v26, %v6670_v20  ;;  %v4669_v4 = vsel %vm1118_vm6, %v6670_v20, %v6671_v38 }
0x17f0   : > { %v4677_v34 = vpop.permute.xlu0 %4676  ;;  %v6674_v45 = vpop.permute.xlu1 %6673 }
0x17f1   : > { %v6676_v57 = vunpack.i.h.bf16 %v6674_v45  ;;  %v6675_v5 = vunpack.i.l.bf16 %v6674_v45 }
0x17f3   : > { %v4639_v26 = vsel %vm1085_vm10, %v6675_v5, %v6676_v57 }
0x17f4   : > { %v4643_v29 = vpop.permute.xlu0 %4642  ;;  %v6679_v6 = vpop.permute.xlu1 %6678 }
0x17f5   : > { %v6681_v58 = vunpack.i.h.bf16 %v6679_v6  ;;  %v6680_v44 = vunpack.i.l.bf16 %v6679_v6  ;;  %v4638_v6 = vsel %vm1085_vm10, %v4633_v1, %v6675_v5 }
0x17f7   : > { %v8571_v15 = vsel %vm1129_vm5, %v6681_v58, %v4677_v34  ;;  %v8574_v35 = vsel %vm1129_vm5, %v6680_v44, %v6681_v58 }
0x17f8   : > { %v4781_v53 = vpack.c.bf16 %v8571_v15, %v8571_v15  ;;  %v6689_v14 = vpop.permute.xlu0 %6688  ;;  %v6684_v17 = vpop.permute.xlu1 %6683  ;;  %v4780_v32 = vpack.c.bf16 %v8574_v35, %v8574_v35 }
0x17f9   : > { %v6691_v2 = vunpack.i.h.bf16 %v6689_v14  ;;  %v6690_v39 = vunpack.i.l.bf16 %v6689_v14  ;;  %v6686_v43 = vunpack.i.h.bf16 %v6684_v17  ;;  %v6685_v62 = vunpack.i.l.bf16 %v6684_v17 }
0x17fa   : > { %5745 = vmatprep.subr.msk.bf16.mxu0 %vm1191_vm9, %v4781_v53  ;;  %v4799_v8 = vsel %vm1191_vm9, %v4780_v32, 0 }
0x17fb   : > { %v4658_v0 = vsel %vm1107_vm8, %v4653_v51, %v6685_v62  ;;  %4825 = vmatpush2.bf16.msra.mxu0 %v4799_v8  ;;  %v4659_v25 = vsel %vm1107_vm8, %v6685_v62, %v6686_v43  ;;  %v4649_v47 = vsel %vm1096_vm7, %v6690_v39, %v6691_v2  ;;  %v4648_v63 = vsel %vm1096_vm7, %v4643_v29, %v6690_v39 }
0x17fc   : > { %v8587_v18 = vpack.c.bf16 %v4668_v60, %v4658_v0  ;;  %v6699_v23 = vpop.permute.xlu0 %6698  ;;  %v4611_v30 = vpop.permute.xlu1 %4610  ;;  %v8589_v50 = vpack.c.bf16 %v4669_v4, %v4659_v25  ;;  %v8594_v51 = vpack.c.bf16 %v4649_v47, %v4639_v26  ;;  %v8599_v20 = vpack.c.bf16 %v4648_v63, %v4638_v6 }
0x17fd   : > { %v6701_v34 = vunpack.i.h.bf16 %v6699_v23  ;;  %v6700_v45 = vunpack.i.l.bf16 %v6699_v23  ;;  %v5743_v25 = vcombine.low %v8562_v24, %v8562_v24 }
0x17fe   : > { %4826 = vmatprep.subr.bf16.mxu0 %v8589_v50 }
0x17ff   : > { %4827 = vmatpush2.bf16.msra.mxu0 %v8587_v18  ;;  %v4629_v17 = vsel %vm1074_vm11, %v6700_v45, %v6701_v34 }
0x1800   : > { %v4623_v58 = vpop.permute.xlu0 %4622  ;;  %v6694_v44 = vpop.permute.xlu1 %6693  ;;  %4828 = vmatprep.subr.bf16.mxu0 %v8594_v51 }
0x1801   : > { %v6696_v38 = vunpack.i.h.bf16 %v6694_v44  ;;  %v6695_v57 = vunpack.i.l.bf16 %v6694_v44  ;;  %v4628_v29 = vsel %vm1074_vm11, %v4623_v58, %v6700_v45 }
0x1803   : > { %v4616_v53 = vsel %vm1061_vm12, %v4611_v30, %v6695_v57  ;;  %4829 = vmatpush2.bf16.msra.mxu0 %v8599_v20  ;;  %v4617_v14 = vsel %vm1061_vm12, %v6695_v57, %v6696_v38 }
0x1804   : > { %v8606_v32 = vpack.c.bf16 %v4628_v29, %v4616_v53  ;;  %v6704_v1 = vpop.permute.xlu1 %6703  ;;  %v8608_v5 = vpack.c.bf16 %v4629_v17, %v4617_v14  ;;  %v4599_v43 = vpop.permute.xlu0 %4598 }
0x1805   : > { %v6706_v2 = vunpack.i.h.bf16 %v6704_v1  ;;  %v6705_v39 = vunpack.i.l.bf16 %v6704_v1 }
0x1806   : > { %4830 = vmatprep.subr.bf16.mxu0 %v8608_v5 }
0x1807   : > { %v4604_v62 = vsel %vm1048_vm13, %v4599_v43, %v6705_v39  ;;  %4831 = vmatpush2.bf16.msra.mxu0 %v8606_v32  ;;  %v4605_v60 = vsel %vm1048_vm13, %v6705_v39, %v6706_v2 }
0x1808   : > { %v8615_v8 = vpack.c.bf16 %v4604_v62, %v8531_v54  ;;  %v8618_v0 = vpack.c.bf16 %v4605_v60, %v8550_v16 }
0x180a   : > { %4832 = vmatprep.subr.bf16.mxu0 %v8618_v0 }
0x180b   : > { %5903 = vmatpush2.bf16.msk.msra.mxu0 %vm7195_vm0, %v8615_v8 }
0x180c   : > { %4834 = vmatprep.subr.bf16.mxu0 %v8488_v27 }
0x180f   : > { %4835 = vmatpush2.bf16.msra.mxu0 %v8499_v48 }
0x1811   : > { %v4787_v54 = vpop.permute.xlu1 %4786 }
0x1812   : > { %4837 = vmatmul.mubr.bf16.vlgmr.msra.gmra.mxu0 %v5743_v25 }
0x1813   : > { %5193 = vmatprep.mubr.bf16.mxu0 %v6900_v41 }
0x18d2   : > { %v4838_v4 = vpop.f32.mrf.mxu0 }
0x18d3   : > { %v4839_v16 = vadd.f32 %v4838_v4, %v4787_v54 }
0x18d4   : > { %v4840_v47 = vpop.f32.mrf.mxu0 }
0x18d5   : > { %v4845_v23 = vmul.f32 0.2, %v4839_v16  ;;  %v4841_v30 = vadd.f32 %v4840_v47, %v4787_v54 }
0x18d6   : > { %v4842_v26 = vpop.f32.mrf.mxu0 }
0x18d7   : > { %v4847_v63 = vmax.f32 %v4839_v16, %v4845_v23  ;;  %v4846_v34 = vmul.f32 0.2, %v4841_v30 }
0x18d8   : > { %v4843_v45 = vpop.f32.mrf.mxu0 }
0x18d9   : > { %v4848_v6 = vmax.f32 %v4841_v30, %v4846_v34  ;;  %v4849_v58 = vmul.f32 %v7088_v10, %v4847_v63  ;;  %v4874_v29 = vmul.f32 %v7086_v9, %v4847_v63 }
0x18db   : > { %v4850_v24 = vmul.f32 %v7094_v13, %v4848_v6  ;;  %v6707_v44 = vpack.i.bf16 %v4848_v6, %v4847_v63  ;;  %v4875_v38 = vmul.f32 %v7092_v12, %v4848_v6 }
0x18dd   : > { %6708 = vrot.lane.b32.xlu1 %v6707_v44, %s8926_s18  ;;  %v6712_v57 = vpack.i.bf16 %v4850_v24, %v4849_v58  ;;  %v6717_v53 = vpack.i.bf16 %v4875_v38, %v4874_v29  ;;  %v8668_v24 = vld [vmem:[%s8942_s3] sm:$0xff] }
0x18de   : > { %v5748_v44 = vcombine.high %v8668_v24, %v8668_v24  ;;  %v5101_v38 = vld [vmem:[%s7051_s27] sm:$0xff] }
0x18df   : > { %6713 = vrot.lane.b32.xlu0 %v6712_v57, %s8926_s18 }
0x18e0   : > { %5152 = vmatprep.mubr.bf16.mxu1 %v5748_v44 }
0x18e3   : > { %6718 = vrot.lane.b32.xlu0 %v6717_v53, %s8926_s18 }
0x194f   : > { %v6709_v14 = vpop.permute.xlu1 %6708 }
0x1950   : > { %v6711_v17 = vunpack.i.h.bf16 %v6709_v14  ;;  %v6710_v1 = vunpack.i.l.bf16 %v6709_v14 }
0x1951   : > { %v6714_v2 = vpop.permute.xlu0 %6713 }
0x1952   : > { %v6716_v39 = vunpack.i.h.bf16 %v6714_v2  ;;  %v8636_v43 = vunpack.i.l.bf16 %v6714_v2  ;;  %v4873_v62 = vsel %vm1009_vm4, %v6711_v17, 0.0  ;;  %v4869_v60 = vsel %vm1009_vm4, %v6710_v1, %v6711_v17 }
0x1953   : > { %v4872_v25 = vsel %vm1009_vm4, 0.0, %v6710_v1  ;;  %v6722_v23 = vpack.i.bf16 %v4873_v62, %v4869_v60 }
0x1954   : > { %v4862_v54 = vsel %vm1009_vm4, %v6716_v39, 0.0  ;;  %v8644_v4 = vsel %vm1009_vm4, %v8636_v43, %v6716_v39  ;;  %4923 = vrot.lane.b32.xlu0 %v4872_v25, %s8930_s16  ;;  %v4861_v16 = vsel %vm1009_vm4, 0.0, %v8636_v43 }
0x1955   : > { %v6719_v47 = vpop.permute.xlu0 %6718  ;;  %4913 = vrot.lane.b32.xlu1 %v4861_v16, %s8935_s2  ;;  %v6727_v63 = vpack.i.bf16 %v4862_v54, %v8644_v4 }
0x1956   : > { %v6721_v30 = vunpack.i.h.bf16 %v6719_v47  ;;  %v6720_v26 = vunpack.i.l.bf16 %v6719_v47 }
0x1958   : > { %v4886_v34 = vsel %vm1009_vm4, %v6721_v30, 0.0  ;;  %v4882_v45 = vsel %vm1009_vm4, %v6720_v26, %v6721_v30  ;;  %6723 = vrot.lane.b32.xlu0 %v6722_v23, %s8930_s16  ;;  %v4885_v58 = vsel %vm1009_vm4, 0.0, %v6720_v26 }
0x1959   : > { %v6737_v6 = vpack.i.bf16 %v4886_v34, %v4882_v45  ;;  %6728 = vrot.lane.b32.xlu1 %v6727_v63, %s8935_s2 }
0x195c   : > { %6738 = vrot.lane.b32.xlu0 %v6737_v6, %s8928_s1 }
0x195d   : > { %6733 = vrot.lane.b32.xlu1 %v6722_v23, %s8929_s7 }
0x1960   : > { %4901 = vrot.lane.b32.xlu0 %v4885_v58, %s8928_s1 }
0x1961   : > { %4889 = vrot.lane.b32.xlu1 %v4872_v25, %s8929_s7 }
0x1964   : > { %4963 = vrot.lane.b32.xlu0 %v4885_v58, %s8931_s15 }
0x1965   : > { %6743 = vrot.lane.b32.xlu1 %v6722_v23, %s8923_s28 }
0x1968   : > { %6748 = vrot.lane.b32.xlu0 %v6737_v6, %s8931_s15 }
0x1969   : > { %4953 = vrot.lane.b32.xlu1 %v4872_v25, %s8923_s28 }
0x196c   : > { %6758 = vrot.lane.b32.xlu0 %v6727_v63, %s8934_s0 }
0x196d   : > { %6753 = vrot.lane.b32.xlu1 %v6737_v6, %s8933_s10 }
0x1970   : > { %4943 = vrot.lane.b32.xlu0 %v4861_v16, %s8934_s0 }
0x1971   : > { %4933 = vrot.lane.b32.xlu1 %v4885_v58, %s8933_s10 }
0x1975   : > { %5104 = vperm.xlu1 %6046, %v5101_v38  }
0x19c6   : > { %v4924_v57 = vpop.permute.xlu0 %4923 }
0x19c7   : > { %v4914_v29 = vpop.permute.xlu1 %4913 }
0x19ca   : > { %v6724_v53 = vpop.permute.xlu0 %6723 }
0x19cb   : > { %v6726_v14 = vunpack.i.h.bf16 %v6724_v53  ;;  %v6725_v17 = vunpack.i.l.bf16 %v6724_v53  ;;  %v6729_v1 = vpop.permute.xlu1 %6728 }
0x19cc   : > { %v6731_v2 = vunpack.i.h.bf16 %v6729_v1  ;;  %v6730_v39 = vunpack.i.l.bf16 %v6729_v1  ;;  %v8695_v1 = vpack.c.bf16 %v8644_v4, %v8571_v15 }
0x19cd   : > { %v4929_v62 = vsel %vm1085_vm10, %v4924_v57, %v6725_v17  ;;  %v4930_v16 = vsel %vm1085_vm10, %v6725_v17, %v6726_v14 }
0x19ce   : > { %v4919_v60 = vsel %vm1074_vm11, %v4914_v29, %v6730_v39  ;;  %v6739_v25 = vpop.permute.xlu0 %6738  ;;  %v4920_v54 = vsel %vm1074_vm11, %v6730_v39, %v6731_v2  ;;  %v8701_v39 = vpack.c.bf16 %v8636_v43, %v8574_v35 }
0x19cf   : > { %v8678_v47 = vpack.c.bf16 %v4929_v62, %v4919_v60  ;;  %v6741_v23 = vunpack.i.h.bf16 %v6739_v25  ;;  %v6740_v30 = vunpack.i.l.bf16 %v6739_v25  ;;  %v6734_v26 = vpop.permute.xlu1 %6733  ;;  %v8680_v63 = vpack.c.bf16 %v4930_v16, %v4920_v54 }
0x19d0   : > { %v6736_v34 = vunpack.i.h.bf16 %v6734_v26  ;;  %v6735_v45 = vunpack.i.l.bf16 %v6734_v26 }
0x19d1   : > { %5136 = vmatprep.subr.bf16.mxu1 %v8680_v63  ;;  %v4908_v44 = vsel %vm1061_vm12, %v6740_v30, %v6741_v23 }
0x19d2   : > { %v4902_v6 = vpop.permute.xlu0 %4901  ;;  %5137 = vmatpush2.bf16.msra.mxu1 %v8678_v47  ;;  %v4896_v58 = vsel %vm1048_vm13, %v6735_v45, %v6736_v34 }
0x19d3   : > { %v4890_v38 = vpop.permute.xlu1 %4889  ;;  %v8686_v57 = vpack.c.bf16 %v4908_v44, %v4896_v58  ;;  %v4907_v29 = vsel %vm1061_vm12, %v4902_v6, %v6740_v30 }
0x19d4   : > { %v4895_v53 = vsel %vm1048_vm13, %v4890_v38, %v6735_v45 }
0x19d5   : > { %v8690_v14 = vpack.c.bf16 %v4907_v29, %v4895_v53  ;;  %5138 = vmatprep.subr.bf16.mxu1 %v8686_v57 }
0x19d6   : > { %v4964_v17 = vpop.permute.xlu0 %4963 }
0x19d7   : > { %v6744_v2 = vpop.permute.xlu1 %6743  ;;  %5139 = vmatpush2.bf16.msra.mxu1 %v8690_v14 }
0x19d8   : > { %5140 = vmatprep.subr.bf16.mxu1 %v8695_v1  ;;  %v6746_v62 = vunpack.i.h.bf16 %v6744_v2  ;;  %v6745_v60 = vunpack.i.l.bf16 %v6744_v2 }
0x19da   : > { %v6749_v25 = vpop.permute.xlu0 %6748  ;;  %v4960_v30 = vsel %vm1118_vm6, %v6745_v60, %v6746_v62 }
0x19db   : > { %v6751_v54 = vunpack.i.h.bf16 %v6749_v25  ;;  %v6750_v16 = vunpack.i.l.bf16 %v6749_v25  ;;  %v4954_v23 = vpop.permute.xlu1 %4953  ;;  %5915 = vmatpush2.bf16.msk.msra.mxu1 %vm7296_vm3, %v8701_v39 }
0x19dc   : > { %v4959_v15 = vsel %vm1118_vm6, %v4954_v23, %v6745_v60  ;;  %5142 = vmatprep.subr.bf16.mxu1 %v8589_v50  ;;  %v5747_v23 = vcombine.low %v8668_v24, %v8668_v24 }
0x19dd   : > { %v4969_v4 = vsel %vm1129_vm5, %v4964_v17, %v6750_v16  ;;  %v4970_v35 = vsel %vm1129_vm5, %v6750_v16, %v6751_v54  ;;  %v6842_v16 = vld [vmem:[%s8942_s3 + $0x8] ss:$0 sps:$4 sm:$0xff]  }
0x19de   : > { %v8711_v43 = vpack.c.bf16 %v4969_v4, %v4959_v15  ;;  %v6759_v26 = vpop.permute.xlu0 %6758  ;;  %v8713_v34 = vpack.c.bf16 %v4970_v35, %v4960_v30 }
0x19df   : > { %v6761_v45 = vunpack.i.h.bf16 %v6759_v26  ;;  %v6760_v6 = vunpack.i.l.bf16 %v6759_v26  ;;  %v6754_v58 = vpop.permute.xlu1 %6753  ;;  %5143 = vmatpush2.bf16.msra.mxu1 %v8587_v18 }
0x19e0   : > { %v6756_v44 = vunpack.i.h.bf16 %v6754_v58  ;;  %v6755_v38 = vunpack.i.l.bf16 %v6754_v58  ;;  %5173 = vmatprep.subr.bf16.mxu0 %v8713_v34  ;;  %5144 = vmatprep.subr.bf16.mxu1 %v8594_v51 }
0x19e1   : > { %5174 = vmatpush1.bf16.msra.mxu0 %v8711_v43  ;;  %v4950_v17 = vsel %vm1107_vm8, %v6760_v6, %v6761_v45 }
0x19e2   : > { %v4944_v29 = vpop.permute.xlu0 %4943  ;;  %v4940_v53 = vsel %vm1096_vm7, %v6755_v38, %v6756_v44 }
0x19e3   : > { %v4934_v2 = vpop.permute.xlu1 %4933  ;;  %5145 = vmatpush2.bf16.msra.mxu1 %v8599_v20  ;;  %v8722_v62 = vpack.c.bf16 %v4950_v17, %v4940_v53  ;;  %v4949_v60 = vsel %vm1107_vm8, %v4944_v29, %v6760_v6 }
0x19e4   : > { %v4939_v25 = vsel %vm1096_vm7, %v4934_v2, %v6755_v38  ;;  %5146 = vmatprep.subr.bf16.mxu1 %v8608_v5  ;;  %v5486_v2 = vld [vmem:[%s7061_s6] sm:$0xff] }
0x19e5   : > { %v8727_v54 = vpack.c.bf16 %v4949_v60, %v4939_v25  ;;  %5175 = vmatprep.subr.bf16.mxu0 %v8722_v62 }
0x19e7   : > { %5147 = vmatpush2.bf16.msra.mxu1 %v8606_v32  ;;  %5176 = vmatpush1.bf16.msra.mxu0 %v8727_v54 }
0x19e8   : > { %5148 = vmatprep.subr.bf16.mxu1 %v8618_v0  ;;  %5511 = vmatprep.subr.bf16.mxu0 %v8426_v19 }
0x19ea   : > { %5750 = vmatmul.mubr.msk.bf16.vlgmr.msra.gmra.mxu0 %vm8943_vm2, %v6842_v16 }
0x19eb   : > { %5919 = vmatpush2.bf16.msk.msra.mxu1 %vm7195_vm0, %v8615_v8  ;;  %5512 = vmatpush1.bf16.msra.mxu0 %v8424_v55 }
0x19ec   : > { %5150 = vmatprep.subr.bf16.mxu1 %v8488_v27  ;;  %5513 = vmatprep.subr.bf16.mxu0 %v8434_v56 }
0x19ef   : > { %5151 = vmatpush2.bf16.msra.mxu1 %v8499_v48  ;;  %5514 = vmatpush1.bf16.msra.mxu0 %v8438_v22 }
0x19f0   : > { %5515 = vmatprep.subr.bf16.mxu0 %v8446_v61 }
0x19f2   : > { %5153 = vmatmul.mubr.bf16.vlgmr.msra.gmra.mxu1 %v5747_v23 }
0x19f3   : > { %5516 = vmatpush1.bf16.msra.mxu0 %v8450_v3  ;;  %5584 = vmatprep.mubr.bf16.mxu1 %v6900_v41  ;;  %v5484_v41 = vld [vmem:[%s7056_s4] sm:$0xff] }
0x19f4   : > { %5517 = vmatprep.subr.bf16.mxu0 %v8456_v28  ;;  %v5751_v36 = vcombine.low %v5484_v41, %v5484_v41 }
0x19f7   : > { %5923 = vmatpush1.bf16.msk.msra.mxu0 %vm7296_vm3, %v8464_v7 }
0x19f8   : > { %5519 = vmatprep.subr.bf16.mxu0 %v8337_v42 }
0x19fb   : > { %5520 = vmatpush1.bf16.msra.mxu0 %v8335_v37  ;;  %v5752_v37 = vcombine.high %v5484_v41, %v5484_v41 }
0x19fc   : > { %5521 = vmatprep.subr.bf16.mxu0 %v8341_v49 }
0x19fd   : > { %5543 = vmatprep.mubr.bf16.mxu0 %v5752_v37 }
0x19ff   : > { %5522 = vmatpush1.bf16.msra.mxu0 %v8347_v59 }
0x1a00   : > { %5523 = vmatprep.subr.bf16.mxu0 %v8356_v33  ;;  %v5105_v33 = vpop.permute.xlu1 %5104 }
0x1a03   : > { %5524 = vmatpush1.bf16.msra.mxu0 %v8354_v21 }
0x1a04   : > { %5525 = vmatprep.subr.bf16.mxu0 %v8363_v11 }
0x1a07   : > { %5927 = vmatpush1.bf16.msk.msra.mxu0 %vm7195_vm0, %v8366_v40 }
0x1a08   : > { %5527 = vmatprep.subr.bf16.mxu0 %v8680_v63 }
0x1a0b   : > { %5528 = vmatpush2.bf16.msra.mxu0 %v8678_v47 }
0x1a0c   : > { %5529 = vmatprep.subr.bf16.mxu0 %v8686_v57 }
0x1a0f   : > { %5530 = vmatpush2.bf16.msra.mxu0 %v8690_v14 }
0x1a10   : > { %5531 = vmatprep.subr.bf16.mxu0 %v8695_v1 }
0x1a13   : > { %5931 = vmatpush2.bf16.msk.msra.mxu0 %vm7296_vm3, %v8701_v39 }
0x1a14   : > { %5533 = vmatprep.subr.bf16.mxu0 %v8589_v50 }
0x1a17   : > { %5534 = vmatpush2.bf16.msra.mxu0 %v8587_v18 }
0x1a18   : > { %5535 = vmatprep.subr.bf16.mxu0 %v8594_v51 }
0x1a1b   : > { %5536 = vmatpush2.bf16.msra.mxu0 %v8599_v20 }
0x1a1c   : > { %5537 = vmatprep.subr.bf16.mxu0 %v8608_v5 }
0x1a1f   : > { %5538 = vmatpush2.bf16.msra.mxu0 %v8606_v32 }
0x1a20   : > { %5539 = vmatprep.subr.bf16.mxu0 %v8618_v0 }
0x1a23   : > { %5935 = vmatpush2.bf16.msk.msra.mxu0 %vm7195_vm0, %v8615_v8 }
0x1a24   : > { %5541 = vmatprep.subr.bf16.mxu0 %v8488_v27 }
0x1a27   : > { %5542 = vmatpush2.bf16.msra.mxu0 %v8499_v48 }
0x1a2a   : > { %5544 = vmatmul.mubr.bf16.vlgmr.msra.gmra.mxu0 %v5751_v36 }
0x1aaa   : > { %v5195_v42 = vpop.f32.mrf.mxu0 }
0x1aac   : > { %v5197_v49 = vpop.f32.mrf.mxu0 }
0x1aae   : > { %v5199_v59 = vpop.f32.mrf.mxu0 }
0x1ab0   : > { %v5200_v21 = vpop.f32.mrf.mxu0 }
0x1ab2   : > { %v5154_v11 = vpop.f32.mrf.mxu1 }
0x1ab3   : > { %v5155_v40 = vadd.f32 %v5154_v11, %v5105_v33 }
0x1ab4   : > { %v5156_v55 = vpop.f32.mrf.mxu1 }
0x1ab5   : > { %v5196_v19 = vadd.f32 %v5195_v42, %v5155_v40  ;;  %v5157_v56 = vadd.f32 %v5156_v55, %v5105_v33 }
0x1ab6   : > { %v5158_v22 = vpop.f32.mrf.mxu1 }
0x1ab7   : > { %v5202_v61 = vmul.f32 0.2, %v5196_v19  ;;  %v5198_v3 = vadd.f32 %v5197_v49, %v5157_v56 }
0x1ab8   : > { %v5159_v28 = vpop.f32.mrf.mxu1 }
0x1ab9   : > { %v5204_v7 = vmax.f32 %v5196_v19, %v5202_v61  ;;  %v5203_v27 = vmul.f32 0.2, %v5198_v3 }
0x1abb   : > { %v5205_v48 = vmax.f32 %v5198_v3, %v5203_v27  ;;  %v5206_v18 = vmul.f32 %v7088_v10, %v5204_v7  ;;  %v5231_v50 = vmul.f32 %v7086_v9, %v5204_v7 }
0x1abd   : > { %v5207_v51 = vmul.f32 %v7094_v13, %v5205_v48  ;;  %v5232_v20 = vmul.f32 %v7092_v12, %v5205_v48  ;;  %v6772_v8 = vpack.i.bf16 %v5205_v48, %v5204_v7 }
0x1abf   : > { %v6762_v32 = vpack.i.bf16 %v5232_v20, %v5231_v50  ;;  %v6767_v5 = vpack.i.bf16 %v5207_v51, %v5206_v18 }
0x1ac1   : > { %6763 = vrot.lane.b32.xlu0 %v6762_v32, %s8926_s18  ;;  %6768 = vrot.lane.b32.xlu1 %v6767_v5, %s8926_s18 }
0x1ac5   : > { %6773 = vrot.lane.b32.xlu0 %v6772_v8, %s8926_s18 }
0x1aea   : > { %v8819_v29 = vpop.f32.mrf.mxu0 }
0x1aec   : > { %v8823_v53 = vpop.f32.mrf.mxu0 }
0x1aee   : > { %v5549_v17 = vpop.f32.mrf.mxu0 }
0x1af0   : > { %v5550_v60 = vpop.f32.mrf.mxu0 }
0x1b33   : > { %v6764_v0 = vpop.permute.xlu0 %6763  ;;  %v6769_v24 = vpop.permute.xlu1 %6768 }
0x1b34   : > { %v8791_v57 = vunpack.i.l.bf16 %v6769_v24  ;;  %v6766_v1 = vunpack.i.h.bf16 %v6764_v0  ;;  %v6765_v39 = vunpack.i.l.bf16 %v6764_v0  ;;  %v6771_v30 = vunpack.i.h.bf16 %v6769_v24 }
0x1b36   : > { %v5218_v15 = vsel %vm1009_vm4, 0.0, %v8791_v57  ;;  %v5239_v4 = vsel %vm1009_vm4, %v6765_v39, %v6766_v1  ;;  %v5243_v35 = vsel %vm1009_vm4, %v6766_v1, 0.0  ;;  %v5242_v26 = vsel %vm1009_vm4, 0.0, %v6765_v39 }
0x1b37   : > { %v6774_v47 = vpop.permute.xlu0 %6773  ;;  %v6787_v45 = vpack.i.bf16 %v5239_v4, %v5242_v26  ;;  %v5219_v6 = vsel %vm1009_vm4, %v6771_v30, 0.0  ;;  %v8810_v58 = vsel %vm1009_vm4, %v8791_v57, %v6771_v30  ;;  %v6797_v38 = vpack.i.bf16 %v5243_v35, %v5239_v4 }
0x1b38   : > { %v6776_v63 = vunpack.i.h.bf16 %v6774_v47  ;;  %v6775_v10 = vunpack.i.l.bf16 %v6774_v47  ;;  %v6792_v44 = vpack.i.bf16 %v5219_v6, %v8810_v58 }
0x1b3a   : > { %v5230_v9 = vsel %vm1009_vm4, %v6776_v63, 0.0  ;;  %v5226_v12 = vsel %vm1009_vm4, %v6775_v10, %v6776_v63  ;;  %v5229_v13 = vsel %vm1009_vm4, 0.0, %v6775_v10 }
0x1b3b   : > { %5310 = vrot.lane.b32.xlu0 %v5229_v13, %s8923_s28  ;;  %5280 = vrot.lane.b32.xlu1 %v5229_v13, %s8930_s16  ;;  %v6777_v14 = vpack.i.bf16 %v5230_v9, %v5226_v12 }
0x1b3f   : > { %6778 = vrot.lane.b32.xlu0 %v6777_v14, %s8923_s28  ;;  %5300 = vrot.lane.b32.xlu1 %v5218_v15, %s8934_s0  ;;  %s8944_s28 = sshll.u32 %s8946_s23, 4 }
0x1b43   : > { %5324 = vrot.lane.b32.xlu0 %v5243_v35, %s8931_s15  ;;  %6783 = vrot.lane.b32.xlu1 %v6777_v14, %s8930_s16 }
0x1b47   : > { %5290 = vrot.lane.b32.xlu0 %v5242_v26, %s8933_s10  ;;  %6788 = vrot.lane.b32.xlu1 %v6787_v45, %s8931_s15 }
0x1b4b   : > { %6798 = vrot.lane.b32.xlu0 %v6797_v38, %s8933_s10  ;;  %6793 = vrot.lane.b32.xlu1 %v6792_v44, %s8934_s0 }
0x1b4f   : > { %6808 = vrot.lane.b32.xlu0 %v6792_v44, %s8935_s2  ;;  %5258 = vrot.lane.b32.xlu1 %v5242_v26, %s8928_s1 }
0x1b53   : > { %5270 = vrot.lane.b32.xlu0 %v5218_v15, %s8935_s2  ;;  %6803 = vrot.lane.b32.xlu1 %v6797_v38, %s8928_s1  ;;  %s958_s1 = scalar_lea.vmem %s7066_s20, %s8944_s28 }
0x1b57   : > { %5246 = vrot.lane.b32.xlu0 %v5229_v13, %s8929_s7  ;;  %6813 = vrot.lane.b32.xlu1 %v6777_v14, %s8929_s7 }
0x1b5b   : > { %5489 = vperm.xlu1 %6046, %v5486_v2  }
0x1bad   : > { %v5311_v25 = vpop.permute.xlu0 %5310  ;;  %v5281_v16 = vpop.permute.xlu1 %5280 }
0x1bb1   : > { %v6779_v23 = vpop.permute.xlu0 %6778  ;;  %v5301_v41 = vpop.permute.xlu1 %5300 }
0x1bb2   : > { %v6780_v33 = vunpack.i.l.bf16 %v6779_v23  ;;  %v6781_v11 = vunpack.i.h.bf16 %v6779_v23 }
0x1bb4   : > { %v5316_v50 = vsel %vm1118_vm6, %v5311_v25, %v6780_v33  ;;  %v5317_v5 = vsel %vm1118_vm6, %v6780_v33, %v6781_v11 }
0x1bb5   : > { %v5325_v36 = vpop.permute.xlu0 %5324  ;;  %v6784_v37 = vpop.permute.xlu1 %6783 }
0x1bb6   : > { %v6786_v19 = vunpack.i.h.bf16 %v6784_v37  ;;  %v6785_v56 = vunpack.i.l.bf16 %v6784_v37 }
0x1bb8   : > { %v5287_v10 = vsel %vm1085_vm10, %v6785_v56, %v6786_v19  ;;  %v5286_v1 = vsel %vm1085_vm10, %v5281_v16, %v6785_v56  ;;  %v6850_v19 = vld [vmem:[%s7082_s26] sm:$0xff] }
0x1bb9   : > { %v5291_v42 = vpop.permute.xlu0 %5290  ;;  %v6789_v49 = vpop.permute.xlu1 %6788 }
0x1bba   : > { %v6791_v59 = vunpack.i.h.bf16 %v6789_v49  ;;  %v6790_v21 = vunpack.i.l.bf16 %v6789_v49 }
0x1bbc   : > { %v5327_v40 = vsel %vm1129_vm5, %v6791_v59, %v5325_v36  ;;  %v5326_v55 = vsel %vm1129_vm5, %v6790_v21, %v6791_v59 }
0x1bbd   : > { %v5483_v22 = vpack.c.bf16 %v5327_v40, %v5327_v40  ;;  %v6799_v61 = vpop.permute.xlu0 %6798  ;;  %v6794_v3 = vpop.permute.xlu1 %6793  ;;  %v5482_v28 = vpack.c.bf16 %v5326_v55, %v5326_v55 }
0x1bbe   : > { %v6801_v7 = vunpack.i.h.bf16 %v6799_v61  ;;  %v6800_v27 = vunpack.i.l.bf16 %v6799_v61  ;;  %v6796_v48 = vunpack.i.h.bf16 %v6794_v3  ;;  %v6795_v18 = vunpack.i.l.bf16 %v6794_v3 }
0x1bbf   : > { %5754 = vmatprep.subr.msk.bf16.mxu1 %vm1191_vm9, %v5483_v22  ;;  %v5506_v51 = vsel %vm1191_vm9, %v5482_v28, 0 }
0x1bc0   : > { %v5306_v20 = vsel %vm1107_vm8, %v5301_v41, %v6795_v18  ;;  %5555 = vmatpush1.bf16.msra.mxu1 %v5506_v51  ;;  %v5307_v32 = vsel %vm1107_vm8, %v6795_v18, %v6796_v48  ;;  %v5297_v8 = vsel %vm1096_vm7, %v6800_v27, %v6801_v7  ;;  %v5296_v9 = vsel %vm1096_vm7, %v5291_v42, %v6800_v27  ;;  %v6847_v42 = vld [vmem:[%s7056_s4 + $0x8] ss:$0 sps:$4 sm:$0xff]  }
0x1bc1   : > { %v5480_v0 = vpack.c.bf16 %v5316_v50, %v5306_v20  ;;  %v6809_v24 = vpop.permute.xlu0 %6808  ;;  %v5259_v47 = vpop.permute.xlu1 %5258  ;;  %v5481_v63 = vpack.c.bf16 %v5317_v5, %v5307_v32  ;;  %v5479_v12 = vpack.c.bf16 %v5297_v8, %v5287_v10  ;;  %v5478_v4 = vpack.c.bf16 %v5296_v9, %v5286_v1 }
0x1bc2   : > { %v6811_v13 = vunpack.i.h.bf16 %v6809_v24  ;;  %v6810_v14 = vunpack.i.l.bf16 %v6809_v24 }
0x1bc3   : > { %5556 = vmatprep.subr.bf16.mxu1 %v5481_v63 }
0x1bc4   : > { %5557 = vmatpush1.bf16.msra.mxu1 %v5480_v0  ;;  %v5277_v44 = vsel %vm1074_vm11, %v6810_v14, %v6811_v13 }
0x1bc5   : > { %v5271_v39 = vpop.permute.xlu0 %5270  ;;  %v6804_v15 = vpop.permute.xlu1 %6803  ;;  %5558 = vmatprep.subr.bf16.mxu1 %v5479_v12 }
0x1bc6   : > { %v6806_v30 = vunpack.i.h.bf16 %v6804_v15  ;;  %v6805_v35 = vunpack.i.l.bf16 %v6804_v15  ;;  %v5276_v26 = vsel %vm1074_vm11, %v5271_v39, %v6810_v14 }
0x1bc8   : > { %v5264_v45 = vsel %vm1061_vm12, %v5259_v47, %v6805_v35  ;;  %5559 = vmatpush1.bf16.msra.mxu1 %v5478_v4  ;;  %v5265_v6 = vsel %vm1061_vm12, %v6805_v35, %v6806_v30 }
0x1bc9   : > { %v5476_v38 = vpack.c.bf16 %v5276_v26, %v5264_v45  ;;  %v6814_v17 = vpop.permute.xlu1 %6813  ;;  %v5477_v2 = vpack.c.bf16 %v5277_v44, %v5265_v6  ;;  %v5247_v16 = vpop.permute.xlu0 %5246 }
0x1bca   : > { %v6816_v60 = vunpack.i.h.bf16 %v6814_v17  ;;  %v6815_v25 = vunpack.i.l.bf16 %v6814_v17 }
0x1bcb   : > { %5560 = vmatprep.subr.bf16.mxu1 %v5477_v2 }
0x1bcc   : > { %v5252_v23 = vsel %vm1048_vm13, %v5247_v16, %v6815_v25  ;;  %5561 = vmatpush1.bf16.msra.mxu1 %v5476_v38  ;;  %v5253_v41 = vsel %vm1048_vm13, %v6815_v25, %v6816_v60 }
0x1bcd   : > { %v5938_v36 = vpack.c.bf16 %v5252_v23, %v8791_v57  ;;  %v5475_v37 = vpack.c.bf16 %v5253_v41, %v8810_v58 }
0x1bcf   : > { %5562 = vmatprep.subr.bf16.mxu1 %v5475_v37 }
0x1bd0   : > { %5939 = vmatpush1.bf16.msk.msra.mxu1 %vm7195_vm0, %v5938_v36 }
0x1bd1   : > { %5564 = vmatprep.subr.bf16.mxu1 %v8713_v34 }
0x1bd4   : > { %5565 = vmatpush1.bf16.msra.mxu1 %v8711_v43 }
0x1bd5   : > { %5566 = vmatprep.subr.bf16.mxu1 %v8722_v62 }
0x1bd6   : > { %v5490_v57 = vpop.permute.xlu1 %5489 }
0x1bd7   : > { %v5546_v58 = vadd.f32 %v8819_v29, %v5490_v57  ;;  %v5548_v46 = vadd.f32 %v8823_v53, %v5490_v57  ;;  %v6851_v53 = vld [vmem:[%s7082_s26 + $0x8] sm:$0xff] }
0x1bd8   : > { %5567 = vmatpush1.bf16.msra.mxu1 %v8727_v54 }
0x1bdb   : > { %5755 = vmatmul.mubr.msk.bf16.vlgmr.msra.gmra.mxu1 %vm2447_vm15, %v6847_v42 }
0x1c9b   : > { %v5586_v49 = vpop.f32.mrf.mxu1 }
0x1c9c   : > { %v5587_v34 = vadd.f32 %v5586_v49, %v5546_v58 }
0x1c9d   : > { %v5588_v59 = vpop.f32.mrf.mxu1 }
0x1c9e   : > { %v5593_v43 = vmul.f32 0.2, %v5587_v34  ;;  %v5589_v21 = vadd.f32 %v5588_v59, %v5548_v46 }
0x1c9f   : > { %v5590_v62 = vpop.f32.mrf.mxu1 }
0x1ca0   : > { %v5595_v33 = vadd.f32 %v5593_v43, %v8267_v31  ;;  %v5594_v54 = vmul.f32 0.2, %v5589_v21 }
0x1ca1   : > { %v5591_v11 = vpop.f32.mrf.mxu1 }
0x1ca2   : > { %v5597_v40 = vmul.f32 0.2, %v5595_v33  ;;  %v5596_v55 = vadd.f32 %v5594_v54, %v8270_v52 }
0x1ca4   : > { %v5599_v29 = vadd.f32 %v6850_v19, %v5597_v40  ;;  %v5598_v56 = vmul.f32 0.2, %v5596_v55 }
0x1ca6   : > { %5601 = vst [vmem:[%s958_s1] sm:$0xff] %v5599_v29  ;;  %v5600_v22 = vadd.f32 %v6851_v53, %v5598_v56 }
0x1ca8   : > { %5602 = vst [vmem:[%s958_s1 + $0x8] sm:$0xff] %v5600_v22 }
0x1ca9 PF: > { %s73_s22 = sadd.s32 1, %s6858_s22  }
0x1caa   : > { %p70_p4 = scmp.ge.s32.totalorder %s73_s22, 4  }
0x1cac   :  { %72 = sbr.rel (!%p70_p4) target bundleno = 51 (0x33), region = 205 }

</bundles_post_ra>
